<compile_context>
chip_gen: v7x
topology: tpu7x:2x2x1
jax: 0.10.0
libtpu: 0.0.40
codegen_flags: <defaults>
</compile_context>

<pallas_src>
import math

import jax
import jax.numpy as jnp
import numpy as np
from jax.experimental import pallas as pl
from jax.experimental.pallas import tpu as pltpu

EPS = 1e-6            # VNLeakyReLU epsilon
LEAKY_SCA = 0.01      # nn.LeakyReLU() default slope
LEAKY_VEC = 0.2       # VNLeakyReLU default slope
MAX_ROW_TILE = 512    # upper bound on focal rows per grid step
MM_DTYPE = jnp.bfloat16   # matmul operand dtype (accumulation stays f32)


# ==========================================================================
# Kernel-side math (feature-major layout: scalars (S, T), vectors (3V, T))
# ==========================================================================
def _gv_linear_fm(sca, vec_flat, wv1_bd, wv2_bd, ws_t, wg_t, bg):
    """GVLinear, feature-major, fused scalar path.

    sca:      (Sin, T)      f32
    vec_flat: (3*Vin, T)    f32
    wv1_bd:   (3H, 3Vin)    bf16  block-diag of wv1.T
    wv2_bd:   (3Vout, 3H)   bf16  block-diag of wv2.T
    ws_t:     (Sout, H+Sin) bf16  [ws_v ; ws_s].T
    wg_t:     (Vout, Sout)  bf16
    bg:       (Vout, 1)     f32
    returns out_sca (Sout, T) f32, out_vec (3*Vout, T) f32
    """
    t = sca.shape[1]
    h = wv1_bd.shape[0] // 3
    vout = wv2_bd.shape[0] // 3

    vi = jnp.dot(wv1_bd, vec_flat.astype(MM_DTYPE),
                 preferred_element_type=jnp.float32)                 # (3H, T)
    vi3 = vi.reshape(3, h, t)
    # spatial norm: plain elementwise adds (no cross-sublane reduction)
    vec_norm = jnp.sqrt(vi3[0] * vi3[0] + vi3[1] * vi3[1] + vi3[2] * vi3[2])

    feat = jnp.concatenate([vec_norm, sca], axis=0)                  # (H+Sin, T)
    out_sca = jnp.dot(ws_t, feat.astype(MM_DTYPE),
                      preferred_element_type=jnp.float32)            # (Sout, T)

    out_vec = jnp.dot(wv2_bd, vi.astype(MM_DTYPE),
                      preferred_element_type=jnp.float32)            # (3Vout, T)
    gate = jax.nn.sigmoid(jnp.dot(wg_t, out_sca.astype(MM_DTYPE),
                                  preferred_element_type=jnp.float32) + bg)
    out_vec = (out_vec.reshape(3, vout, t) * gate[None, :, :]).reshape(3 * vout, t)
    return out_sca, out_vec


def _vn_leaky_relu_fm(vec_flat, wd_bd, slope=LEAKY_VEC):
    """VNLeakyReLU, feature-major.  vec_flat: (3V, T) f32, wd_bd: (3V, 3V) bf16."""
    three_v, t = vec_flat.shape
    v = three_v // 3
    d = jnp.dot(wd_bd, vec_flat.astype(MM_DTYPE),
                preferred_element_type=jnp.float32)                  # (3V, T)
    x3 = vec_flat.reshape(3, v, t)
    d3 = d.reshape(3, v, t)
    dotprod = x3[0] * d3[0] + x3[1] * d3[1] + x3[2] * d3[2]          # (V, T)
    d_norm_sq = d3[0] * d3[0] + d3[1] * d3[1] + d3[2] * d3[2]
    neg = x3 - (dotprod / (d_norm_sq + EPS))[None, :, :] * d3
    kept = jnp.where((dotprod >= 0)[None, :, :], x3, neg)
    return (slope * x3 + (1.0 - slope) * kept).reshape(three_v, t)


def position_predictor_kernel(sca_ref, vec_ref, pos_ref, *refs):
    w_refs = refs[:-4]
    rel_ref, abs_ref, sig_ref, pi_ref = refs[-4:]

    g0 = [r[...] for r in w_refs[0:5]]         # gvp[0] GVLinear
    wd_bd = w_refs[5][...]                     # gvp[0] VNLeakyReLU direction
    g1 = [r[...] for r in w_refs[6:11]]        # gvp[1] GVLinear
    head = [r[...] for r in w_refs[11:16]]     # fused mu|logsigma|pi GVLinear

    sca = sca_ref[...]                         # (Sin, T)
    vec = vec_ref[...]                         # (3, Vin, T)
    t = sca.shape[1]
    vec_flat = vec.reshape(-1, t)              # (3*Vin, T)

    # gvp[0] = GVPerceptronVN
    s, v = _gv_linear_fm(sca, vec_flat, *g0)
    v = _vn_leaky_relu_fm(v, wd_bd)
    s = jnp.where(s >= 0, s, LEAKY_SCA * s)
    # gvp[1] = GVLinear
    s, v = _gv_linear_fm(s, v, *g1)
    # fused heads: out_v = [rel_mu | logsigma], out_s = [mu_sca | ls_sca | pi_logits]
    out_s, out_v = _gv_linear_fm(s, v, *head)       # (3K, T), (3*2K, T)

    # in-kernel epilogue (EUP/XLU slots are idle here)
    k = pi_ref.shape[0]
    out_v3 = out_v.reshape(3, 2 * k, t)
    rel_mu = out_v3[:, :k, :]                                    # (3, K, T)
    abs_mu = rel_mu + pos_ref[...][:, None, :]                   # + (3, 1, T)
    sigma = jnp.exp(out_v3[:, k:, :])

    logits = out_s[2 * k:, :]                                    # (K, T)
    m = jnp.max(logits, axis=0, keepdims=True)
    e = jnp.exp(logits - m)
    pi = e / jnp.sum(e, axis=0, keepdims=True)

    rel_ref[...] = rel_mu
    abs_ref[...] = abs_mu
    sig_ref[...] = sigma
    pi_ref[...] = pi


# ==========================================================================
# Host-side parameter preprocessing (transpose, block-diag over space,
# scalar-path fusion, head fusion, bf16 cast)
# ==========================================================================
def _block_diag3(w):
    a, b = w.shape
    out = jnp.zeros((3 * a, 3 * b), w.dtype)
    out = out.at[0:a, 0:b].set(w)
    out = out.at[a:2 * a, b:2 * b].set(w)
    out = out.at[2 * a:3 * a, 2 * b:3 * b].set(w)
    return out


def _gv_kernel_weights(wv1, wv2, ws, wg, bg):
    """torch-structured GVLinear params -> feature-major kernel weights."""
    return [_block_diag3(wv1.T).astype(MM_DTYPE),    # (3H, 3Vin)
            _block_diag3(wv2.T).astype(MM_DTYPE),    # (3Vout, 3H)
            ws.T.astype(MM_DTYPE),                   # (Sout, H+Sin)
            wg.T.astype(MM_DTYPE),                   # (Vout, Sout)
            bg.T.astype(jnp.float32)]                # (Vout, 1)


def preprocess_params(params):
    """Original 26 torch-structured arrays -> 16 kernel weight arrays."""
    it = iter(params)
    take = lambda n: [next(it) for _ in range(n)]

    g0 = take(5)
    (wd,) = take(1)
    g1 = take(5)
    mu, ls, pi = take(5), take(5), take(5)

    def parts(p):
        wv1, wv2, ws, wg, bg = p
        h = wv1.shape[1]
        return wv1, wv2, ws[:h], ws[h:], wg, bg, h

    wv1_m, wv2_m, wsv_m, wss_m, wg_m, bg_m, h_m = parts(mu)
    wv1_l, wv2_l, wsv_l, wss_l, wg_l, bg_l, h_l = parts(ls)
    wv1_p, wv2_p, wsv_p, wss_p, wg_p, bg_p, h_p = parts(pi)

    sm, sl, sp = wsv_m.shape[1], wsv_l.shape[1], wsv_p.shape[1]   # scalar widths
    vm, vl = wv2_m.shape[1], wv2_l.shape[1]                       # vector widths
    H, S3, V2 = h_m + h_l + h_p, sm + sl + sp, vm + vl

    wv1_cat = jnp.concatenate([wv1_m, wv1_l, wv1_p], axis=1)      # (Vin, H)

    wv2_cat = jnp.zeros((H, V2), jnp.float32)                     # pi vec out dropped
    wv2_cat = wv2_cat.at[0:h_m, 0:vm].set(wv2_m)
    wv2_cat = wv2_cat.at[h_m:h_m + h_l, vm:vm + vl].set(wv2_l)

    wsv_cat = jnp.zeros((H, S3), jnp.float32)
    wsv_cat = wsv_cat.at[0:h_m, 0:sm].set(wsv_m)
    wsv_cat = wsv_cat.at[h_m:h_m + h_l, sm:sm + sl].set(wsv_l)
    wsv_cat = wsv_cat.at[h_m + h_l:H, sm + sl:S3].set(wsv_p)
    wss_cat = jnp.concatenate([wss_m, wss_l, wss_p], axis=1)      # (Sin, S3)
    ws_cat = jnp.concatenate([wsv_cat, wss_cat], axis=0)          # (H+Sin, S3)

    wg_cat = jnp.zeros((S3, V2), jnp.float32)
    wg_cat = wg_cat.at[0:sm, 0:vm].set(wg_m)
    wg_cat = wg_cat.at[sm:sm + sl, vm:vm + vl].set(wg_l)
    bg_cat = jnp.concatenate([bg_m, bg_l], axis=1)                # (1, 2K)

    out = []
    out += _gv_kernel_weights(*g0)
    out.append(_block_diag3(wd.T).astype(MM_DTYPE))
    out += _gv_kernel_weights(*g1)
    out += _gv_kernel_weights(wv1_cat, wv2_cat, ws_cat, wg_cat, bg_cat)
    return out


# ==========================================================================
# Wrapper
# ==========================================================================
def _choose_row_tile(nf, max_tile=MAX_ROW_TILE):
    # biggest 128-multiple tile that still leaves >= 2 grid steps when Nf allows
    # it (v7x: 2 TensorCores, grid axis is "parallel"); minimum one lane tile.
    half = pl.cdiv(pl.cdiv(nf, 2), 128) * 128
    return int(max(128, min(max_tile, half)))


def position_predictor_forward(h_sca, h_vec, idx_focal, pos_compose, params,
                               n_component, max_row_tile=MAX_ROW_TILE):
    K = n_component
    kparams = preprocess_params(params)

    # --- glue: data-dependent gather of focal rows stays in plain JAX ---
    sca_f = h_sca[idx_focal].astype(jnp.float32)                  # (Nf, S)
    vec_f = h_vec[idx_focal].astype(jnp.float32)                  # (Nf, V, 3) torch
    pos_f = pos_compose[idx_focal].astype(jnp.float32)            # (Nf, 3)

    nf = sca_f.shape[0]
    if nf == 0:                                                   # empty-grid guard
        z3 = jnp.zeros((0, K, 3), jnp.float32)
        return z3, z3, z3, jnp.zeros((0, K), jnp.float32)

    row_tile = _choose_row_tile(nf, max_row_tile)
    n_pad = pl.cdiv(nf, row_tile) * row_tile
    pad = n_pad - nf

    # feature-major, rows-on-lanes
    sca_p = jnp.pad(sca_f.T, ((0, 0), (0, pad)))                           # (S, Np)
    vec_p = jnp.pad(jnp.transpose(vec_f, (2, 1, 0)),
                    ((0, 0), (0, 0), (0, pad)))                            # (3, V, Np)
    pos_p = jnp.pad(pos_f.T, ((0, 0), (0, pad)))                           # (3, Np)

    S, V = sca_p.shape[0], vec_p.shape[1]
    grid = (n_pad // row_tile,)

    def wspec(w):
        return pl.BlockSpec(w.shape, lambda i: (0, 0))

    in_specs = ([pl.BlockSpec((S, row_tile), lambda i: (0, i)),
                 pl.BlockSpec((3, V, row_tile), lambda i: (0, 0, i)),
                 pl.BlockSpec((3, row_tile), lambda i: (0, i))]
                + [wspec(w) for w in kparams])
    out_specs = [pl.BlockSpec((3, K, row_tile), lambda i: (0, 0, i)),
                 pl.BlockSpec((3, K, row_tile), lambda i: (0, 0, i)),
                 pl.BlockSpec((3, K, row_tile), lambda i: (0, 0, i)),
                 pl.BlockSpec((K, row_tile), lambda i: (0, i))]
    out_shape = (jax.ShapeDtypeStruct((3, K, n_pad), jnp.float32),
                 jax.ShapeDtypeStruct((3, K, n_pad), jnp.float32),
                 jax.ShapeDtypeStruct((3, K, n_pad), jnp.float32),
                 jax.ShapeDtypeStruct((K, n_pad), jnp.float32))

    rel, absm, sig, pi = pl.pallas_call(
        position_predictor_kernel,
        out_shape=out_shape,
        grid_spec=pltpu.PrefetchScalarGridSpec(
            num_scalar_prefetch=0,
            grid=grid,
            in_specs=in_specs,
            out_specs=out_specs),
        compiler_params=pltpu.CompilerParams(
            dimension_semantics=("parallel",)),
    )(sca_p, vec_p, pos_p, *kparams)

    # --- glue: drop padding, back to torch (N, K, 3) / (N, K) convention ---
    rel_mu = jnp.transpose(rel[:, :, :nf], (2, 1, 0))
    abs_mu = jnp.transpose(absm[:, :, :nf], (2, 1, 0))
    sigma = jnp.transpose(sig[:, :, :nf], (2, 1, 0))
    pi_out = pi[:, :nf].T
    return rel_mu, abs_mu, sigma, pi_out


# ==========================================================================
# Pure-JAX reference (torch-faithful, original parameter structure).
# mm_dtype lets us build a reference whose matmul operands are rounded the
# same way as the kernel's (bf16) for a tight structural comparison.
# ==========================================================================
def _gv_linear_ref(sca, vec, wv1, wv2, ws, wg, bg, mm_dtype=jnp.float32):
    t, _, vin = vec.shape
    h = wv1.shape[1]
    dot = lambda a, b: jnp.dot(a.astype(mm_dtype), b.astype(mm_dtype),
                               preferred_element_type=jnp.float32)
    vec_inter = dot(vec.reshape(t * 3, vin), wv1).reshape(t, 3, h)
    vec_norm = jnp.sqrt(jnp.sum(vec_inter * vec_inter, axis=1))           # (T, H)
    out_sca = dot(vec_norm, ws[:h]) + dot(sca, ws[h:])
    out_vec = dot(vec_inter.reshape(t * 3, h), wv2).reshape(t, 3, -1)
    gate = jax.nn.sigmoid(dot(out_sca, wg) + bg)
    return out_sca, out_vec * gate[:, None, :]


def _vn_leaky_relu_ref(vec, wd, slope=LEAKY_VEC, mm_dtype=jnp.float32):
    t, _, v = vec.shape
    d = jnp.dot(vec.reshape(t * 3, v).astype(mm_dtype), wd.astype(mm_dtype),
                preferred_element_type=jnp.float32).reshape(t, 3, v)
    dotprod = jnp.sum(vec * d, axis=1, keepdims=True)
    mask = (dotprod >= 0).astype(vec.dtype)
    d_norm_sq = jnp.sum(d * d, axis=1, keepdims=True)
    return slope * vec + (1.0 - slope) * (
        mask * vec + (1.0 - mask) * (vec - (dotprod / (d_norm_sq + EPS)) * d))


def reference_forward(h_sca, h_vec, idx_focal, pos_compose, params, n_component,
                      mm_dtype=jnp.float32):
    sca = h_sca[idx_focal].astype(jnp.float32)
    vec = jnp.transpose(h_vec[idx_focal], (0, 2, 1)).astype(jnp.float32)  # (N,3,V)
    pos = pos_compose[idx_focal].astype(jnp.float32)
    it = iter(params)
    take = lambda n: [next(it) for _ in range(n)]
    s, v = _gv_linear_ref(sca, vec, *take(5), mm_dtype=mm_dtype)
    v = _vn_leaky_relu_ref(v, *take(1), mm_dtype=mm_dtype)
    s = jnp.where(s >= 0, s, LEAKY_SCA * s)
    s, v = _gv_linear_ref(s, v, *take(5), mm_dtype=mm_dtype)
    _, rel_mu = _gv_linear_ref(s, v, *take(5), mm_dtype=mm_dtype)         # (N,3,K)
    _, logsig = _gv_linear_ref(s, v, *take(5), mm_dtype=mm_dtype)
    pi_sca, _ = _gv_linear_ref(s, v, *take(5), mm_dtype=mm_dtype)
    sigma = jnp.exp(logsig)
    pi = jax.nn.softmax(pi_sca, axis=-1)
    abs_mu = rel_mu + pos[:, :, None]
    return (jnp.transpose(rel_mu, (0, 2, 1)), jnp.transpose(abs_mu, (0, 2, 1)),
            jnp.transpose(sigma, (0, 2, 1)), pi)


# ==========================================================================
# Deterministic synthetic parameters (torch GVLinear structure)
# ==========================================================================
def gvlinear_params(key, in_s, in_v, out_s, out_v):
    h = max(in_v, out_v)
    k1, k2, k3, k4, k5 = jax.random.split(key, 5)
    sc = lambda fan: 1.0 / math.sqrt(fan)
    wv1 = jax.random.normal(k1, (in_v, h), jnp.float32) * sc(in_v)
    wv2 = jax.random.normal(k2, (h, out_v), jnp.float32) * sc(h)
    ws = jax.random.normal(k3, (h + in_s, out_s), jnp.float32) * sc(h + in_s)
    wg = jax.random.normal(k4, (out_s, out_v), jnp.float32) * sc(out_s)
    bg = jax.random.normal(k5, (1, out_v), jnp.float32) * 0.01
    return [wv1, wv2, ws, wg, bg]


def make_params(key, in_sca, in_vec, num_filters, n_component):
    nf0, nf1 = num_filters
    ks = jax.random.split(key, 6)
    params = []
    params += gvlinear_params(ks[0], in_sca, in_vec, nf0, nf1)            # gvp[0]
    params.append(jax.random.normal(ks[1], (nf1, nf1), jnp.float32)
                  * (1.0 / math.sqrt(nf1)))                               # VNLeakyReLU
    params += gvlinear_params(ks[2], nf0, nf1, nf0, nf1)                  # gvp[1]
    params += gvlinear_params(ks[3], nf0, nf1, n_component, n_component)  # mu_net
    params += gvlinear_params(ks[4], nf0, nf1, n_component, n_component)  # logsigma_net
    params += gvlinear_params(ks[5], nf0, nf1, n_component, 1)            # pi_net
    return params


if __name__ == "__main__":
    in_sca, in_vec = 16, 8
    num_filters = (32, 16)
    n_component = 4
    n_compose, n_focal = 512, 300   # -> 2 row tiles of 256 (multi-step grid)

    root = jax.random.PRNGKey(0)
    kp, kh_s, kh_v, kpos, kidx = jax.random.split(root, 5)

    params = make_params(kp, in_sca, in_vec, num_filters, n_component)
    h_sca = jax.random.normal(kh_s, (n_compose, in_sca), jnp.float32)
    h_vec = jax.random.normal(kh_v, (n_compose, in_vec, 3), jnp.float32)
    pos_compose = jax.random.normal(kpos, (n_compose, 3), jnp.float32)
    idx_focal = jax.random.randint(kidx, (n_focal,), 0, n_compose)

    outs = position_predictor_forward(h_sca, h_vec, idx_focal, pos_compose,
                                      params, n_component)
    outs = jax.block_until_ready(outs)

    # structural parity vs a reference whose matmul operands are rounded to bf16
    refs_bf16 = reference_forward(h_sca, h_vec, idx_focal, pos_compose,
                                  params, n_component, mm_dtype=MM_DTYPE)
    for o, r in zip(outs, refs_bf16):
        np.testing.assert_allclose(np.asarray(o), np.asarray(r),
                                   rtol=1e-2, atol=1e-2)

    # semantic parity vs the full-f32 torch-faithful reference
    # (tolerance widened per review: bf16 MXU operands vs f32 reference)
    refs_f32 = reference_forward(h_sca, h_vec, idx_focal, pos_compose,
                                 params, n_component, mm_dtype=jnp.float32)
    for o, r in zip(outs, refs_f32):
        np.testing.assert_allclose(np.asarray(o), np.asarray(r),
                                   rtol=2e-1, atol=1e-1)

    # shape sanity (torch convention): (N,K,3),(N,K,3),(N,K,3),(N,K)
    assert outs[0].shape == (n_focal, n_component, 3)
    assert outs[1].shape == (n_focal, n_component, 3)
    assert outs[2].shape == (n_focal, n_component, 3)
    assert outs[3].shape == (n_focal, n_component)
    print("KERNEL_OK")
</pallas_src>

<mosaic_0001>
module attributes {stable_mosaic.version = 11 : i64} {
  func.func @position_predictor_kernel(%arg0: i32, %arg1: memref<16x256xf32, #tpu.memory_space<vmem>>, %arg2: memref<3x8x256xf32, #tpu.memory_space<vmem>>, %arg3: memref<3x256xf32, #tpu.memory_space<vmem>>, %arg4: memref<48x24xbf16, #tpu.memory_space<vmem>>, %arg5: memref<48x48xbf16, #tpu.memory_space<vmem>>, %arg6: memref<32x32xbf16, #tpu.memory_space<vmem>>, %arg7: memref<16x32xbf16, #tpu.memory_space<vmem>>, %arg8: memref<16x1xf32, #tpu.memory_space<vmem>>, %arg9: memref<48x48xbf16, #tpu.memory_space<vmem>>, %arg10: memref<48x48xbf16, #tpu.memory_space<vmem>>, %arg11: memref<48x48xbf16, #tpu.memory_space<vmem>>, %arg12: memref<32x48xbf16, #tpu.memory_space<vmem>>, %arg13: memref<16x32xbf16, #tpu.memory_space<vmem>>, %arg14: memref<16x1xf32, #tpu.memory_space<vmem>>, %arg15: memref<144x48xbf16, #tpu.memory_space<vmem>>, %arg16: memref<24x144xbf16, #tpu.memory_space<vmem>>, %arg17: memref<12x80xbf16, #tpu.memory_space<vmem>>, %arg18: memref<8x12xbf16, #tpu.memory_space<vmem>>, %arg19: memref<8x1xf32, #tpu.memory_space<vmem>>, %arg20: memref<3x4x256xf32, #tpu.memory_space<vmem>>, %arg21: memref<3x4x256xf32, #tpu.memory_space<vmem>>, %arg22: memref<3x4x256xf32, #tpu.memory_space<vmem>>, %arg23: memref<4x256xf32, #tpu.memory_space<vmem>>) attributes {dimension_semantics = [#tpu.dimension_semantics<parallel>], iteration_bounds = array<i64: 2>, scalar_prefetch = 0 : i64, scratch_operands = 0 : i64, tpu.core_type = #tpu.core_type<tc>, window_params = [{transform_indices = @transform_0, window_bounds = array<i64: 16, 256>}, {transform_indices = @transform_1, window_bounds = array<i64: 3, 8, 256>}, {transform_indices = @transform_2, window_bounds = array<i64: 3, 256>}, {pipeline_mode = #tpu.pipeline_mode<synchronous>, transform_indices = @transform_3, window_bounds = array<i64: 48, 24>}, {pipeline_mode = #tpu.pipeline_mode<synchronous>, transform_indices = @transform_4, window_bounds = array<i64: 48, 48>}, {pipeline_mode = #tpu.pipeline_mode<synchronous>, transform_indices = @transform_5, window_bounds = array<i64: 32, 32>}, {pipeline_mode = #tpu.pipeline_mode<synchronous>, transform_indices = @transform_6, window_bounds = array<i64: 16, 32>}, {pipeline_mode = #tpu.pipeline_mode<synchronous>, transform_indices = @transform_7, window_bounds = array<i64: 16, 1>}, {pipeline_mode = #tpu.pipeline_mode<synchronous>, transform_indices = @transform_8, window_bounds = array<i64: 48, 48>}, {pipeline_mode = #tpu.pipeline_mode<synchronous>, transform_indices = @transform_9, window_bounds = array<i64: 48, 48>}, {pipeline_mode = #tpu.pipeline_mode<synchronous>, transform_indices = @transform_10, window_bounds = array<i64: 48, 48>}, {pipeline_mode = #tpu.pipeline_mode<synchronous>, transform_indices = @transform_11, window_bounds = array<i64: 32, 48>}, {pipeline_mode = #tpu.pipeline_mode<synchronous>, transform_indices = @transform_12, window_bounds = array<i64: 16, 32>}, {pipeline_mode = #tpu.pipeline_mode<synchronous>, transform_indices = @transform_13, window_bounds = array<i64: 16, 1>}, {pipeline_mode = #tpu.pipeline_mode<synchronous>, transform_indices = @transform_14, window_bounds = array<i64: 144, 48>}, {pipeline_mode = #tpu.pipeline_mode<synchronous>, transform_indices = @transform_15, window_bounds = array<i64: 24, 144>}, {pipeline_mode = #tpu.pipeline_mode<synchronous>, transform_indices = @transform_16, window_bounds = array<i64: 12, 80>}, {pipeline_mode = #tpu.pipeline_mode<synchronous>, transform_indices = @transform_17, window_bounds = array<i64: 8, 12>}, {pipeline_mode = #tpu.pipeline_mode<synchronous>, transform_indices = @transform_18, window_bounds = array<i64: 8, 1>}, {transform_indices = @transform_19, window_bounds = array<i64: 3, 4, 256>}, {transform_indices = @transform_20, window_bounds = array<i64: 3, 4, 256>}, {transform_indices = @transform_21, window_bounds = array<i64: 3, 4, 256>}, {transform_indices = @transform_22, window_bounds = array<i64: 4, 256>}]} {
    %c0 = arith.constant 0 : index
    %c0_0 = arith.constant 0 : index
    %0 = vector.load %arg4[%c0, %c0_0] : memref<48x24xbf16, #tpu.memory_space<vmem>>, vector<48x24xbf16>
    %c0_1 = arith.constant 0 : index
    %c0_2 = arith.constant 0 : index
    %1 = vector.load %arg5[%c0_1, %c0_2] : memref<48x48xbf16, #tpu.memory_space<vmem>>, vector<48x48xbf16>
    %c0_3 = arith.constant 0 : index
    %c0_4 = arith.constant 0 : index
    %2 = vector.load %arg6[%c0_3, %c0_4] : memref<32x32xbf16, #tpu.memory_space<vmem>>, vector<32x32xbf16>
    %c0_5 = arith.constant 0 : index
    %c0_6 = arith.constant 0 : index
    %3 = vector.load %arg7[%c0_5, %c0_6] : memref<16x32xbf16, #tpu.memory_space<vmem>>, vector<16x32xbf16>
    %c0_7 = arith.constant 0 : index
    %c0_8 = arith.constant 0 : index
    %4 = vector.load %arg8[%c0_7, %c0_8] : memref<16x1xf32, #tpu.memory_space<vmem>>, vector<16x1xf32>
    %c0_9 = arith.constant 0 : index
    %c0_10 = arith.constant 0 : index
    %5 = vector.load %arg9[%c0_9, %c0_10] : memref<48x48xbf16, #tpu.memory_space<vmem>>, vector<48x48xbf16>
    %c0_11 = arith.constant 0 : index
    %c0_12 = arith.constant 0 : index
    %6 = vector.load %arg10[%c0_11, %c0_12] : memref<48x48xbf16, #tpu.memory_space<vmem>>, vector<48x48xbf16>
    %c0_13 = arith.constant 0 : index
    %c0_14 = arith.constant 0 : index
    %7 = vector.load %arg11[%c0_13, %c0_14] : memref<48x48xbf16, #tpu.memory_space<vmem>>, vector<48x48xbf16>
    %c0_15 = arith.constant 0 : index
    %c0_16 = arith.constant 0 : index
    %8 = vector.load %arg12[%c0_15, %c0_16] : memref<32x48xbf16, #tpu.memory_space<vmem>>, vector<32x48xbf16>
    %c0_17 = arith.constant 0 : index
    %c0_18 = arith.constant 0 : index
    %9 = vector.load %arg13[%c0_17, %c0_18] : memref<16x32xbf16, #tpu.memory_space<vmem>>, vector<16x32xbf16>
    %c0_19 = arith.constant 0 : index
    %c0_20 = arith.constant 0 : index
    %10 = vector.load %arg14[%c0_19, %c0_20] : memref<16x1xf32, #tpu.memory_space<vmem>>, vector<16x1xf32>
    %c0_21 = arith.constant 0 : index
    %c0_22 = arith.constant 0 : index
    %11 = vector.load %arg15[%c0_21, %c0_22] : memref<144x48xbf16, #tpu.memory_space<vmem>>, vector<144x48xbf16>
    %c0_23 = arith.constant 0 : index
    %c0_24 = arith.constant 0 : index
    %12 = vector.load %arg16[%c0_23, %c0_24] : memref<24x144xbf16, #tpu.memory_space<vmem>>, vector<24x144xbf16>
    %c0_25 = arith.constant 0 : index
    %c0_26 = arith.constant 0 : index
    %13 = vector.load %arg17[%c0_25, %c0_26] : memref<12x80xbf16, #tpu.memory_space<vmem>>, vector<12x80xbf16>
    %c0_27 = arith.constant 0 : index
    %c0_28 = arith.constant 0 : index
    %14 = vector.load %arg18[%c0_27, %c0_28] : memref<8x12xbf16, #tpu.memory_space<vmem>>, vector<8x12xbf16>
    %c0_29 = arith.constant 0 : index
    %c0_30 = arith.constant 0 : index
    %15 = vector.load %arg19[%c0_29, %c0_30] : memref<8x1xf32, #tpu.memory_space<vmem>>, vector<8x1xf32>
    %c0_31 = arith.constant 0 : index
    %c0_32 = arith.constant 0 : index
    %16 = vector.load %arg1[%c0_31, %c0_32] : memref<16x256xf32, #tpu.memory_space<vmem>>, vector<16x256xf32>
    %c0_33 = arith.constant 0 : index
    %c0_34 = arith.constant 0 : index
    %c0_35 = arith.constant 0 : index
    %17 = vector.load %arg2[%c0_33, %c0_34, %c0_35] : memref<3x8x256xf32, #tpu.memory_space<vmem>>, vector<3x8x256xf32>
    %18 = vector.shape_cast %17 : vector<3x8x256xf32> to vector<24x256xf32>
    %19 = arith.truncf %18 : vector<24x256xf32> to vector<24x256xbf16>
    %cst = arith.constant dense<0.000000e+00> : vector<48x256xf32>
    %20 = tpu.matmul %0, %19, %cst {dimension_numbers = #tpu.dot_dimension_numbers<[1], [0], [0], [1], [0, 0, 1, 1], [], []>} : vector<48x24xbf16>, vector<24x256xbf16>, vector<48x256xf32> -> vector<48x256xf32>
    %21 = vector.shape_cast %20 : vector<48x256xf32> to vector<3x16x256xf32>
    %22 = vector.extract_strided_slice %21 {offsets = [0, 0, 0], sizes = [1, 16, 256], strides = [1, 1, 1]} : vector<3x16x256xf32> to vector<1x16x256xf32>
    %23 = vector.shape_cast %22 : vector<1x16x256xf32> to vector<16x256xf32>
    %24 = vector.extract_strided_slice %21 {offsets = [0, 0, 0], sizes = [1, 16, 256], strides = [1, 1, 1]} : vector<3x16x256xf32> to vector<1x16x256xf32>
    %25 = vector.shape_cast %24 : vector<1x16x256xf32> to vector<16x256xf32>
    %26 = arith.mulf %23, %25 : vector<16x256xf32>
    %27 = vector.extract_strided_slice %21 {offsets = [1, 0, 0], sizes = [1, 16, 256], strides = [1, 1, 1]} : vector<3x16x256xf32> to vector<1x16x256xf32>
    %28 = vector.shape_cast %27 : vector<1x16x256xf32> to vector<16x256xf32>
    %29 = vector.extract_strided_slice %21 {offsets = [1, 0, 0], sizes = [1, 16, 256], strides = [1, 1, 1]} : vector<3x16x256xf32> to vector<1x16x256xf32>
    %30 = vector.shape_cast %29 : vector<1x16x256xf32> to vector<16x256xf32>
    %31 = arith.mulf %28, %30 : vector<16x256xf32>
    %32 = arith.addf %26, %31 : vector<16x256xf32>
    %33 = vector.extract_strided_slice %21 {offsets = [2, 0, 0], sizes = [1, 16, 256], strides = [1, 1, 1]} : vector<3x16x256xf32> to vector<1x16x256xf32>
    %34 = vector.shape_cast %33 : vector<1x16x256xf32> to vector<16x256xf32>
    %35 = vector.extract_strided_slice %21 {offsets = [2, 0, 0], sizes = [1, 16, 256], strides = [1, 1, 1]} : vector<3x16x256xf32> to vector<1x16x256xf32>
    %36 = vector.shape_cast %35 : vector<1x16x256xf32> to vector<16x256xf32>
    %37 = arith.mulf %34, %36 : vector<16x256xf32>
    %38 = arith.addf %32, %37 : vector<16x256xf32>
    %39 = math.sqrt %38 : vector<16x256xf32>
    %40 = tpu.concatenate %39, %16 in 0 : vector<16x256xf32>, vector<16x256xf32> -> vector<32x256xf32>
    %41 = arith.truncf %40 : vector<32x256xf32> to vector<32x256xbf16>
    %cst_36 = arith.constant dense<0.000000e+00> : vector<32x256xf32>
    %42 = tpu.matmul %2, %41, %cst_36 {dimension_numbers = #tpu.dot_dimension_numbers<[1], [0], [0], [1], [0, 0, 1, 1], [], []>} : vector<32x32xbf16>, vector<32x256xbf16>, vector<32x256xf32> -> vector<32x256xf32>
    %43 = arith.truncf %20 : vector<48x256xf32> to vector<48x256xbf16>
    %cst_37 = arith.constant dense<0.000000e+00> : vector<48x256xf32>
    %44 = tpu.matmul %1, %43, %cst_37 {dimension_numbers = #tpu.dot_dimension_numbers<[1], [0], [0], [1], [0, 0, 1, 1], [], []>} : vector<48x48xbf16>, vector<48x256xbf16>, vector<48x256xf32> -> vector<48x256xf32>
    %45 = arith.truncf %42 : vector<32x256xf32> to vector<32x256xbf16>
    %cst_38 = arith.constant dense<0.000000e+00> : vector<16x256xf32>
    %46 = tpu.matmul %3, %45, %cst_38 {dimension_numbers = #tpu.dot_dimension_numbers<[1], [0], [0], [1], [0, 0, 1, 1], [], []>} : vector<16x32xbf16>, vector<32x256xbf16>, vector<16x256xf32> -> vector<16x256xf32>
    %47 = vector.broadcast %4 : vector<16x1xf32> to vector<16x256xf32>
    %48 = arith.addf %46, %47 : vector<16x256xf32>
    %49 = arith.negf %48 : vector<16x256xf32>
    %50 = math.exp %49 : vector<16x256xf32>
    %cst_39 = arith.constant 1.000000e+00 : f32
    %51 = vector.broadcast %cst_39 : f32 to vector<16x256xf32>
    %52 = arith.addf %51, %50 : vector<16x256xf32>
    %53 = arith.divf %51, %52 : vector<16x256xf32>
    %54 = vector.shape_cast %44 : vector<48x256xf32> to vector<3x16x256xf32>
    %55 = vector.shape_cast %53 : vector<16x256xf32> to vector<1x16x256xf32>
    %56 = vector.broadcast %55 : vector<1x16x256xf32> to vector<3x16x256xf32>
    %57 = arith.mulf %54, %56 : vector<3x16x256xf32>
    %58 = vector.shape_cast %57 : vector<3x16x256xf32> to vector<48x256xf32>
    %59 = arith.truncf %58 : vector<48x256xf32> to vector<48x256xbf16>
    %cst_40 = arith.constant dense<0.000000e+00> : vector<48x256xf32>
    %60 = tpu.matmul %5, %59, %cst_40 {dimension_numbers = #tpu.dot_dimension_numbers<[1], [0], [0], [1], [0, 0, 1, 1], [], []>} : vector<48x48xbf16>, vector<48x256xbf16>, vector<48x256xf32> -> vector<48x256xf32>
    %61 = vector.shape_cast %58 : vector<48x256xf32> to vector<3x16x256xf32>
    %62 = vector.shape_cast %60 : vector<48x256xf32> to vector<3x16x256xf32>
    %63 = vector.extract_strided_slice %61 {offsets = [0, 0, 0], sizes = [1, 16, 256], strides = [1, 1, 1]} : vector<3x16x256xf32> to vector<1x16x256xf32>
    %64 = vector.shape_cast %63 : vector<1x16x256xf32> to vector<16x256xf32>
    %65 = vector.extract_strided_slice %62 {offsets = [0, 0, 0], sizes = [1, 16, 256], strides = [1, 1, 1]} : vector<3x16x256xf32> to vector<1x16x256xf32>
    %66 = vector.shape_cast %65 : vector<1x16x256xf32> to vector<16x256xf32>
    %67 = arith.mulf %64, %66 : vector<16x256xf32>
    %68 = vector.extract_strided_slice %61 {offsets = [1, 0, 0], sizes = [1, 16, 256], strides = [1, 1, 1]} : vector<3x16x256xf32> to vector<1x16x256xf32>
    %69 = vector.shape_cast %68 : vector<1x16x256xf32> to vector<16x256xf32>
    %70 = vector.extract_strided_slice %62 {offsets = [1, 0, 0], sizes = [1, 16, 256], strides = [1, 1, 1]} : vector<3x16x256xf32> to vector<1x16x256xf32>
    %71 = vector.shape_cast %70 : vector<1x16x256xf32> to vector<16x256xf32>
    %72 = arith.mulf %69, %71 : vector<16x256xf32>
    %73 = arith.addf %67, %72 : vector<16x256xf32>
    %74 = vector.extract_strided_slice %61 {offsets = [2, 0, 0], sizes = [1, 16, 256], strides = [1, 1, 1]} : vector<3x16x256xf32> to vector<1x16x256xf32>
    %75 = vector.shape_cast %74 : vector<1x16x256xf32> to vector<16x256xf32>
    %76 = vector.extract_strided_slice %62 {offsets = [2, 0, 0], sizes = [1, 16, 256], strides = [1, 1, 1]} : vector<3x16x256xf32> to vector<1x16x256xf32>
    %77 = vector.shape_cast %76 : vector<1x16x256xf32> to vector<16x256xf32>
    %78 = arith.mulf %75, %77 : vector<16x256xf32>
    %79 = arith.addf %73, %78 : vector<16x256xf32>
    %80 = vector.extract_strided_slice %62 {offsets = [0, 0, 0], sizes = [1, 16, 256], strides = [1, 1, 1]} : vector<3x16x256xf32> to vector<1x16x256xf32>
    %81 = vector.shape_cast %80 : vector<1x16x256xf32> to vector<16x256xf32>
    %82 = vector.extract_strided_slice %62 {offsets = [0, 0, 0], sizes = [1, 16, 256], strides = [1, 1, 1]} : vector<3x16x256xf32> to vector<1x16x256xf32>
    %83 = vector.shape_cast %82 : vector<1x16x256xf32> to vector<16x256xf32>
    %84 = arith.mulf %81, %83 : vector<16x256xf32>
    %85 = vector.extract_strided_slice %62 {offsets = [1, 0, 0], sizes = [1, 16, 256], strides = [1, 1, 1]} : vector<3x16x256xf32> to vector<1x16x256xf32>
    %86 = vector.shape_cast %85 : vector<1x16x256xf32> to vector<16x256xf32>
    %87 = vector.extract_strided_slice %62 {offsets = [1, 0, 0], sizes = [1, 16, 256], strides = [1, 1, 1]} : vector<3x16x256xf32> to vector<1x16x256xf32>
    %88 = vector.shape_cast %87 : vector<1x16x256xf32> to vector<16x256xf32>
    %89 = arith.mulf %86, %88 : vector<16x256xf32>
    %90 = arith.addf %84, %89 : vector<16x256xf32>
    %91 = vector.extract_strided_slice %62 {offsets = [2, 0, 0], sizes = [1, 16, 256], strides = [1, 1, 1]} : vector<3x16x256xf32> to vector<1x16x256xf32>
    %92 = vector.shape_cast %91 : vector<1x16x256xf32> to vector<16x256xf32>
    %93 = vector.extract_strided_slice %62 {offsets = [2, 0, 0], sizes = [1, 16, 256], strides = [1, 1, 1]} : vector<3x16x256xf32> to vector<1x16x256xf32>
    %94 = vector.shape_cast %93 : vector<1x16x256xf32> to vector<16x256xf32>
    %95 = arith.mulf %92, %94 : vector<16x256xf32>
    %96 = arith.addf %90, %95 : vector<16x256xf32>
    %cst_41 = arith.constant 9.99999997E-7 : f32
    %97 = vector.broadcast %cst_41 : f32 to vector<16x256xf32>
    %98 = arith.addf %96, %97 : vector<16x256xf32>
    %99 = arith.divf %79, %98 : vector<16x256xf32>
    %100 = vector.shape_cast %99 : vector<16x256xf32> to vector<1x16x256xf32>
    %101 = vector.broadcast %100 : vector<1x16x256xf32> to vector<3x16x256xf32>
    %102 = arith.mulf %101, %62 : vector<3x16x256xf32>
    %103 = arith.subf %61, %102 : vector<3x16x256xf32>
    %cst_42 = arith.constant 0.000000e+00 : f32
    %104 = vector.broadcast %cst_42 : f32 to vector<16x256xf32>
    %105 = arith.cmpf oge, %79, %104 : vector<16x256xf32>
    %106 = vector.shape_cast %105 : vector<16x256xi1> to vector<1x16x256xi1>
    %107 = vector.shape_cast %106 : vector<1x16x256xi1> to vector<1x16x256xi1>
    %108 = vector.broadcast %107 : vector<1x16x256xi1> to vector<3x16x256xi1>
    %109 = arith.select %108, %61, %103 : vector<3x16x256xi1>, vector<3x16x256xf32>
    %cst_43 = arith.constant 2.000000e-01 : f32
    %110 = vector.broadcast %cst_43 : f32 to vector<3x16x256xf32>
    %111 = arith.mulf %110, %61 : vector<3x16x256xf32>
    %cst_44 = arith.constant 8.000000e-01 : f32
    %112 = vector.broadcast %cst_44 : f32 to vector<3x16x256xf32>
    %113 = arith.mulf %112, %109 : vector<3x16x256xf32>
    %114 = arith.addf %111, %113 : vector<3x16x256xf32>
    %115 = vector.shape_cast %114 : vector<3x16x256xf32> to vector<48x256xf32>
    %cst_45 = arith.constant 0.000000e+00 : f32
    %116 = vector.broadcast %cst_45 : f32 to vector<32x256xf32>
    %117 = arith.cmpf oge, %42, %116 : vector<32x256xf32>
    %cst_46 = arith.constant 0.00999999977 : f32
    %118 = vector.broadcast %cst_46 : f32 to vector<32x256xf32>
    %119 = arith.mulf %118, %42 : vector<32x256xf32>
    %120 = arith.select %117, %42, %119 : vector<32x256xi1>, vector<32x256xf32>
    %121 = arith.truncf %115 : vector<48x256xf32> to vector<48x256xbf16>
    %cst_47 = arith.constant dense<0.000000e+00> : vector<48x256xf32>
    %122 = tpu.matmul %6, %121, %cst_47 {dimension_numbers = #tpu.dot_dimension_numbers<[1], [0], [0], [1], [0, 0, 1, 1], [], []>} : vector<48x48xbf16>, vector<48x256xbf16>, vector<48x256xf32> -> vector<48x256xf32>
    %123 = vector.shape_cast %122 : vector<48x256xf32> to vector<3x16x256xf32>
    %124 = vector.extract_strided_slice %123 {offsets = [0, 0, 0], sizes = [1, 16, 256], strides = [1, 1, 1]} : vector<3x16x256xf32> to vector<1x16x256xf32>
    %125 = vector.shape_cast %124 : vector<1x16x256xf32> to vector<16x256xf32>
    %126 = vector.extract_strided_slice %123 {offsets = [0, 0, 0], sizes = [1, 16, 256], strides = [1, 1, 1]} : vector<3x16x256xf32> to vector<1x16x256xf32>
    %127 = vector.shape_cast %126 : vector<1x16x256xf32> to vector<16x256xf32>
    %128 = arith.mulf %125, %127 : vector<16x256xf32>
    %129 = vector.extract_strided_slice %123 {offsets = [1, 0, 0], sizes = [1, 16, 256], strides = [1, 1, 1]} : vector<3x16x256xf32> to vector<1x16x256xf32>
    %130 = vector.shape_cast %129 : vector<1x16x256xf32> to vector<16x256xf32>
    %131 = vector.extract_strided_slice %123 {offsets = [1, 0, 0], sizes = [1, 16, 256], strides = [1, 1, 1]} : vector<3x16x256xf32> to vector<1x16x256xf32>
    %132 = vector.shape_cast %131 : vector<1x16x256xf32> to vector<16x256xf32>
    %133 = arith.mulf %130, %132 : vector<16x256xf32>
    %134 = arith.addf %128, %133 : vector<16x256xf32>
    %135 = vector.extract_strided_slice %123 {offsets = [2, 0, 0], sizes = [1, 16, 256], strides = [1, 1, 1]} : vector<3x16x256xf32> to vector<1x16x256xf32>
    %136 = vector.shape_cast %135 : vector<1x16x256xf32> to vector<16x256xf32>
    %137 = vector.extract_strided_slice %123 {offsets = [2, 0, 0], sizes = [1, 16, 256], strides = [1, 1, 1]} : vector<3x16x256xf32> to vector<1x16x256xf32>
    %138 = vector.shape_cast %137 : vector<1x16x256xf32> to vector<16x256xf32>
    %139 = arith.mulf %136, %138 : vector<16x256xf32>
    %140 = arith.addf %134, %139 : vector<16x256xf32>
    %141 = math.sqrt %140 : vector<16x256xf32>
    %142 = tpu.concatenate %141, %120 in 0 : vector<16x256xf32>, vector<32x256xf32> -> vector<48x256xf32>
    %143 = arith.truncf %142 : vector<48x256xf32> to vector<48x256xbf16>
    %cst_48 = arith.constant dense<0.000000e+00> : vector<32x256xf32>
    %144 = tpu.matmul %8, %143, %cst_48 {dimension_numbers = #tpu.dot_dimension_numbers<[1], [0], [0], [1], [0, 0, 1, 1], [], []>} : vector<32x48xbf16>, vector<48x256xbf16>, vector<32x256xf32> -> vector<32x256xf32>
    %145 = arith.truncf %122 : vector<48x256xf32> to vector<48x256xbf16>
    %cst_49 = arith.constant dense<0.000000e+00> : vector<48x256xf32>
    %146 = tpu.matmul %7, %145, %cst_49 {dimension_numbers = #tpu.dot_dimension_numbers<[1], [0], [0], [1], [0, 0, 1, 1], [], []>} : vector<48x48xbf16>, vector<48x256xbf16>, vector<48x256xf32> -> vector<48x256xf32>
    %147 = arith.truncf %144 : vector<32x256xf32> to vector<32x256xbf16>
    %cst_50 = arith.constant dense<0.000000e+00> : vector<16x256xf32>
    %148 = tpu.matmul %9, %147, %cst_50 {dimension_numbers = #tpu.dot_dimension_numbers<[1], [0], [0], [1], [0, 0, 1, 1], [], []>} : vector<16x32xbf16>, vector<32x256xbf16>, vector<16x256xf32> -> vector<16x256xf32>
    %149 = vector.broadcast %10 : vector<16x1xf32> to vector<16x256xf32>
    %150 = arith.addf %148, %149 : vector<16x256xf32>
    %151 = arith.negf %150 : vector<16x256xf32>
    %152 = math.exp %151 : vector<16x256xf32>
    %cst_51 = arith.constant 1.000000e+00 : f32
    %153 = vector.broadcast %cst_51 : f32 to vector<16x256xf32>
    %154 = arith.addf %153, %152 : vector<16x256xf32>
    %155 = arith.divf %153, %154 : vector<16x256xf32>
    %156 = vector.shape_cast %146 : vector<48x256xf32> to vector<3x16x256xf32>
    %157 = vector.shape_cast %155 : vector<16x256xf32> to vector<1x16x256xf32>
    %158 = vector.broadcast %157 : vector<1x16x256xf32> to vector<3x16x256xf32>
    %159 = arith.mulf %156, %158 : vector<3x16x256xf32>
    %160 = vector.shape_cast %159 : vector<3x16x256xf32> to vector<48x256xf32>
    %161 = arith.truncf %160 : vector<48x256xf32> to vector<48x256xbf16>
    %cst_52 = arith.constant dense<0.000000e+00> : vector<144x256xf32>
    %162 = tpu.matmul %11, %161, %cst_52 {dimension_numbers = #tpu.dot_dimension_numbers<[1], [0], [0], [1], [0, 0, 1, 1], [], []>} : vector<144x48xbf16>, vector<48x256xbf16>, vector<144x256xf32> -> vector<144x256xf32>
    %163 = vector.shape_cast %162 : vector<144x256xf32> to vector<3x48x256xf32>
    %164 = vector.extract_strided_slice %163 {offsets = [0, 0, 0], sizes = [1, 48, 256], strides = [1, 1, 1]} : vector<3x48x256xf32> to vector<1x48x256xf32>
    %165 = vector.shape_cast %164 : vector<1x48x256xf32> to vector<48x256xf32>
    %166 = vector.extract_strided_slice %163 {offsets = [0, 0, 0], sizes = [1, 48, 256], strides = [1, 1, 1]} : vector<3x48x256xf32> to vector<1x48x256xf32>
    %167 = vector.shape_cast %166 : vector<1x48x256xf32> to vector<48x256xf32>
    %168 = arith.mulf %165, %167 : vector<48x256xf32>
    %169 = vector.extract_strided_slice %163 {offsets = [1, 0, 0], sizes = [1, 48, 256], strides = [1, 1, 1]} : vector<3x48x256xf32> to vector<1x48x256xf32>
    %170 = vector.shape_cast %169 : vector<1x48x256xf32> to vector<48x256xf32>
    %171 = vector.extract_strided_slice %163 {offsets = [1, 0, 0], sizes = [1, 48, 256], strides = [1, 1, 1]} : vector<3x48x256xf32> to vector<1x48x256xf32>
    %172 = vector.shape_cast %171 : vector<1x48x256xf32> to vector<48x256xf32>
    %173 = arith.mulf %170, %172 : vector<48x256xf32>
    %174 = arith.addf %168, %173 : vector<48x256xf32>
    %175 = vector.extract_strided_slice %163 {offsets = [2, 0, 0], sizes = [1, 48, 256], strides = [1, 1, 1]} : vector<3x48x256xf32> to vector<1x48x256xf32>
    %176 = vector.shape_cast %175 : vector<1x48x256xf32> to vector<48x256xf32>
    %177 = vector.extract_strided_slice %163 {offsets = [2, 0, 0], sizes = [1, 48, 256], strides = [1, 1, 1]} : vector<3x48x256xf32> to vector<1x48x256xf32>
    %178 = vector.shape_cast %177 : vector<1x48x256xf32> to vector<48x256xf32>
    %179 = arith.mulf %176, %178 : vector<48x256xf32>
    %180 = arith.addf %174, %179 : vector<48x256xf32>
    %181 = math.sqrt %180 : vector<48x256xf32>
    %182 = tpu.concatenate %181, %144 in 0 : vector<48x256xf32>, vector<32x256xf32> -> vector<80x256xf32>
    %183 = arith.truncf %182 : vector<80x256xf32> to vector<80x256xbf16>
    %cst_53 = arith.constant dense<0.000000e+00> : vector<12x256xf32>
    %184 = tpu.matmul %13, %183, %cst_53 {dimension_numbers = #tpu.dot_dimension_numbers<[1], [0], [0], [1], [0, 0, 1, 1], [], []>} : vector<12x80xbf16>, vector<80x256xbf16>, vector<12x256xf32> -> vector<12x256xf32>
    %185 = arith.truncf %162 : vector<144x256xf32> to vector<144x256xbf16>
    %cst_54 = arith.constant dense<0.000000e+00> : vector<24x256xf32>
    %186 = tpu.matmul %12, %185, %cst_54 {dimension_numbers = #tpu.dot_dimension_numbers<[1], [0], [0], [1], [0, 0, 1, 1], [], []>} : vector<24x144xbf16>, vector<144x256xbf16>, vector<24x256xf32> -> vector<24x256xf32>
    %187 = arith.truncf %184 : vector<12x256xf32> to vector<12x256xbf16>
    %cst_55 = arith.constant dense<0.000000e+00> : vector<8x256xf32>
    %188 = tpu.matmul %14, %187, %cst_55 {dimension_numbers = #tpu.dot_dimension_numbers<[1], [0], [0], [1], [0, 0, 1, 1], [], []>} : vector<8x12xbf16>, vector<12x256xbf16>, vector<8x256xf32> -> vector<8x256xf32>
    %189 = vector.broadcast %15 : vector<8x1xf32> to vector<8x256xf32>
    %190 = arith.addf %188, %189 : vector<8x256xf32>
    %191 = arith.negf %190 : vector<8x256xf32>
    %192 = math.exp %191 : vector<8x256xf32>
    %cst_56 = arith.constant 1.000000e+00 : f32
    %193 = vector.broadcast %cst_56 : f32 to vector<8x256xf32>
    %194 = arith.addf %193, %192 : vector<8x256xf32>
    %195 = arith.divf %193, %194 : vector<8x256xf32>
    %196 = vector.shape_cast %186 : vector<24x256xf32> to vector<3x8x256xf32>
    %197 = vector.shape_cast %195 : vector<8x256xf32> to vector<1x8x256xf32>
    %198 = vector.broadcast %197 : vector<1x8x256xf32> to vector<3x8x256xf32>
    %199 = arith.mulf %196, %198 : vector<3x8x256xf32>
    %200 = vector.shape_cast %199 : vector<3x8x256xf32> to vector<24x256xf32>
    %201 = vector.shape_cast %200 : vector<24x256xf32> to vector<3x8x256xf32>
    %202 = vector.extract_strided_slice %201 {offsets = [0, 0, 0], sizes = [3, 4, 256], strides = [1, 1, 1]} : vector<3x8x256xf32> to vector<3x4x256xf32>
    %c0_57 = arith.constant 0 : index
    %c0_58 = arith.constant 0 : index
    %203 = vector.load %arg3[%c0_57, %c0_58] : memref<3x256xf32, #tpu.memory_space<vmem>>, vector<3x256xf32>
    %204 = vector.shape_cast %203 : vector<3x256xf32> to vector<3x1x256xf32>
    %205 = vector.broadcast %204 : vector<3x1x256xf32> to vector<3x4x256xf32>
    %206 = arith.addf %202, %205 : vector<3x4x256xf32>
    %207 = vector.extract_strided_slice %201 {offsets = [0, 4, 0], sizes = [3, 4, 256], strides = [1, 1, 1]} : vector<3x8x256xf32> to vector<3x4x256xf32>
    %208 = math.exp %207 : vector<3x4x256xf32>
    %209 = vector.extract_strided_slice %184 {offsets = [8, 0], sizes = [4, 256], strides = [1, 1]} : vector<12x256xf32> to vector<4x256xf32>
    %cst_59 = arith.constant dense<0xFF800000> : vector<256xf32>
    %210 = vector.multi_reduction <maximumf>, %209, %cst_59 [0] : vector<4x256xf32> to vector<256xf32>
    %211 = vector.shape_cast %210 : vector<256xf32> to vector<1x256xf32>
    %212 = vector.broadcast %211 : vector<1x256xf32> to vector<4x256xf32>
    %213 = arith.subf %209, %212 : vector<4x256xf32>
    %214 = math.exp %213 : vector<4x256xf32>
    %cst_60 = arith.constant dense<0.000000e+00> : vector<256xf32>
    %215 = vector.multi_reduction <add>, %214, %cst_60 [0] : vector<4x256xf32> to vector<256xf32>
    %216 = vector.shape_cast %215 : vector<256xf32> to vector<1x256xf32>
    %217 = vector.broadcast %216 : vector<1x256xf32> to vector<4x256xf32>
    %218 = arith.divf %214, %217 : vector<4x256xf32>
    %c0_61 = arith.constant 0 : index
    %c0_62 = arith.constant 0 : index
    %c0_63 = arith.constant 0 : index
    %219 = vector.load %arg20[%c0_61, %c0_62, %c0_63] : memref<3x4x256xf32, #tpu.memory_space<vmem>>, vector<3x4x256xf32>
    tpu.vector_store %arg20[%c0_61, %c0_62, %c0_63], %202 {strides = array<i32>} : memref<3x4x256xf32, #tpu.memory_space<vmem>>, vector<3x4x256xf32>,
    %c0_64 = arith.constant 0 : index
    %c0_65 = arith.constant 0 : index
    %c0_66 = arith.constant 0 : index
    %220 = vector.load %arg21[%c0_64, %c0_65, %c0_66] : memref<3x4x256xf32, #tpu.memory_space<vmem>>, vector<3x4x256xf32>
    tpu.vector_store %arg21[%c0_64, %c0_65, %c0_66], %206 {strides = array<i32>} : memref<3x4x256xf32, #tpu.memory_space<vmem>>, vector<3x4x256xf32>,
    %c0_67 = arith.constant 0 : index
    %c0_68 = arith.constant 0 : index
    %c0_69 = arith.constant 0 : index
    %221 = vector.load %arg22[%c0_67, %c0_68, %c0_69] : memref<3x4x256xf32, #tpu.memory_space<vmem>>, vector<3x4x256xf32>
    tpu.vector_store %arg22[%c0_67, %c0_68, %c0_69], %208 {strides = array<i32>} : memref<3x4x256xf32, #tpu.memory_space<vmem>>, vector<3x4x256xf32>,
    %c0_70 = arith.constant 0 : index
    %c0_71 = arith.constant 0 : index
    %222 = vector.load %arg23[%c0_70, %c0_71] : memref<4x256xf32, #tpu.memory_space<vmem>>, vector<4x256xf32>
    tpu.vector_store %arg23[%c0_70, %c0_71], %218 {strides = array<i32>} : memref<4x256xf32, #tpu.memory_space<vmem>>, vector<4x256xf32>,
    return
  }
  func.func @transform_0(%arg0: i32) -> (i32, i32) {
    %c0_i32 = arith.constant 0 : i32
    %c0_i32_0 = arith.constant 0 : i32
    return %c0_i32, %arg0 : i32, i32
  }
  func.func @transform_1(%arg0: i32) -> (i32, i32, i32) {
    %c0_i32 = arith.constant 0 : i32
    %c0_i32_0 = arith.constant 0 : i32
    %c0_i32_1 = arith.constant 0 : i32
    return %c0_i32, %c0_i32_0, %arg0 : i32, i32, i32
  }
  func.func @transform_2(%arg0: i32) -> (i32, i32) {
    %c0_i32 = arith.constant 0 : i32
    %c0_i32_0 = arith.constant 0 : i32
    return %c0_i32, %arg0 : i32, i32
  }
  func.func @transform_3(%arg0: i32) -> (i32, i32) {
    %c0_i32 = arith.constant 0 : i32
    %c0_i32_0 = arith.constant 0 : i32
    %c0_i32_1 = arith.constant 0 : i32
    return %c0_i32, %c0_i32_0 : i32, i32
  }
  func.func @transform_4(%arg0: i32) -> (i32, i32) {
    %c0_i32 = arith.constant 0 : i32
    %c0_i32_0 = arith.constant 0 : i32
    %c0_i32_1 = arith.constant 0 : i32
    return %c0_i32, %c0_i32_0 : i32, i32
  }
  func.func @transform_5(%arg0: i32) -> (i32, i32) {
    %c0_i32 = arith.constant 0 : i32
    %c0_i32_0 = arith.constant 0 : i32
    %c0_i32_1 = arith.constant 0 : i32
    return %c0_i32, %c0_i32_0 : i32, i32
  }
  func.func @transform_6(%arg0: i32) -> (i32, i32) {
    %c0_i32 = arith.constant 0 : i32
    %c0_i32_0 = arith.constant 0 : i32
    %c0_i32_1 = arith.constant 0 : i32
    return %c0_i32, %c0_i32_0 : i32, i32
  }
  func.func @transform_7(%arg0: i32) -> (i32, i32) {
    %c0_i32 = arith.constant 0 : i32
    %c0_i32_0 = arith.constant 0 : i32
    %c0_i32_1 = arith.constant 0 : i32
    return %c0_i32, %c0_i32_0 : i32, i32
  }
  func.func @transform_8(%arg0: i32) -> (i32, i32) {
    %c0_i32 = arith.constant 0 : i32
    %c0_i32_0 = arith.constant 0 : i32
    %c0_i32_1 = arith.constant 0 : i32
    return %c0_i32, %c0_i32_0 : i32, i32
  }
  func.func @transform_9(%arg0: i32) -> (i32, i32) {
    %c0_i32 = arith.constant 0 : i32
    %c0_i32_0 = arith.constant 0 : i32
    %c0_i32_1 = arith.constant 0 : i32
    return %c0_i32, %c0_i32_0 : i32, i32
  }
  func.func @transform_10(%arg0: i32) -> (i32, i32) {
    %c0_i32 = arith.constant 0 : i32
    %c0_i32_0 = arith.constant 0 : i32
    %c0_i32_1 = arith.constant 0 : i32
    return %c0_i32, %c0_i32_0 : i32, i32
  }
  func.func @transform_11(%arg0: i32) -> (i32, i32) {
    %c0_i32 = arith.constant 0 : i32
    %c0_i32_0 = arith.constant 0 : i32
    %c0_i32_1 = arith.constant 0 : i32
    return %c0_i32, %c0_i32_0 : i32, i32
  }
  func.func @transform_12(%arg0: i32) -> (i32, i32) {
    %c0_i32 = arith.constant 0 : i32
    %c0_i32_0 = arith.constant 0 : i32
    %c0_i32_1 = arith.constant 0 : i32
    return %c0_i32, %c0_i32_0 : i32, i32
  }
  func.func @transform_13(%arg0: i32) -> (i32, i32) {
    %c0_i32 = arith.constant 0 : i32
    %c0_i32_0 = arith.constant 0 : i32
    %c0_i32_1 = arith.constant 0 : i32
    return %c0_i32, %c0_i32_0 : i32, i32
  }
  func.func @transform_14(%arg0: i32) -> (i32, i32) {
    %c0_i32 = arith.constant 0 : i32
    %c0_i32_0 = arith.constant 0 : i32
    %c0_i32_1 = arith.constant 0 : i32
    return %c0_i32, %c0_i32_0 : i32, i32
  }
  func.func @transform_15(%arg0: i32) -> (i32, i32) {
    %c0_i32 = arith.constant 0 : i32
    %c0_i32_0 = arith.constant 0 : i32
    %c0_i32_1 = arith.constant 0 : i32
    return %c0_i32, %c0_i32_0 : i32, i32
  }
  func.func @transform_16(%arg0: i32) -> (i32, i32) {
    %c0_i32 = arith.constant 0 : i32
    %c0_i32_0 = arith.constant 0 : i32
    %c0_i32_1 = arith.constant 0 : i32
    return %c0_i32, %c0_i32_0 : i32, i32
  }
  func.func @transform_17(%arg0: i32) -> (i32, i32) {
    %c0_i32 = arith.constant 0 : i32
    %c0_i32_0 = arith.constant 0 : i32
    %c0_i32_1 = arith.constant 0 : i32
    return %c0_i32, %c0_i32_0 : i32, i32
  }
  func.func @transform_18(%arg0: i32) -> (i32, i32) {
    %c0_i32 = arith.constant 0 : i32
    %c0_i32_0 = arith.constant 0 : i32
    %c0_i32_1 = arith.constant 0 : i32
    return %c0_i32, %c0_i32_0 : i32, i32
  }
  func.func @transform_19(%arg0: i32) -> (i32, i32, i32) {
    %c0_i32 = arith.constant 0 : i32
    %c0_i32_0 = arith.constant 0 : i32
    %c0_i32_1 = arith.constant 0 : i32
    return %c0_i32, %c0_i32_0, %arg0 : i32, i32, i32
  }
  func.func @transform_20(%arg0: i32) -> (i32, i32, i32) {
    %c0_i32 = arith.constant 0 : i32
    %c0_i32_0 = arith.constant 0 : i32
    %c0_i32_1 = arith.constant 0 : i32
    return %c0_i32, %c0_i32_0, %arg0 : i32, i32, i32
  }
  func.func @transform_21(%arg0: i32) -> (i32, i32, i32) {
    %c0_i32 = arith.constant 0 : i32
    %c0_i32_0 = arith.constant 0 : i32
    %c0_i32_1 = arith.constant 0 : i32
    return %c0_i32, %c0_i32_0, %arg0 : i32, i32, i32
  }
  func.func @transform_22(%arg0: i32) -> (i32, i32) {
    %c0_i32 = arith.constant 0 : i32
    %c0_i32_0 = arith.constant 0 : i32
    return %c0_i32, %arg0 : i32, i32
  }
}

</mosaic_0001>

<bundles_post_ra>
// kernel: tpu_custom_call.1
= control target key start
LH: loop header
LB: loop body
LE: loop exit
PB: predicated region body
PF: predicated region fallthrough
CT: control target
= control target key end

     0   :  { %s5436_s0 = inlined_call_operand.vmem [shape: f32[16,512], index: 0, kind: input, shape index: {}]   ;;  %s5437_s1 = inlined_call_operand.vmem [shape: f32[3,8,512], index: 1, kind: input, shape index: {}]   ;;  %s5438_s2 = inlined_call_operand.hbm [shape: f32[3,512], index: 2, kind: input, shape index: {}]   ;;  %s5439_s3 = inlined_call_operand.vmem [shape: bf16[48,24], index: 3, kind: input, shape index: {}]   ;;  %s5440_s4 = inlined_call_operand.hbm [shape: bf16[48,48], index: 4, kind: input, shape index: {}]   ;;  %s5441_s5 = inlined_call_operand.hbm [shape: bf16[32,32], index: 5, kind: input, shape index: {}]   ;;  %s5442_s6 = inlined_call_operand.hbm [shape: bf16[16,32], index: 6, kind: input, shape index: {}]   ;;  %s5443_s7 = inlined_call_operand.vmem [shape: f32[16,1], index: 7, kind: input, shape index: {}]   ;;  %s5444_s8 = inlined_call_operand.hbm [shape: bf16[48,48], index: 8, kind: input, shape index: {}]   ;;  %s5445_s9 = inlined_call_operand.vmem [shape: bf16[48,48], index: 9, kind: input, shape index: {}]   ;;  %s5446_s10 = inlined_call_operand.hbm [shape: bf16[48,48], index: 10, kind: input, shape index: {}]   ;;  %s5447_s11 = inlined_call_operand.hbm [shape: bf16[32,48], index: 11, kind: input, shape index: {}]   ;;  %s5448_s12 = inlined_call_operand.vmem [shape: bf16[16,32], index: 12, kind: input, shape index: {}]   ;;  %s5449_s13 = inlined_call_operand.vmem [shape: f32[16,1], index: 13, kind: input, shape index: {}]   ;;  %s5450_s14 = inlined_call_operand.vmem [shape: bf16[144,48], index: 14, kind: input, shape index: {}]   ;;  %s5451_s15 = inlined_call_operand.hbm [shape: bf16[24,144], index: 15, kind: input, shape index: {}]   ;;  %s5452_s16 = inlined_call_operand.vmem [shape: bf16[12,80], index: 16, kind: input, shape index: {}]   ;;  %s5453_s17 = inlined_call_operand.vmem [shape: bf16[8,12], index: 17, kind: input, shape index: {}]   ;;  %s5454_s18 = inlined_call_operand.vmem [shape: f32[8,1], index: 18, kind: input, shape index: {}]   ;;  %s5455_s19 = inlined_call_operand.hbm [shape: f32[3,4,512], index: 19, kind: output, shape index: {0}]   ;;  %s5456_s20 = inlined_call_operand.hbm [shape: f32[3,4,512], index: 20, kind: output, shape index: {1}]   ;;  %s5457_s21 = inlined_call_operand.hbm [shape: f32[3,4,512], index: 21, kind: output, shape index: {2}]   ;;  %s5458_s22 = inlined_call_operand.hbm [shape: f32[4,512], index: 22, kind: output, shape index: {3}]  }
   0x1   :  { %5494 = sst [smem:[#allocation42_spill]] %s5436_s0 }
   0x2   :  { %5495 = sst [smem:[#allocation43_spill]] %s5437_s1 }
   0x3   :  { %5496 = sst [smem:[#allocation44_spill]] %s5438_s2 }
   0x4   :  { %5497 = sst [smem:[#allocation45_spill]] %s5439_s3 }
   0x5   :  { %5498 = sst [smem:[#allocation46_spill]] %s5440_s4 }
   0x6   :  { %5499 = sst [smem:[#allocation47_spill]] %s5441_s5 }
   0x7   :  { %5500 = sst [smem:[#allocation48_spill]] %s5442_s6 }
   0x8   :  { %5501 = sst [smem:[#allocation49_spill]] %s5443_s7 }
   0x9   :  { %5502 = sst [smem:[#allocation50_spill]] %s5444_s8 }
   0xa   :  { %5503 = sst [smem:[#allocation51_spill]] %s5445_s9 }
   0xb   :  { %5504 = sst [smem:[#allocation52_spill]] %s5446_s10 }
   0xc   :  { %5505 = sst [smem:[#allocation53_spill]] %s5447_s11 }
   0xd   :  { %5506 = sst [smem:[#allocation54_spill]] %s5448_s12 }
   0xe   :  { %5507 = sst [smem:[#allocation55_spill]] %s5449_s13 }
   0xf   :  { %5508 = sst [smem:[#allocation56_spill]] %s5450_s14 }
  0x10   :  { %5509 = sst [smem:[#allocation57_spill]] %s5452_s16 }
  0x11   :  { %5510 = sst [smem:[#allocation58_spill]] %s5453_s17 }
  0x12   :  { %5511 = sst [smem:[#allocation59_spill]] %s5455_s19 }
  0x13   :  { %5512 = sst [smem:[#allocation60_spill]] %s5456_s20 }
  0x14   :  { %5513 = sst [smem:[#allocation61_spill]] %s5457_s21 }
  0x15   :  { %5514 = sst [smem:[#allocation62_spill]] %s5458_s22 }
  0x16   :  { %28 = vsyncpa [#allocation5], 0 }
  0x17   :  { %30 = vsyncpa [#allocation5 + $0x1], 0 }
  0x18   :  { %31 = vsyncpa [#allocation8], 0 }
  0x19   :  { %32 = vsyncpa [#allocation11], 0 }
  0x1a   :  { %33 = vsyncpa [#allocation14], 0 }
  0x1b   :  { %34 = vsyncpa [#allocation17], 0 }
  0x1c   :  { %35 = vsyncpa [#allocation6], 0 }
  0x1d   :  { %37 = vsyncpa [#allocation6 + $0x1], 0 }
  0x1e   :  { %38 = vsyncpa [#allocation20], 0 }
  0x1f   :  { %40 = vsyncpa [#allocation20 + $0x1], 0 }
  0x20   :  { %41 = vsyncpa [#allocation23], 0 }
  0x21   :  { %43 = vsyncpa [#allocation23 + $0x1], 0  ;;  %s4120_s3 = smov 0   ;;  %s4122_s28 = smov 0  }
  0x22   :  { %s4124_s29 = smov 0   ;;  %s4126_s30 = smov 0  }
  0x23 LB: > { %5515 = sst [smem:[#allocation32_spill]] %s3970_s3  ;;  %s4141_s4 = sadd.s32 4294967295, %s3982_s30   ;;  %s3982_s30 = sphi %s4126_s30, %s5602_s30   ;;  %s3978_s29 = sphi %s4124_s29, %s5606_s29   ;;  %s3974_s28 = sphi %s4122_s28, %s5605_s28   ;;  %s3970_s3 = sphi %s4120_s3, %s5604_s3  }
  0x24   : > { %s5464_s0 = sadd.s32 4294967294, %s3982_s30   ;;  %s4145_s23 = sadd.s32 1, %s3982_s30  }
  0x25   : > { %5516 = sst [smem:[#allocation33_spill]] %s4145_s23  ;;  %s56_s1 = sadd.s32 1, %s3978_s29 }
  0x26   : > { %s53_s5 = ssub.s32 %s3982_s30, %s4145_s23  ;;  %p63_p0 = scmp.ne.s32.totalorder %s3978_s29, %s3974_s28 }
  0x27   : > { %p54_p1 = scmp.eq.s32.totalorder %s53_s5, 0  ;;  %p64_p2 = scmp.eq.s32.totalorder %s3982_s30, 0 }
  0x28   : > { %p121_p3 = scmp.ne.s32.totalorder %s3974_s28, %s3970_s3  ;;  %p5475_p4 = scmp.eq.s32.totalorder %s4141_s4, 0 }
  0x29   : > { %s4157_s24 = scalar_select %p54_p1, %s3978_s29, %s56_s1  }
  0x2a   : > { %p4159_p5 = por %p64_p2, %p63_p0  ;;  %p4165_p6 = por %p5475_p4, %p121_p3 }
  0x2b   : > { %5517 = sst [smem:[#allocation34_spill]] %s4157_s24  ;;  %p481_p7 = scmp.eq.s32.totalorder %s4141_s4, 1 }
  0x2c   : > { %s5518_s6 = scalar_select %p4159_p5, 1, 0 }
  0x2d   : > { %s5519_s25 = scalar_select %p4165_p6, 1, 0 }
  0x2e   : > { %p487_p8 = scmp.eq.s32.totalorder %s5464_s0, 1  ;;  %p3171_p9 = scmp.ge.s32.totalorder %s3982_s30, 1 }
  0x2f   : > { %p572_p10 = scmp.lt.s32.totalorder %s3982_s30, 3  ;;  %p4174_p11 = por %p481_p7, %p63_p0 }
  0x30   : > { %p4178_p12 = por %p487_p8, %p121_p3  ;;  %s3984_s1 = smov [#allocation7]  }
  0x31   : > { %s5520_s26 = scalar_select %p4174_p11, 1, 0 }
  0x32   : > { %s5522_s2 = scalar_select %p4178_p12, 1, 0 }
  0x33   : > { %5521 = sst [smem:[#allocation35_spill]] %s5520_s26  ;;  %p4182_p13 = pnand %p3171_p9, %p572_p10 }
  0x34   : > { %5523 = sst [smem:[#allocation36_spill]] %s5522_s2  ;;  %s587_s5 = sshll.u32 %s3984_s1, 4  ;;  %s588_s5 = int_to_ptr.vmem [resolvable:$true] %s587_s5 }
  0x35   : > { %s5524_s27 = scalar_select %p4182_p13, 1, 0 }
  0x36   : > { %p3340_p1 = pneg %p4182_p13  ;;  %s3985_s24 = smov [#allocation10]  }
  0x37   : > { %s613_s23 = sshll.u32 %s3985_s24, 4  ;;  %s5526_s21 = sld [smem:[#allocation46_spill]]  ;;  %s4194_s23 = int_to_ptr.vmem [resolvable:$true] %s613_s23 }
  0x38   : > { %p4190_p2 = pnand %p3340_p1, %p5475_p4 }
  0x3a   : > { %p4204_p3 = pneg %p4190_p2 }
  0x3d   : > { %s3584_s20 = scalar_lea.hbm %s5526_s21, 384 }
  0x3e   : > { %p3585_p0 = scmp.ne.s32.totalorder %s5526_s21, %s3584_s20  ;;  %p3591_p9 = scmp.lt.u32.totalorder %s3584_s20, %s5526_s21 }
  0x40   : > { %p3587_p7 = pnand %p4204_p3, %p3585_p0 }
  0x42   : > { %p3588_p8 = pneg %p3587_p7 }
  0x44   : > { %p3593_p10 = pnand %p3591_p9, %p3588_p8 }
  0x46   : > { %3596 = shalt.err (!%p3593_p10)
}
  0x47   : > { %s3597_s3 = scalar_lea.vmem %s588_s5, 384  ;;  %p3605_p11 = scmp.lt.s32.totalorder %s588_s5, %s588_s5 }
  0x48   : > { %p3598_p1 = scmp.ne.s32.totalorder %s588_s5, %s3597_s3  ;;  %p3606_p6 = scmp.lt.s32.totalorder %s3597_s3, %s3597_s3 }
  0x4a   : > { %p3600_p4 = pnand %p3598_p1, %p4204_p3  ;;  %p3607_p13 = por %p3606_p6, %p3605_p11 }
  0x4c   : > { %p3601_p12 = pneg %p3600_p4 }
  0x4e   : > { %p3608_p5 = pnand %p3607_p13, %p3601_p12 }
  0x50   : > { %3611 = shalt.err (!%p3608_p5)
}
  0x51   : > { %s3986_s19 = smov 64   ;;  %s3987_s22 = smov 4  }
  0x52   : > { %3343 = dma.hbm_to_vmem [thread:$0]  (!%p4190_p2), %s5526_s21, 384, %s588_s5, [#allocation8], %s3986_s19, %s3986_s19, %s3987_s22  }
  0x53   : > { %s5528_s17 = sld [smem:[#allocation48_spill]] }
  0x59   : > { %s3612_s16 = scalar_lea.hbm %s5528_s17, 128 }
  0x5a   : > { %p3613_p4 = scmp.ne.s32.totalorder %s5528_s17, %s3612_s16  ;;  %p3619_p11 = scmp.lt.u32.totalorder %s3612_s16, %s5528_s17 }
  0x5c   : > { %p3615_p5 = pnand %p3613_p4, %p4204_p3 }
  0x5e   : > { %p3616_p6 = pneg %p3615_p5 }
  0x60   : > { %p3621_p12 = pnand %p3619_p11, %p3616_p6 }
  0x62   : > { %3624 = shalt.err (!%p3621_p12)
}
  0x63   : > { %s3625_s5 = scalar_lea.vmem %s4194_s23, 128  ;;  %p3633_p8 = scmp.lt.s32.totalorder %s4194_s23, %s4194_s23 }
  0x64   : > { %p3626_p13 = scmp.ne.s32.totalorder %s4194_s23, %s3625_s5  ;;  %p3634_p9 = scmp.lt.s32.totalorder %s3625_s5, %s3625_s5 }
  0x66   : > { %p3628_p0 = pnand %p3626_p13, %p4204_p3  ;;  %p3635_p10 = por %p3634_p9, %p3633_p8 }
  0x68   : > { %p3629_p7 = pneg %p3628_p0 }
  0x6a   : > { %p3636_p1 = pnand %p3635_p10, %p3629_p7 }
  0x6c   : > { %3639 = shalt.err (!%p3636_p1)
}
  0x6d   : > { %3349 = dma.hbm_to_vmem [thread:$0]  (!%p4190_p2), %s5528_s17, 128, %s4194_s23, [#allocation11], %s3986_s19, %s3986_s19, %s3987_s22  }
  0x6e   : > { %s3988_s14 = smov [#allocation13]   ;;  %s3989_s20 = smov [#allocation9]  }
  0x6f   : > { %s645_s16 = sshll.u32 %s3988_s14, 4  ;;  %s600_s26 = sshll.u32 %s3989_s20, 4  ;;  %s646_s16 = int_to_ptr.vmem [resolvable:$true] %s645_s16  ;;  %s601_s26 = int_to_ptr.vmem [resolvable:$true] %s600_s26 }
  0x70   : > { %s5529_s10 = sld [smem:[#allocation52_spill]] }
  0x76   : > { %s3640_s3 = scalar_lea.hbm %s5529_s10, 384 }
  0x77   : > { %p3641_p4 = scmp.ne.s32.totalorder %s5529_s10, %s3640_s3  ;;  %p3647_p11 = scmp.lt.u32.totalorder %s3640_s3, %s5529_s10 }
  0x79   : > { %p3643_p5 = pnand %p3641_p4, %p4204_p3 }
  0x7b   : > { %p3644_p6 = pneg %p3643_p5 }
  0x7d   : > { %p3649_p12 = pnand %p3647_p11, %p3644_p6 }
  0x7f   : > { %3652 = shalt.err (!%p3649_p12)
}
  0x80   : > { %s3653_s23 = scalar_lea.vmem %s646_s16, 384  ;;  %p3661_p8 = scmp.lt.s32.totalorder %s646_s16, %s646_s16 }
  0x81   : > { %p3654_p13 = scmp.ne.s32.totalorder %s646_s16, %s3653_s23  ;;  %p3662_p9 = scmp.lt.s32.totalorder %s3653_s23, %s3653_s23 }
  0x83   : > { %p3656_p0 = pnand %p3654_p13, %p4204_p3  ;;  %p3663_p10 = por %p3662_p9, %p3661_p8 }
  0x85   : > { %p3657_p7 = pneg %p3656_p0 }
  0x87   : > { %p3664_p1 = pnand %p3663_p10, %p3657_p7 }
  0x89   : > { %3667 = shalt.err (!%p3664_p1)
}
  0x8a   : > { %3355 = dma.hbm_to_vmem [thread:$0]  (!%p4190_p2), %s5529_s10, 384, %s646_s16, [#allocation14], %s3986_s19, %s3986_s19, %s3987_s22  }
  0x8b   : > { %s5530_s20 = sld [smem:[#allocation47_spill]] }
  0x91   : > { %s3668_s2 = scalar_lea.hbm %s5530_s20, 256 }
  0x92   : > { %p3669_p4 = scmp.ne.s32.totalorder %s5530_s20, %s3668_s2  ;;  %p3675_p11 = scmp.lt.u32.totalorder %s3668_s2, %s5530_s20 }
  0x94   : > { %p3671_p5 = pnand %p3669_p4, %p4204_p3 }
  0x96   : > { %p3672_p6 = pneg %p3671_p5 }
  0x98   : > { %p3677_p12 = pnand %p3675_p11, %p3672_p6 }
  0x9a   : > { %3680 = shalt.err (!%p3677_p12)
}
  0x9b   : > { %s3681_s23 = scalar_lea.vmem %s601_s26, 256  ;;  %p3689_p8 = scmp.lt.s32.totalorder %s601_s26, %s601_s26 }
  0x9c   : > { %p3682_p13 = scmp.ne.s32.totalorder %s601_s26, %s3681_s23  ;;  %p3690_p9 = scmp.lt.s32.totalorder %s3681_s23, %s3681_s23 }
  0x9e   : > { %p3684_p0 = pnand %p3682_p13, %p4204_p3  ;;  %p3691_p10 = por %p3690_p9, %p3689_p8 }
  0xa0   : > { %p3685_p7 = pneg %p3684_p0 }
  0xa2   : > { %p3692_p1 = pnand %p3691_p10, %p3685_p7 }
  0xa4   : > { %3695 = shalt.err (!%p3692_p1)
}
  0xa5   : > { %3346 = dma.hbm_to_vmem [thread:$0]  (!%p4190_p2), %s5530_s20, 256, %s601_s26, [#allocation8], %s3986_s19, %s3986_s19, %s3987_s22  }
  0xa6   : > { %s3990_s21 = smov [#allocation12]   ;;  %s3991_s14 = smov [#allocation15]  }
  0xa7   : > { %s629_s13 = sshll.u32 %s3990_s21, 4  ;;  %s658_s2 = sshll.u32 %s3991_s14, 4  ;;  %s630_s13 = int_to_ptr.vmem [resolvable:$true] %s629_s13  ;;  %s659_s2 = int_to_ptr.vmem [resolvable:$true] %s658_s2 }
  0xa8   : > { %s5531_s8 = sld [smem:[#allocation50_spill]] }
  0xae   : > { %s3696_s5 = scalar_lea.hbm %s5531_s8, 384 }
  0xaf   : > { %p3697_p4 = scmp.ne.s32.totalorder %s5531_s8, %s3696_s5  ;;  %p3703_p11 = scmp.lt.u32.totalorder %s3696_s5, %s5531_s8 }
  0xb1   : > { %p3699_p5 = pnand %p3697_p4, %p4204_p3 }
  0xb3   : > { %p3700_p6 = pneg %p3699_p5 }
  0xb5   : > { %p3705_p12 = pnand %p3703_p11, %p3700_p6 }
  0xb7   : > { %3708 = shalt.err (!%p3705_p12)
}
  0xb8   : > { %s3709_s26 = scalar_lea.vmem %s630_s13, 384  ;;  %p3717_p8 = scmp.lt.s32.totalorder %s630_s13, %s630_s13 }
  0xb9   : > { %p3710_p13 = scmp.ne.s32.totalorder %s630_s13, %s3709_s26  ;;  %p3718_p9 = scmp.lt.s32.totalorder %s3709_s26, %s3709_s26 }
  0xbb   : > { %p3712_p0 = pnand %p3710_p13, %p4204_p3  ;;  %p3719_p10 = por %p3718_p9, %p3717_p8 }
  0xbd   : > { %p3713_p7 = pneg %p3712_p0 }
  0xbf   : > { %p3720_p1 = pnand %p3719_p10, %p3713_p7 }
  0xc1   : > { %3723 = shalt.err (!%p3720_p1)
}
  0xc2   : > { %3352 = dma.hbm_to_vmem [thread:$0]  (!%p4190_p2), %s5531_s8, 384, %s630_s13, [#allocation11], %s3986_s19, %s3986_s19, %s3987_s22  }
  0xc3   : > { %s5532_s11 = sld [smem:[#allocation53_spill]] }
  0xc9   : > { %s3724_s24 = scalar_lea.hbm %s5532_s11, 256 }
  0xca   : > { %p3725_p4 = scmp.ne.s32.totalorder %s5532_s11, %s3724_s24  ;;  %p3731_p11 = scmp.lt.u32.totalorder %s3724_s24, %s5532_s11 }
  0xcc   : > { %p3727_p5 = pnand %p3725_p4, %p4204_p3 }
  0xce   : > { %p3728_p6 = pneg %p3727_p5 }
  0xd0   : > { %p3733_p12 = pnand %p3731_p11, %p3728_p6 }
  0xd2   : > { %3736 = shalt.err (!%p3733_p12)
}
  0xd3   : > { %s3737_s16 = scalar_lea.vmem %s659_s2, 256  ;;  %p3745_p8 = scmp.lt.s32.totalorder %s659_s2, %s659_s2 }
  0xd4   : > { %p3738_p13 = scmp.ne.s32.totalorder %s659_s2, %s3737_s16  ;;  %p3746_p9 = scmp.lt.s32.totalorder %s3737_s16, %s3737_s16 }
  0xd6   : > { %p3740_p0 = pnand %p3738_p13, %p4204_p3  ;;  %p3747_p10 = por %p3746_p9, %p3745_p8 }
  0xd8   : > { %p3741_p7 = pneg %p3740_p0 }
  0xda   : > { %p3748_p1 = pnand %p3747_p10, %p3741_p7 }
  0xdc   : > { %3751 = shalt.err (!%p3748_p1)
}
  0xdd   : > { %3358 = dma.hbm_to_vmem [thread:$0]  (!%p4190_p2), %s5532_s11, 256, %s659_s2, [#allocation14], %s3986_s19, %s3986_s19, %s3987_s22  }
  0xde   : > { %s3992_s10 = smov [#allocation16]   ;;  %s3752_s24 = scalar_lea.hbm %s5451_s15, 384 }
  0xdf   : > { %s680_s9 = sshll.u32 %s3992_s10, 4  ;;  %p3753_p4 = scmp.ne.s32.totalorder %s5451_s15, %s3752_s24  ;;  %s681_s9 = int_to_ptr.vmem [resolvable:$true] %s680_s9 }
  0xe0   : > { %p3759_p11 = scmp.lt.u32.totalorder %s3752_s24, %s5451_s15 }
  0xe1   : > { %p3755_p5 = pnand %p3753_p4, %p4204_p3 }
  0xe3   : > { %p3756_p6 = pneg %p3755_p5 }
  0xe5   : > { %p3761_p12 = pnand %p3759_p11, %p3756_p6 }
  0xe7   : > { %3764 = shalt.err (!%p3761_p12)
}
  0xe8   : > { %s3765_s19 = scalar_lea.vmem %s681_s9, 384  ;;  %p3773_p8 = scmp.lt.s32.totalorder %s681_s9, %s681_s9 }
  0xe9   : > { %p3766_p13 = scmp.ne.s32.totalorder %s681_s9, %s3765_s19  ;;  %p3774_p9 = scmp.lt.s32.totalorder %s3765_s19, %s3765_s19 }
  0xeb   : > { %p3768_p0 = pnand %p3766_p13, %p4204_p3  ;;  %p3775_p10 = por %p3774_p9, %p3773_p8 }
  0xed   : > { %p3769_p7 = pneg %p3768_p0 }
  0xef   : > { %p3776_p1 = pnand %p3775_p10, %p3769_p7 }
  0xf1   : > { %3779 = shalt.err (!%p3776_p1)
}
  0xf2   : > { %s3993_s22 = smov 128   ;;  %s3994_s2 = smov 8  }
  0xf3   : > { %3361 = dma.hbm_to_vmem [thread:$0]  (!%p4190_p2), %s5451_s15, 384, %s681_s9, [#allocation17], %s3993_s22, %s3993_s22, %s3994_s2  }
  0xf4   : > { %p5484_p4 = scmp.ge.s32.totalorder %s3982_s30, 2 }
  0xf5   : > { %p5533_p3 = scmp.ne.s32.totalorder (!%p5484_p4), %s5518_s6, 0 }
  0xf6   : > { %699 = sbr.rel (%p5484_p4) target bundleno = 307 (0x133), region = 80 }
  0xfd   : > { %702 = sbr.rel (!%p5533_p3) target bundleno = 265 (0x109), region = 84  ;;  %s704_s1 = sand.u32 (%p5533_p3), 1, %s3978_s29  }
  0xfe   : > { %s3292_s26 = sshll.u32 (%p5533_p3), %s3982_s30, 4  ;;  %s3180_s10 = sshll.u32 (%p5533_p3), %s704_s1, 5 }
  0xff   : > { %s5534_s0 = sld [smem:[#allocation42_spill]] (%p5533_p3)  ;;  %s706_s9 = scalar_lea.vmem (%p5533_p3), [#allocation2], %s3180_s10 }
 0x105   : > { %s709_s24 = scalar_lea.vmem %s5534_s0, %s3292_s26 }
 0x106   : > { %v722_v0 = vld [vmem:[%s709_s24] sm:$0xff]  ;;  %v724_v1 = vld [vmem:[%s709_s24 + $0x8] sm:$0xff] }
 0x107   : > { %v726_v2 = vld [vmem:[%s709_s24 + $0x20] sm:$0xff]  ;;  %723 = vst [vmem:[%s706_s9] sm:$0xff] %v722_v0  ;;  %725 = vst [vmem:[%s706_s9 + $0x8] sm:$0xff] %v724_v1  ;;  %v728_v3 = vld [vmem:[%s709_s24 + $0x28] sm:$0xff] }
 0x108   : > { %727 = vst [vmem:[%s706_s9 + $0x10] sm:$0xff] %v726_v2  ;;  %729 = vst [vmem:[%s706_s9 + $0x18] sm:$0xff] %v728_v3 }
 0x109 PF: > { %p5535_p2 = scmp.ne.s32.totalorder %s5518_s6, 0 }
 0x10a   : > { %s737_s3 = sand.u32 (%p5535_p2), 1, %s3978_s29   ;;  %s3293_s5 = sshll.u32 (%p5535_p2), %s3982_s30, 4 }
 0x10b   : > { %735 = sbr.rel (!%p5535_p2) target bundleno = 278 (0x116), region = 107  ;;  %s5536_s22 = sld [smem:[#allocation43_spill]] (%p5535_p2) }
 0x10c   : > { %s3299_s12 = smul.u32 (%p5535_p2), 48, %s737_s3 }
 0x10e   : > { %s739_s16 = scalar_lea.vmem (%p5535_p2), [#allocation3], %s3299_s12 }
 0x111   : > { %s742_s2 = scalar_lea.vmem (%p5535_p2), %s5536_s22, %s3293_s5 }
 0x112   : > { %v755_v4 = vld [vmem:[%s742_s2] sm:$0xff]  ;;  %v757_v5 = vld [vmem:[%s742_s2 + $0x8] sm:$0xff] }
 0x113   : > { %v759_v6 = vld [vmem:[%s742_s2 + $0x20] sm:$0xff]  ;;  %v761_v7 = vld [vmem:[%s742_s2 + $0x28] sm:$0xff]  ;;  %756 = vst [vmem:[%s739_s16] sm:$0xff] %v755_v4  ;;  %758 = vst [vmem:[%s739_s16 + $0x8] sm:$0xff] %v757_v5 }
 0x114   : > { %v763_v8 = vld [vmem:[%s742_s2 + $0x40] sm:$0xff]  ;;  %v765_v9 = vld [vmem:[%s742_s2 + $0x48] sm:$0xff]  ;;  %760 = vst [vmem:[%s739_s16 + $0x10] sm:$0xff] %v759_v6  ;;  %762 = vst [vmem:[%s739_s16 + $0x18] sm:$0xff] %v761_v7 }
 0x115   : > { %764 = vst [vmem:[%s739_s16 + $0x20] sm:$0xff] %v763_v8  ;;  %766 = vst [vmem:[%s739_s16 + $0x28] sm:$0xff] %v765_v9 }
 0x116 PF: > { %s773_s13 = sand.u32 1, %s3978_s29   ;;  %s3294_s1 = sshll.u32 %s3982_s30, 7 }
 0x117   : > { %s3185_s26 = sshll.u32 %s773_s13, 3  ;;  %s5537_s14 = sld [smem:[#allocation44_spill]] }
 0x118   : > { %s777_s24 = scalar_lea.vmem [#allocation4], %s3185_s26  ;;  %s774_s3 = scalar_lea.sflag [#allocation5], %s773_s13 }
 0x119   : > { %s785_s9 = sshll.u32 %s777_s24, 4  ;;  %p5538_p6 = scmp.ne.s32.totalorder %s5518_s6, 0  ;;  %s786_s9 = int_to_ptr.vmem [resolvable:$true] %s785_s9 }
 0x11d   : > { %s4373_s0 = scalar_lea.hbm %s5537_s14, %s3294_s1  ;;  %s3784_s19 = scalar_lea.hbm %s5537_s14, 256 }
 0x11e   : > { %s3780_s5 = scalar_lea.hbm %s4373_s0, 128  ;;  %p3785_p13 = scmp.lt.u32.totalorder %s4373_s0, %s5537_s14 }
 0x11f   : > { %p3781_p5 = scmp.ne.s32.totalorder %s4373_s0, %s3780_s5  ;;  %p3786_p0 = scmp.lt.u32.totalorder %s3784_s19, %s3780_s5 }
 0x120   : > { %p3788_p8 = scmp.lt.u32.totalorder %s3780_s5, %s4373_s0 }
 0x121   : > { %p3782_p11 = pnand %p3781_p5, %p5538_p6  ;;  %p3787_p7 = por %p3786_p0, %p3785_p13 }
 0x123   : > { %p3783_p12 = pneg %p3782_p11  ;;  %p3789_p9 = por %p3788_p8, %p3787_p7 }
 0x125   : > { %p3790_p10 = pnand %p3789_p9, %p3783_p12 }
 0x127   : > { %3793 = shalt.err (!%p3790_p10)
}
 0x128   : > { %s3794_s16 = scalar_lea.vmem %s786_s9, 128  ;;  %s3995_s13 = smov [#allocation4]  }
 0x129   : > { %p3795_p1 = scmp.ne.s32.totalorder %s786_s9, %s3794_s16  ;;  %s3798_s1 = sshll.u32 %s3995_s13, 4  ;;  %s3799_s1 = int_to_ptr.vmem [resolvable:$false] %s3798_s1 }
 0x12a   : > { %s3800_s26 = scalar_lea.vmem %s3799_s1, 256  ;;  %p3801_p5 = scmp.lt.s32.totalorder %s786_s9, %s3799_s1 }
 0x12b   : > { %p3796_p3 = pnand %p3795_p1, %p5538_p6  ;;  %p3802_p11 = scmp.lt.s32.totalorder %s3800_s26, %s3794_s16 }
 0x12d   : > { %p3797_p2 = pneg %p3796_p3  ;;  %p3803_p4 = por %p3802_p11, %p3801_p5 }
 0x12f   : > { %p3804_p0 = pnand %p3803_p4, %p3797_p2 }
 0x131   : > { %3807 = shalt.err (!%p3804_p0)
}
 0x132   : > { %3316 = dma.hbm_to_vmem [thread:$0]  (%p5538_p6), %s4373_s0, 128, %s786_s9, %s774_s3  }
 0x133 PF: > { %p5539_p12 = scmp.ne.s32.totalorder %s5524_s27, 0 }
 0x135   : > { %794 = sbr.rel (%p5539_p12) target bundleno = 2966 (0xb96), region = 134 }
 0x13c   : > { %s4395_s10 = sand.u32 1, %s3974_s28   ;;  %p5540_p4 = scmp.ne.s32.totalorder %s5519_s25, 0 }
 0x13d   : > { %s3189_s21 = sshll.u32 %s4395_s10, 5  ;;  %s3300_s24 = smul.u32 48, %s4395_s10 }
 0x13e   : > { %s3190_s5 = sshll.u32 %s4395_s10, 3  ;;  %s4400_s12 = scalar_lea.vmem [#allocation2], %s3189_s21 }
 0x13f   : > { %s806_s6 = scalar_lea.vmem [#allocation3], %s3300_s24  ;;  %s811_s0 = scalar_lea.sflag [#allocation5], %s4395_s10 }
 0x140   : > { %s4405_s9 = scalar_lea.vmem [#allocation4], %s3190_s5 }
 0x141   : > { %3937 = dma.done.wait (%p5540_p4), %s811_s0, 128  }
 0x142   : > { %3939 = vsyncadd (%p5540_p4), %s811_s0, 4294967168  ;;  %p5541_p6 = scmp.eq.s32.totalorder %s4141_s4, 0 }
 0x144   : > { %3941 = dma.done.wait (%p5541_p6), [#allocation8], 640   ;;  %p5542_p13 = pmov %p5541_p6 }
 0x145   : > { %p5543_p7 = pmov %p5541_p6 }
 0x146   : > { %3943 = vsyncadd (%p5542_p13), [#allocation8], 4294966656 }
 0x147   : > { %3945 = dma.done.wait (%p5543_p7), [#allocation11], 512   ;;  %p5544_p8 = pmov %p5541_p6 }
 0x148   : > { %p5545_p9 = pmov %p5541_p6 }
 0x149   : > { %3947 = vsyncadd (%p5544_p8), [#allocation11], 4294966784 }
 0x14a   : > { %3949 = dma.done.wait (%p5545_p9), [#allocation14], 640   ;;  %p5546_p10 = pmov %p5541_p6 }
 0x14b   : > { %p5547_p1 = pmov %p5541_p6 }
 0x14c   : > { %3951 = vsyncadd (%p5546_p10), [#allocation14], 4294966656 }
 0x14d   : > { %3953 = dma.done.wait (%p5547_p1), [#allocation17], 384   ;;  %p5548_p3 = pmov %p5547_p1 }
 0x14e   : > { %v5485_v10 = vmov 0   ;;  %v1010_v11 = vld [vmem:[%s806_s6 + $0x8] sm:$0xff]  ;;  %v1012_v12 = vld [vmem:[%s806_s6 + $0x18] sm:$0xff]  ;;  %v1009_v13 = vld [vmem:[%s806_s6] sm:$0xff]  ;;  %vm1044_vm0 = vcmask 1043456   ;;  %vm1034_vm1 = vcmask 195584  }
 0x14f   : > { %3955 = vsyncadd (%p5548_p3), [#allocation17], 4294966912  ;;  %1083 = vmatprep.mubr.bf16.mxu0 %v5485_v10  ;;  %1215 = vmatprep.mubr.bf16.mxu1 %v5485_v10  ;;  %v1016_v14 = vpack.c.bf16 %v1012_v12, %v1010_v11  ;;  %v1011_v15 = vld [vmem:[%s806_s6 + $0x10] sm:$0xff]  ;;  %v1014_v16 = vld [vmem:[%s806_s6 + $0x28] sm:$0xff]  ;;  %s5549_s3 = sld [smem:[#allocation45_spill]]  ;;  %vm1176_vm10 = vcmask 261120  }
 0x150   : > { %3438 = vset.pattern.permute.xlu0 %v5485_v10  ;;  %3439 = vset.pattern.permute.xlu1 %v5485_v10  ;;  %v1013_v17 = vld [vmem:[%s806_s6 + $0x20] sm:$0xff]  ;;  %v1015_v18 = vpack.c.bf16 %v1011_v15, %v1009_v13  ;;  %v1018_v19 = vpack.c.bf16 %v1014_v16, %v1014_v16  ;;  %v1006_v15 = vld [vmem:[%s4400_s12 + $0x8] sm:$0xff]  ;;  %v1008_v16 = vld [vmem:[%s4400_s12 + $0x18] sm:$0xff]  ;;  %vm1257_vm11 = vcmask 392192   ;;  %s5551_s7 = sld [smem:[#allocation49_spill]]  ;;  %s5552_s25 = sld [smem:[#allocation51_spill]] }
 0x151   : > { %v1017_v20 = vpack.c.bf16 %v1013_v17, %v1013_v17  ;;  %1051 = vmatprep.subr.bf16.mxu0 %v1016_v14  ;;  %s5555_s13 = sld [smem:[#allocation55_spill]]  ;;  %s5557_s27 = sld [smem:[#allocation56_spill]] }
 0x152   : > { %1052 = vmatpush1.bf16.msra.mxu0 %v1015_v18  ;;  %s5563_s26 = sld [smem:[#allocation57_spill]]  ;;  %s5589_s6 = sld [smem:[#allocation35_spill]] }
 0x153   : > { %v1046_v21 = vsel %vm1044_vm0, %v1017_v20, 0  ;;  %3202 = vmatprep.subr.msk.bf16.mxu0 %vm1044_vm0, %v1018_v19  ;;  %s925_s0 = scalar_lea.vmem [#allocation22], %s3190_s5  ;;  %s5590_s2 = sld [smem:[#allocation62_spill]] }
 0x154   : > { %s2904_s1 = sshll.u32 %s925_s0, 4  ;;  %s3997_s5 = smov [#allocation22]   ;;  %s2905_s1 = int_to_ptr.vmem [resolvable:$true] %s2904_s1 }
 0x155   : > { %s5550_s23 = smov %s5549_s3  ;;  %v3440_v22 = vld [vmem:[%s5549_s3] sm:$0xff]   ;;  %s5265_s3 = sshll.u32 %s4141_s4, 7 }
 0x156   : > { %1054 = vmatpush1.bf16.msra.mxu0 %v1046_v21  ;;  %v3441_v23 = vld [vmem:[%s5550_s23 + $0x8] sm:$0xff]   ;;  %v3442_v24 = vld [vmem:[%s5550_s23 + $0x10] sm:$0xff]   ;;  %s3808_s21 = scalar_lea.vmem %s2905_s1, 128  ;;  %s3812_s24 = sshll.u32 %s3997_s5, 4  ;;  %s3813_s24 = int_to_ptr.vmem [resolvable:$false] %s3812_s24 }
 0x157   : > { %p3809_p2 = scmp.ne.s32.totalorder %s2905_s1, %s3808_s21  ;;  %p3815_p12 = scmp.lt.s32.totalorder %s2905_s1, %s3813_s24 }
 0x158   : > { %p5591_p5 = scmp.ne.s32.totalorder %s5589_s6, 0 }
 0x159   : > { %3203 = vmatmul.mubr.msk.bf16.vlgmr.msra.gmra.mrb[0].mxu0 %vm1034_vm1, %v3440_v22  ;;  %s5271_s16 = scalar_lea.hbm %s5590_s2, %s5265_s3 }
 0x15a   : > { %1093 = vmatprep.mubr.bf16.mxu0 %v5485_v10  ;;  %p3810_p11 = pnand %p3809_p2, %p5591_p5 }
 0x15c   : > { %p3811_p0 = pneg %p3810_p11 }
 0x161   : > { %3204 = vmatmul.mubr.msk.bf16.gmra.mrb[4].mxu0 %vm1034_vm1, %v3441_v23 }
 0x162   : > { %1103 = vmatprep.mubr.bf16.mxu0 %v5485_v10 }
 0x169   : > { %3205 = vmatmul.mubr.msk.bf16.gmra.mrb[8].mxu0 %vm1034_vm1, %v3442_v24  ;;  %v1165_v24 = vpack.c.bf16 %v1008_v16, %v1006_v15 }
 0x16a   : > { %1384 = vmatprep.mubr.bf16.mxu0 %v5485_v10 }
 0x22c   : > { %v4445_v25 = vpop.f32.mrb[0].mxu0 }
 0x22d   : > { %v4447_v26 = vpop.f32.mrb[1].mxu0  ;;  %v1114_v32 = vmul.f32 %v4445_v25, %v4445_v25 }
 0x22e   : > { %v4449_v27 = vpop.f32.mrb[2].mxu0  ;;  %v1115_v35 = vmul.f32 %v4447_v26, %v4447_v26 }
 0x22f   : > { %v1236_v28 = vpack.c.bf16 %v4449_v27, %v4445_v25  ;;  %v4453_v29 = vpop.f32.mrb[3].mxu0  ;;  %v1116_v38 = vmul.f32 %v4449_v27, %v4449_v27  ;;  %v952_v25 = vld [vmem:[%s5551_s7] sm:$0xff]  ;;  %v953_v27 = vld [vmem:[%s5551_s7 + $0x8] sm:$0xff] }
 0x230   : > { %v1237_v30 = vpack.c.bf16 %v4453_v29, %v4447_v26  ;;  %v1117_v43 = vmul.f32 %v4453_v29, %v4453_v29  ;;  %v3446_v26 = vld [vmem:[#allocation7] sm:$0xff]   ;;  %1336 = vperm.xlu0 %3438, %v952_v25   ;;  %v1004_v29 = vld [vmem:[%s5454_s18] sm:$0xff] }
 0x234   : > { %v4457_v31 = vpop.f32.mrb[4].mxu0  ;;  %1341 = vperm.xlu0 %3438, %v953_v27  }
 0x235   : > { %v1118_v33 = vmul.f32 %v4457_v31, %v4457_v31  ;;  %v4463_v34 = vpop.f32.mrb[5].mxu0 }
 0x236   : > { %v1119_v36 = vmul.f32 %v4463_v34, %v4463_v34  ;;  %v4469_v37 = vpop.f32.mrb[6].mxu0 }
 0x237   : > { %v1122_v39 = vadd.f32 %v1118_v33, %v1114_v32  ;;  %v1120_v40 = vmul.f32 %v4469_v37, %v4469_v37  ;;  %v1238_v41 = vpack.c.bf16 %v4469_v37, %v4457_v31  ;;  %v4477_v42 = vpop.f32.mrb[7].mxu0  ;;  %v1005_v32 = vld [vmem:[%s4400_s12] sm:$0xff]  ;;  %v1007_v33 = vld [vmem:[%s4400_s12 + $0x10] sm:$0xff]  ;;  %s5556_s12 = sld [smem:[#allocation54_spill]] }
 0x238   : > { %v1123_v44 = vadd.f32 %v1119_v36, %v1115_v35  ;;  %v1121_v45 = vmul.f32 %v4477_v42, %v4477_v42  ;;  %v1239_v46 = vpack.c.bf16 %v4477_v42, %v4463_v34  ;;  %v1164_v35 = vpack.c.bf16 %v1007_v33, %v1005_v32  ;;  %v3443_v36 = vld [vmem:[#allocation9] sm:$0xff]   ;;  %2592 = vperm.xlu0 %3438, %v1004_v29  }
 0x239   : > { %v1124_v47 = vadd.f32 %v1120_v40, %v1116_v38  ;;  %v3444_v38 = vld [vmem:[#allocation9 + $0x8] sm:$0xff]  }
 0x23a   : > { %v1125_v48 = vadd.f32 %v1121_v45, %v1117_v43 }
 0x23c   : > { %v4485_v49 = vpop.f32.mrb[8].mxu0 }
 0x23d   : > { %v1126_v50 = vmul.f32 %v4485_v49, %v4485_v49  ;;  %v4489_v51 = vpop.f32.mrb[9].mxu0 }
 0x23e   : > { %v1127_v52 = vmul.f32 %v4489_v51, %v4489_v51  ;;  %v4493_v53 = vpop.f32.mrb[10].mxu0 }
 0x23f   : > { %v1130_v54 = vadd.f32 %v1126_v50, %v1122_v39  ;;  %v1128_v55 = vmul.f32 %v4493_v53, %v4493_v53  ;;  %v1240_v56 = vpack.c.bf16 %v4493_v53, %v4485_v49  ;;  %v1111_v57 = vpop.f32.mrb[11].mxu0 }
 0x240   : > { %v1131_v58 = vadd.f32 %v1127_v52, %v1123_v44  ;;  %v1129_v59 = vmul.f32 %v1111_v57, %v1111_v57  ;;  %v1241_v60 = vpack.c.bf16 %v1111_v57, %v4489_v51 }
 0x241   : > { %v1132_v61 = vadd.f32 %v1128_v55, %v1124_v47  ;;  %3476 = vrsqrt.f32 %v1130_v54  ;;  %vm1136_vm2 = vcmp.eq.f32.partialorder %v1130_v54, inf  ;;  %vm1138_vm5 = vcmp.eq.f32.partialorder %v1130_v54, 0.0 }
 0x242   : > { %v1133_v62 = vadd.f32 %v1129_v59, %v1125_v48  ;;  %3478 = vrsqrt.f32 %v1131_v58  ;;  %vm1143_vm3 = vcmp.eq.f32.partialorder %v1131_v58, inf  ;;  %vm1145_vm4 = vcmp.eq.f32.partialorder %v1131_v58, 0.0 }
 0x243   : > { %3480 = vrsqrt.f32 %v1132_v61  ;;  %v1146_v5 = vand.u32 2147483648, %v1131_v58  ;;  %v1139_v7 = vand.u32 2147483648, %v1130_v54  ;;  %vm1150_vm6 = vcmp.eq.f32.partialorder %v1132_v61, inf }
 0x244   : > { %3482 = vrsqrt.f32 %v1133_v62  ;;  %v1153_v12 = vand.u32 2147483648, %v1132_v61  ;;  %vm1157_vm7 = vcmp.eq.f32.partialorder %v1133_v62, inf  ;;  %v1160_v13 = vand.u32 2147483648, %v1133_v62 }
 0x245   : > { %vm1152_vm8 = vcmp.eq.f32.partialorder %v1132_v61, 0.0  ;;  %vm1159_vm9 = vcmp.eq.f32.partialorder %v1133_v62, 0.0 }
 0x24b   : > { %v3477_v63 = vpop.eup %3476 }
 0x24c   : > { %v3479_v0 = vpop.eup %3478  ;;  %v1135_v1 = vmul.f32 %v3477_v63, %v1130_v54 }
 0x24d   : > { %v3481_v2 = vpop.eup %3480  ;;  %v1142_v3 = vmul.f32 %v3479_v0, %v1131_v58 }
 0x24e   : > { %v3483_v4 = vpop.eup %3482  ;;  %v1137_v6 = vsel %vm1136_vm2, %v1130_v54, %v1135_v1  ;;  %v1149_v8 = vmul.f32 %v3481_v2, %v1132_v61  ;;  %v3445_v1 = vld [vmem:[#allocation10] sm:$0xff]  }
 0x24f   : > { %v1144_v9 = vsel %vm1143_vm3, %v1131_v58, %v1142_v3  ;;  %v1156_v11 = vmul.f32 %v3483_v4, %v1133_v62  ;;  %v1140_v18 = vsel %vm1138_vm5, %v1139_v7, %v1137_v6 }
 0x250   : > { %v1151_v14 = vsel %vm1150_vm6, %v1132_v61, %v1149_v8  ;;  %v1147_v20 = vsel %vm1145_vm4, %v1146_v5, %v1144_v9 }
 0x251   : > { %v1158_v17 = vsel %vm1157_vm7, %v1133_v62, %v1156_v11  ;;  %v1154_v19 = vsel %vm1152_vm8, %v1153_v12, %v1151_v14 }
 0x252   : > { %v1161_v21 = vsel %vm1159_vm9, %v1160_v13, %v1158_v17  ;;  %v1162_v22 = vpack.c.bf16 %v1154_v19, %v1140_v18 }
 0x253   : > { %v1163_v23 = vpack.c.bf16 %v1161_v21, %v1147_v20 }
 0x255   : > { %1183 = vmatprep.subr.bf16.mxu1 %v1163_v23 }
 0x256   : > { %1184 = vmatpush1.bf16.msra.mxu1 %v1162_v22 }
 0x257   : > { %1185 = vmatprep.subr.bf16.mxu1 %v1165_v24 }
 0x25a   : > { %1186 = vmatpush1.bf16.msra.mxu1 %v1164_v35 }
 0x25b   : > { %1267 = vmatprep.subr.bf16.mxu1 %v1237_v30  ;;  %v3448_v30 = vld [vmem:[#allocation7 + $0x10] sm:$0xff]  }
 0x25d   : > { %3208 = vmatmul.mubr.msk.bf16.vlgmr.msra.gmra.mrb[0].mxu1 %vm1176_vm10, %v3443_v36 }
 0x25e   : > { %1268 = vmatpush1.bf16.msra.mxu1 %v1236_v28  ;;  %1225 = vmatprep.mubr.bf16.mxu1 %v5485_v10  ;;  %v3447_v28 = vld [vmem:[#allocation7 + $0x8] sm:$0xff]  }
 0x25f   : > { %1269 = vmatprep.subr.bf16.mxu1 %v1239_v46 }
 0x262   : > { %1270 = vmatpush1.bf16.msra.mxu1 %v1238_v41 }
 0x263   : > { %1271 = vmatprep.subr.bf16.mxu1 %v1241_v60 }
 0x265   : > { %3209 = vmatmul.mubr.msk.bf16.gmra.mrb[4].mxu1 %vm1176_vm10, %v3444_v38 }
 0x266   : > { %1272 = vmatpush1.bf16.msra.mxu1 %v1240_v56  ;;  %1299 = vmatprep.mubr.bf16.mxu1 %v5485_v10 }
 0x26d   : > { %3213 = vmatmul.mubr.msk.bf16.vlgmr.msra.gmra.mrb[8].mxu1 %vm1257_vm11, %v3446_v26 }
 0x26e   : > { %1309 = vmatprep.mubr.bf16.mxu1 %v5485_v10 }
 0x275   : > { %3214 = vmatmul.mubr.msk.bf16.gmra.mrb[12].mxu1 %vm1257_vm11, %v3447_v28 }
 0x276   : > { %1319 = vmatprep.mubr.bf16.mxu1 %v5485_v10 }
 0x27d   : > { %3215 = vmatmul.mubr.msk.bf16.gmra.mrb[16].mxu1 %vm1257_vm11, %v3448_v30 }
 0x27e   : > { %1746 = vmatprep.mubr.bf16.mxu1 %v5485_v10 }
 0x2af   : > { %v1337_v18 = vpop.permute.xlu0 %1336 }
 0x2b3   : > { %v1342_v22 = vpop.permute.xlu0 %1341 }
 0x330   : > { %v1217_v31 = vpop.f32.mrb[0].mxu1 }
 0x331   : > { %v1668_v34 = vmul.f32 0.01, %v1217_v31  ;;  %v1219_v37 = vpop.f32.mrb[1].mxu1  ;;  %vm1660_vm12 = vcmp.ge.f32.partialorder %v1217_v31, 0.0 }
 0x332   : > { %v1669_v39 = vmul.f32 0.01, %v1219_v37  ;;  %v1221_v40 = vpop.f32.mrb[2].mxu1  ;;  %vm1661_vm13 = vcmp.ge.f32.partialorder %v1219_v37, 0.0 }
 0x333   : > { %v1330_v41 = vpack.c.bf16 %v1221_v40, %v1217_v31  ;;  %vm1662_vm14 = vcmp.ge.f32.partialorder %v1221_v40, 0.0  ;;  %v1670_v42 = vmul.f32 0.01, %v1221_v40  ;;  %v1223_v43 = vpop.f32.mrb[3].mxu1  ;;  %v4537_v46 = vsel %vm1660_vm12, %v1217_v31, %v1668_v34 }
 0x334   : > { %vm1663_vm15 = vcmp.ge.f32.partialorder %v1223_v43, 0.0  ;;  %v1671_v44 = vmul.f32 0.01, %v1223_v43  ;;  %v1331_v45 = vpack.c.bf16 %v1223_v43, %v1219_v37  ;;  %v4543_v49 = vsel %vm1661_vm13, %v1219_v37, %v1669_v39 }
 0x335   : > { %v4539_v47 = vsel %vm1662_vm14, %v1221_v40, %v1670_v42 }
 0x336   : > { %v1827_v48 = vpack.c.bf16 %v4539_v47, %v4537_v46  ;;  %1352 = vmatprep.subr.bf16.mxu0 %v1331_v45  ;;  %v4545_v50 = vsel %vm1663_vm15, %v1223_v43, %v1671_v44  ;;  %v3458_v46 = vld [vmem:[#allocation13] sm:$0xff]   ;;  %v978_v47 = vld [vmem:[%s5555_s13] sm:$0xff] }
 0x337   : > { %1353 = vmatpush1.bf16.msra.mxu0 %v1330_v41  ;;  %v1828_v51 = vpack.c.bf16 %v4545_v50, %v4543_v49  ;;  %1999 = vperm.xlu1 %3439, %v978_v47   ;;  %v3459_v49 = vld [vmem:[#allocation13 + $0x8] sm:$0xff]   ;;  %v3460_v50 = vld [vmem:[#allocation13 + $0x10] sm:$0xff]  }
 0x338   : > { %v1227_v52 = vpop.f32.mrb[4].mxu1 }
 0x339   : > { %v1672_v53 = vmul.f32 0.01, %v1227_v52  ;;  %v1229_v54 = vpop.f32.mrb[5].mxu1  ;;  %vm1664_vm1 = vcmp.ge.f32.partialorder %v1227_v52, 0.0 }
 0x33a   : > { %v1673_v55 = vmul.f32 0.01, %v1229_v54  ;;  %v1231_v56 = vpop.f32.mrb[6].mxu1  ;;  %vm1665_vm2 = vcmp.ge.f32.partialorder %v1229_v54, 0.0 }
 0x33b   : > { %v1332_v57 = vpack.c.bf16 %v1231_v56, %v1227_v52  ;;  %vm1666_vm3 = vcmp.ge.f32.partialorder %v1231_v56, 0.0  ;;  %v1674_v58 = vmul.f32 0.01, %v1231_v56  ;;  %v1233_v59 = vpop.f32.mrb[7].mxu1  ;;  %v4549_v62 = vsel %vm1664_vm1, %v1227_v52, %v1672_v53 }
 0x33c   : > { %vm1667_vm4 = vcmp.ge.f32.partialorder %v1233_v59, 0.0  ;;  %v1675_v60 = vmul.f32 0.01, %v1233_v59  ;;  %v1333_v61 = vpack.c.bf16 %v1233_v59, %v1229_v54  ;;  %v4555_v2 = vsel %vm1665_vm2, %v1229_v54, %v1673_v55 }
 0x33d   : > { %v4551_v63 = vsel %vm1666_vm3, %v1231_v56, %v1674_v58 }
 0x33e   : > { %1354 = vmatprep.subr.bf16.mxu0 %v1333_v61  ;;  %v4557_v3 = vsel %vm1667_vm4, %v1233_v59, %v1675_v60 }
 0x33f   : > { %1355 = vmatpush1.bf16.msra.mxu0 %v1332_v57 }
 0x340   : > { %v1301_v5 = vpop.f32.mrb[8].mxu1 }
 0x341   : > { %v1303_v6 = vpop.f32.mrb[9].mxu1 }
 0x342   : > { %3217 = vmatmul.mubr.msk.bf16.vlgmr.msra.gmra.mrb[12].mxu0 %vm1176_vm10, %v3445_v1  ;;  %v1305_v7 = vpop.f32.mrb[10].mxu1 }
 0x343   : > { %1493 = vmatprep.mubr.bf16.mxu0 %v5485_v10  ;;  %v1307_v8 = vpop.f32.mrb[11].mxu1 }
 0x348   : > { %v1311_v9 = vpop.f32.mrb[12].mxu1 }
 0x349   : > { %v1313_v11 = vpop.f32.mrb[13].mxu1 }
 0x34a   : > { %v1315_v12 = vpop.f32.mrb[14].mxu1 }
 0x34b   : > { %v1317_v13 = vpop.f32.mrb[15].mxu1 }
 0x350   : > { %v1321_v14 = vpop.f32.mrb[16].mxu1 }
 0x351   : > { %v1323_v15 = vpop.f32.mrb[17].mxu1 }
 0x352   : > { %v1325_v16 = vpop.f32.mrb[18].mxu1 }
 0x353   : > { %v1327_v17 = vpop.f32.mrb[19].mxu1 }
 0x415   : > { %v1386_v19 = vpop.f32.mrb[12].mxu0 }
 0x416   : > { %v1387_v20 = vadd.f32 %v1386_v19, %v1337_v18  ;;  %v1388_v21 = vpop.f32.mrb[13].mxu0 }
 0x417   : > { %v1389_v23 = vadd.f32 %v1388_v21, %v1337_v18  ;;  %v1390_v24 = vpop.f32.mrb[14].mxu0 }
 0x418   : > { %v3218_v32 = vmul.f32 -1.442695, %v1387_v20  ;;  %v1391_v33 = vadd.f32 %v1390_v24, %v1342_v22  ;;  %v1392_v35 = vpop.f32.mrb[15].mxu0 }
 0x419   : > { %v3219_v36 = vmul.f32 -1.442695, %v1389_v23  ;;  %v1393_v38 = vadd.f32 %v1392_v35, %v1342_v22 }
 0x41a   : > { %3484 = vpow2.f32 %v3218_v32  ;;  %v3220_v26 = vmul.f32 -1.442695, %v1391_v33 }
 0x41b   : > { %3486 = vpow2.f32 %v3219_v36  ;;  %v3221_v25 = vmul.f32 -1.442695, %v1393_v38 }
 0x41c   : > { %3488 = vpow2.f32 %v3220_v26 }
 0x41d   : > { %3490 = vpow2.f32 %v3221_v25 }
 0x424   : > { %v3485_v27 = vpop.eup %3484 }
 0x425   : > { %v3487_v28 = vpop.eup %3486  ;;  %v1407_v29 = vadd.f32 1.0, %v3485_v27 }
 0x426   : > { %v3489_v30 = vpop.eup %3488  ;;  %v1408_v31 = vadd.f32 1.0, %v3487_v28 }
 0x427   : > { %v3491_v34 = vpop.eup %3490  ;;  %3492 = vrcp.f32 %v1407_v29  ;;  %v1409_v37 = vadd.f32 1.0, %v3489_v30 }
 0x428   : > { %3494 = vrcp.f32 %v1408_v31  ;;  %v1410_v39 = vadd.f32 1.0, %v3491_v34 }
 0x429   : > { %3496 = vrcp.f32 %v1409_v37 }
 0x42a   : > { %3498 = vrcp.f32 %v1410_v39 }
 0x431   : > { %v3493_v40 = vpop.eup %3492 }
 0x432   : > { %v3495_v41 = vpop.eup %3494  ;;  %v4563_v42 = vmul.f32 %v3493_v40, %v1301_v5  ;;  %v4565_v43 = vmul.f32 %v3493_v40, %v1311_v9  ;;  %v4567_v44 = vmul.f32 %v3493_v40, %v1321_v14 }
 0x433   : > { %v3497_v45 = vpop.eup %3496  ;;  %v4569_v52 = vmul.f32 %v3495_v41, %v1303_v6  ;;  %v4571_v53 = vmul.f32 %v3495_v41, %v1313_v11  ;;  %v4573_v54 = vmul.f32 %v3495_v41, %v1323_v15  ;;  %v3449_v11 = vld [vmem:[#allocation12] sm:$0xff]  }
 0x434   : > { %v3499_v55 = vpop.eup %3498  ;;  %v4575_v56 = vmul.f32 %v3497_v45, %v1305_v7  ;;  %v4577_v57 = vmul.f32 %v3497_v45, %v1315_v12  ;;  %v4579_v58 = vmul.f32 %v3497_v45, %v1325_v16  ;;  %v3450_v12 = vld [vmem:[#allocation12 + $0x8] sm:$0xff]  }
 0x435   : > { %v4581_v59 = vmul.f32 %v3499_v55, %v1307_v8  ;;  %v4583_v60 = vmul.f32 %v3499_v55, %v1317_v13  ;;  %v4585_v61 = vmul.f32 %v3499_v55, %v1327_v17  ;;  %v3451_v13 = vld [vmem:[#allocation12 + $0x10] sm:$0xff]  }
 0x436   : > { %v1431_v5 = vpack.c.bf16 %v4575_v56, %v4563_v42  ;;  %v1433_v7 = vpack.c.bf16 %v4577_v57, %v4565_v43  ;;  %v1435_v9 = vpack.c.bf16 %v4579_v58, %v4567_v44 }
 0x437   : > { %v1432_v1 = vpack.c.bf16 %v4581_v59, %v4569_v52  ;;  %v1434_v6 = vpack.c.bf16 %v4583_v60, %v4571_v53  ;;  %v1436_v8 = vpack.c.bf16 %v4585_v61, %v4573_v54 }
 0x439   : > { %1461 = vmatprep.subr.bf16.mxu0 %v1432_v1 }
 0x43a   : > { %1462 = vmatpush1.bf16.msra.mxu0 %v1431_v5 }
 0x43b   : > { %1463 = vmatprep.subr.bf16.mxu0 %v1434_v6 }
 0x43e   : > { %1464 = vmatpush1.bf16.msra.mxu0 %v1433_v7 }
 0x43f   : > { %1465 = vmatprep.subr.bf16.mxu0 %v1436_v8 }
 0x442   : > { %1466 = vmatpush1.bf16.msra.mxu0 %v1435_v9 }
 0x445   : > { %3225 = vmatmul.mubr.msk.bf16.vlgmr.msra.gmra.mrb[16].mxu0 %vm1257_vm11, %v3449_v11 }
 0x446   : > { %1503 = vmatprep.mubr.bf16.mxu0 %v5485_v10 }
 0x44d   : > { %3226 = vmatmul.mubr.msk.bf16.gmra.mrb[20].mxu0 %vm1257_vm11, %v3450_v12 }
 0x44e   : > { %1513 = vmatprep.mubr.bf16.mxu0 %v5485_v10 }
 0x455   : > { %3227 = vmatmul.mubr.msk.bf16.gmra.mrb[24].mxu0 %vm1257_vm11, %v3451_v13 }
 0x456   : > { %1879 = vmatprep.mubr.bf16.mxu0 %v5485_v10 }
 0x518   : > { %v4605_v14 = vpop.f32.mrb[16].mxu0 }
 0x519   : > { %v4607_v15 = vpop.f32.mrb[17].mxu0  ;;  %v1524_v18 = vmul.f32 %v4605_v14, %v4563_v42  ;;  %v1544_v19 = vmul.f32 %v4605_v14, %v4605_v14 }
 0x51a   : > { %v4609_v16 = vpop.f32.mrb[18].mxu0  ;;  %v1525_v20 = vmul.f32 %v4607_v15, %v4569_v52  ;;  %v1545_v21 = vmul.f32 %v4607_v15, %v4607_v15 }
 0x51b   : > { %v4611_v17 = vpop.f32.mrb[19].mxu0  ;;  %v1526_v23 = vmul.f32 %v4609_v16, %v4575_v56  ;;  %v1546_v24 = vmul.f32 %v4609_v16, %v4609_v16 }
 0x51c   : > { %v1527_v36 = vmul.f32 %v4611_v17, %v4581_v59  ;;  %v1547_v38 = vmul.f32 %v4611_v17, %v4611_v17 }
 0x520   : > { %v4621_v22 = vpop.f32.mrb[20].mxu0 }
 0x521   : > { %v1528_v32 = vmul.f32 %v4621_v22, %v4565_v43  ;;  %v1548_v33 = vmul.f32 %v4621_v22, %v4621_v22  ;;  %v4631_v35 = vpop.f32.mrb[21].mxu0 }
 0x522   : > { %v1529_v26 = vmul.f32 %v4631_v35, %v4571_v53  ;;  %v1549_v25 = vmul.f32 %v4631_v35, %v4631_v35  ;;  %v4641_v27 = vpop.f32.mrb[22].mxu0 }
 0x523   : > { %v1532_v28 = vadd.f32 %v1528_v32, %v1524_v18  ;;  %v1552_v29 = vadd.f32 %v1548_v33, %v1544_v19  ;;  %v1530_v30 = vmul.f32 %v4641_v27, %v4577_v57  ;;  %v1550_v31 = vmul.f32 %v4641_v27, %v4641_v27  ;;  %v4647_v34 = vpop.f32.mrb[23].mxu0 }
 0x524   : > { %v1533_v37 = vadd.f32 %v1529_v26, %v1525_v20  ;;  %v1553_v39 = vadd.f32 %v1549_v25, %v1545_v21  ;;  %v1531_v40 = vmul.f32 %v4647_v34, %v4583_v60  ;;  %v1551_v41 = vmul.f32 %v4647_v34, %v4647_v34 }
 0x525   : > { %v1534_v45 = vadd.f32 %v1530_v30, %v1526_v23  ;;  %v1554_v55 = vadd.f32 %v1550_v31, %v1546_v24 }
 0x526   : > { %v1535_v1 = vadd.f32 %v1531_v40, %v1527_v36  ;;  %v1555_v5 = vadd.f32 %v1551_v41, %v1547_v38  ;;  %v4670_v40 = vmul.f32 0.2, %v4569_v52  ;;  %v4673_v41 = vmul.f32 0.2, %v4581_v59 }
 0x528   : > { %v1515_v6 = vpop.f32.mrb[24].mxu0 }
 0x529   : > { %v1536_v7 = vmul.f32 %v1515_v6, %v4567_v44  ;;  %v1556_v8 = vmul.f32 %v1515_v6, %v1515_v6  ;;  %v1517_v9 = vpop.f32.mrb[25].mxu0 }
 0x52a   : > { %v1537_v11 = vmul.f32 %v1517_v9, %v4573_v54  ;;  %v1557_v12 = vmul.f32 %v1517_v9, %v1517_v9  ;;  %v1519_v13 = vpop.f32.mrb[26].mxu0 }
 0x52b   : > { %v1540_v18 = vadd.f32 %v1536_v7, %v1532_v28  ;;  %v1560_v19 = vadd.f32 %v1556_v8, %v1552_v29  ;;  %v1538_v20 = vmul.f32 %v1519_v13, %v4579_v58  ;;  %v1558_v21 = vmul.f32 %v1519_v13, %v1519_v13  ;;  %v4656_v32 = vpop.f32.mrb[27].mxu0 }
 0x52c   : > { %v4658_v23 = vadd.f32 %v1537_v11, %v1533_v37  ;;  %v1561_v24 = vadd.f32 %v1557_v12, %v1553_v39  ;;  %v1539_v33 = vmul.f32 %v4656_v32, %v4585_v61  ;;  %v1559_v36 = vmul.f32 %v4656_v32, %v4656_v32 }
 0x52d   : > { %v1564_v38 = vadd.f32 1e-06, %v1560_v19  ;;  %v4664_v26 = vadd.f32 %v1538_v20, %v1534_v45  ;;  %v1562_v25 = vadd.f32 %v1558_v21, %v1554_v55  ;;  %v1624_v39 = vmul.f32 0.2, %v4563_v42 }
 0x52e   : > { %v1565_v28 = vadd.f32 1e-06, %v1561_v24  ;;  %v4666_v29 = vadd.f32 %v1539_v33, %v1535_v1  ;;  %v1563_v30 = vadd.f32 %v1559_v36, %v1555_v5  ;;  %v1626_v45 = vmul.f32 0.2, %v4575_v56 }
 0x52f   : > { %3500 = vrcp.f32 %v1564_v38  ;;  %v1566_v31 = vadd.f32 1e-06, %v1562_v25  ;;  %v4677_v1 = vmul.f32 0.2, %v4571_v53  ;;  %v4680_v5 = vmul.f32 0.2, %v4583_v60 }
 0x530   : > { %3502 = vrcp.f32 %v1565_v28  ;;  %v1567_v37 = vadd.f32 1e-06, %v1563_v30  ;;  %v1628_v7 = vmul.f32 0.2, %v4565_v43  ;;  %v1630_v12 = vmul.f32 0.2, %v4577_v57 }
 0x531   : > { %3504 = vrcp.f32 %v1566_v31  ;;  %v4685_v19 = vmul.f32 0.2, %v4573_v54  ;;  %v4688_v20 = vmul.f32 0.2, %v4567_v44  ;;  %vm1600_vm5 = vcmp.ge.f32.partialorder %v1540_v18, 0.0 }
 0x532   : > { %3506 = vrcp.f32 %v1567_v37  ;;  %vm1602_vm6 = vcmp.ge.f32.partialorder %v4664_v26, 0.0  ;;  %v4693_v33 = vmul.f32 0.2, %v4579_v58  ;;  %vm1601_vm7 = vcmp.ge.f32.partialorder %v4658_v23, 0.0 }
 0x533   : > { %vm1603_vm8 = vcmp.ge.f32.partialorder %v4666_v29, 0.0 }
 0x539   : > { %v3501_v55 = vpop.eup %3500 }
 0x53a   : > { %v3503_v8 = vpop.eup %3502  ;;  %v1569_v11 = vmul.f32 %v3501_v55, %v1540_v18 }
 0x53b   : > { %v3505_v21 = vpop.eup %3504  ;;  %v1571_v24 = vmul.f32 %v3503_v8, %v4658_v23 }
 0x53c   : > { %v3507_v36 = vpop.eup %3506  ;;  %v1576_v38 = vmul.f32 %v1569_v11, %v4605_v14  ;;  %v1580_v25 = vmul.f32 %v1569_v11, %v4621_v22  ;;  %v1584_v28 = vmul.f32 %v1569_v11, %v1515_v6  ;;  %v1573_v30 = vmul.f32 %v3505_v21, %v4664_v26 }
 0x53d   : > { %v1577_v31 = vmul.f32 %v1571_v24, %v4607_v15  ;;  %v1581_v37 = vmul.f32 %v1571_v24, %v4631_v35  ;;  %v1585_v55 = vmul.f32 %v1571_v24, %v1517_v9  ;;  %v1575_v8 = vmul.f32 %v3507_v36, %v4666_v29 }
 0x53e   : > { %v1588_v0 = vsub.f32 %v4563_v42, %v1576_v38  ;;  %v1592_v14 = vsub.f32 %v4565_v43, %v1580_v25  ;;  %v1596_v22 = vsub.f32 %v4567_v44, %v1584_v28  ;;  %v1578_v6 = vmul.f32 %v1573_v30, %v4609_v16 }
 0x53f   : > { %v1597_v11 = vsub.f32 %v4573_v54, %v1585_v55  ;;  %v1582_v21 = vmul.f32 %v1573_v30, %v4641_v27  ;;  %v1586_v4 = vmul.f32 %v1573_v30, %v1519_v13  ;;  %v1579_v15 = vmul.f32 %v1575_v8, %v4611_v17 }
 0x540   : > { %v1612_v35 = vsel %vm1600_vm5, %v4563_v42, %v1588_v0  ;;  %v1616_v9 = vsel %vm1600_vm5, %v4565_v43, %v1592_v14  ;;  %v1620_v24 = vsel %vm1600_vm5, %v4567_v44, %v1596_v22  ;;  %v1590_v36 = vsub.f32 %v4575_v56, %v1578_v6 }
 0x541   : > { %v1636_v38 = vmul.f32 0.8, %v1612_v35  ;;  %v1640_v16 = vmul.f32 0.8, %v1616_v9  ;;  %v1644_v25 = vmul.f32 0.8, %v1620_v24  ;;  %v1594_v28 = vsub.f32 %v4577_v57, %v1582_v21 }
 0x542   : > { %v1598_v27 = vsub.f32 %v4579_v58, %v1586_v4  ;;  %v1614_v17 = vsel %vm1602_vm6, %v4575_v56, %v1590_v36  ;;  %v1583_v0 = vmul.f32 %v1575_v8, %v4647_v34  ;;  %v1587_v42 = vmul.f32 %v1575_v8, %v4656_v32 }
 0x543   : > { %v1618_v43 = vsel %vm1602_vm6, %v4577_v57, %v1594_v28  ;;  %v1638_v44 = vmul.f32 0.8, %v1614_v17  ;;  %v1589_v13 = vsub.f32 %v4569_v52, %v1577_v31  ;;  %v1591_v18 = vsub.f32 %v4581_v59, %v1579_v15 }
 0x544   : > { %v1622_v4 = vsel %vm1602_vm6, %v4579_v58, %v1598_v27  ;;  %v1642_v30 = vmul.f32 0.8, %v1618_v43  ;;  %v1599_v56 = vsub.f32 %v4585_v61, %v1587_v42  ;;  %v1648_v55 = vadd.f32 %v1636_v38, %v1624_v39 }
 0x545   : > { %v1646_v34 = vmul.f32 0.8, %v1622_v4  ;;  %v1613_v32 = vsel %vm1601_vm7, %v4569_v52, %v1589_v13  ;;  %v1615_v57 = vsel %vm1603_vm8, %v4581_v59, %v1591_v18  ;;  %v1650_v31 = vadd.f32 %v1638_v44, %v1626_v45 }
 0x546   : > { %v1637_v8 = vmul.f32 0.8, %v1613_v32  ;;  %v1639_v14 = vmul.f32 0.8, %v1615_v57  ;;  %v1593_v22 = vsub.f32 %v4571_v53, %v1581_v37  ;;  %v1595_v58 = vsub.f32 %v4583_v60, %v1583_v0 }
 0x547   : > { %v1684_v26 = vpack.c.bf16 %v1650_v31, %v1648_v55  ;;  %v1652_v6 = vadd.f32 %v1640_v16, %v1628_v7  ;;  %v1654_v21 = vadd.f32 %v1642_v30, %v1630_v12  ;;  %v1621_v39 = vsel %vm1601_vm7, %v4573_v54, %v1597_v11 }
 0x548   : > { %v1649_v52 = vadd.f32 %v1637_v8, %v4670_v40  ;;  %v1651_v15 = vadd.f32 %v1639_v14, %v4673_v41  ;;  %v1617_v59 = vsel %vm1601_vm7, %v4571_v53, %v1593_v22  ;;  %v1619_v45 = vsel %vm1603_vm8, %v4583_v60, %v1595_v58 }
 0x549   : > { %v1641_v37 = vmul.f32 0.8, %v1617_v59  ;;  %v1643_v35 = vmul.f32 0.8, %v1619_v45  ;;  %v1686_v7 = vpack.c.bf16 %v1654_v21, %v1652_v6  ;;  %v1623_v12 = vsel %vm1603_vm8, %v4585_v61, %v1599_v56 }
 0x54a   : > { %v1685_v54 = vpack.c.bf16 %v1651_v15, %v1649_v52  ;;  %v1635_v40 = vmul.f32 0.2, %v4585_v61  ;;  %v1645_v11 = vmul.f32 0.8, %v1621_v39  ;;  %v1647_v41 = vmul.f32 0.8, %v1623_v12 }
 0x54b   : > { %v1653_v9 = vadd.f32 %v1641_v37, %v4677_v1  ;;  %v1655_v53 = vadd.f32 %v1643_v35, %v4680_v5  ;;  %v1656_v23 = vadd.f32 %v1644_v25, %v4688_v20  ;;  %v1658_v60 = vadd.f32 %v1646_v34, %v4693_v33  ;;  %v3452_v61 = vld [vmem:[%s5552_s25] sm:$0xff]   ;;  %v3453_v1 = vld [vmem:[%s5552_s25 + $0x8] sm:$0xff]   ;;  %v3454_v5 = vld [vmem:[%s5552_s25 + $0x10] sm:$0xff]  }
 0x54c   : > { %1714 = vmatprep.subr.bf16.mxu1 %v1685_v54  ;;  %v1657_v24 = vadd.f32 %v1645_v11, %v4685_v19  ;;  %v1659_v36 = vadd.f32 %v1647_v41, %v1635_v40 }
 0x54d   : > { %1715 = vmatpush1.bf16.msra.mxu1 %v1684_v26  ;;  %v1687_v29 = vpack.c.bf16 %v1655_v53, %v1653_v9  ;;  %v1688_v38 = vpack.c.bf16 %v1658_v60, %v1656_v23 }
 0x54e   : > { %v1689_v16 = vpack.c.bf16 %v1659_v36, %v1657_v24 }
 0x54f   : > { %1716 = vmatprep.subr.bf16.mxu1 %v1687_v29 }
 0x551   : > { %1717 = vmatpush1.bf16.msra.mxu1 %v1686_v7 }
 0x552   : > { %1718 = vmatprep.subr.bf16.mxu1 %v1689_v16 }
 0x555   : > { %1719 = vmatpush1.bf16.msra.mxu1 %v1688_v38 }
 0x558   : > { %3231 = vmatmul.mubr.msk.bf16.vlgmr.msra.gmra.mrb[20].mxu1 %vm1257_vm11, %v3452_v61 }
 0x559   : > { %1756 = vmatprep.mubr.bf16.mxu1 %v5485_v10 }
 0x560   : > { %3232 = vmatmul.mubr.msk.bf16.gmra.mrb[24].mxu1 %vm1257_vm11, %v3453_v1 }
 0x561   : > { %1766 = vmatprep.mubr.bf16.mxu1 %v5485_v10 }
 0x568   : > { %3233 = vmatmul.mubr.msk.bf16.gmra.mrb[28].mxu1 %vm1257_vm11, %v3454_v5 }
 0x569   : > { %1962 = vmatprep.mubr.bf16.mxu1 %v5485_v10 }
 0x62b   : > { %v1748_v19 = vpop.f32.mrb[20].mxu1 }
 0x62c   : > { %v1750_v20 = vpop.f32.mrb[21].mxu1  ;;  %v1777_v0 = vmul.f32 %v1748_v19, %v1748_v19 }
 0x62d   : > { %v1752_v33 = vpop.f32.mrb[22].mxu1  ;;  %v1778_v44 = vmul.f32 %v1750_v20, %v1750_v20 }
 0x62e   : > { %v1900_v25 = vpack.c.bf16 %v1752_v33, %v1748_v19  ;;  %v1754_v28 = vpop.f32.mrb[23].mxu1  ;;  %v1779_v4 = vmul.f32 %v1752_v33, %v1752_v33 }
 0x62f   : > { %v1901_v27 = vpack.c.bf16 %v1754_v28, %v1750_v20  ;;  %v1780_v32 = vmul.f32 %v1754_v28, %v1754_v28 }
 0x631   : > { %1930 = vmatprep.subr.bf16.mxu1 %v1901_v27 }
 0x632   : > { %1931 = vmatpush1.bf16.msra.mxu1 %v1900_v25 }
 0x633   : > { %v1758_v17 = vpop.f32.mrb[24].mxu1 }
 0x634   : > { %v1781_v42 = vmul.f32 %v1758_v17, %v1758_v17  ;;  %v1760_v43 = vpop.f32.mrb[25].mxu1 }
 0x635   : > { %v1782_v13 = vmul.f32 %v1760_v43, %v1760_v43  ;;  %v1762_v18 = vpop.f32.mrb[26].mxu1 }
 0x636   : > { %v1785_v30 = vadd.f32 %v1781_v42, %v1777_v0  ;;  %v1783_v56 = vmul.f32 %v1762_v18, %v1762_v18  ;;  %v1902_v55 = vpack.c.bf16 %v1762_v18, %v1758_v17  ;;  %v1764_v34 = vpop.f32.mrb[27].mxu1  ;;  %v5553_v0 = vpack.c.bf16 %v4557_v3, %v4555_v2  ;;  %v3455_v42 = vld [vmem:[#allocation15] sm:$0xff]  }
 0x637   : > { %v1786_v57 = vadd.f32 %v1782_v13, %v1778_v44  ;;  %v1784_v31 = vmul.f32 %v1764_v34, %v1764_v34  ;;  %v1903_v8 = vpack.c.bf16 %v1764_v34, %v1760_v43  ;;  %v5554_v43 = vpack.c.bf16 %v4551_v63, %v4549_v62  ;;  %v3456_v44 = vld [vmem:[#allocation15 + $0x8] sm:$0xff]  }
 0x638   : > { %v1787_v14 = vadd.f32 %v1783_v56, %v1779_v4 }
 0x639   : > { %v1788_v22 = vadd.f32 %v1784_v31, %v1780_v32  ;;  %1932 = vmatprep.subr.bf16.mxu1 %v1903_v8  ;;  %v3457_v32 = vld [vmem:[%s5556_s12] sm:$0xff]   ;;  %s5588_s12 = sld [smem:[#allocation58_spill]] }
 0x63a   : > { %1933 = vmatpush1.bf16.msra.mxu1 %v1902_v55 }
 0x63b   : > { %v1768_v58 = vpop.f32.mrb[28].mxu1 }
 0x63c   : > { %v1789_v26 = vmul.f32 %v1768_v58, %v1768_v58  ;;  %v1770_v6 = vpop.f32.mrb[29].mxu1 }
 0x63d   : > { %v1790_v21 = vmul.f32 %v1770_v6, %v1770_v6  ;;  %v1772_v39 = vpop.f32.mrb[30].mxu1 }
 0x63e   : > { %v1793_v52 = vadd.f32 %v1789_v26, %v1785_v30  ;;  %v1791_v15 = vmul.f32 %v1772_v39, %v1772_v39  ;;  %v1904_v59 = vpack.c.bf16 %v1772_v39, %v1768_v58  ;;  %v1774_v45 = vpop.f32.mrb[31].mxu1 }
 0x63f   : > { %v1794_v37 = vadd.f32 %v1790_v21, %v1786_v57  ;;  %v1792_v35 = vmul.f32 %v1774_v45, %v1774_v45  ;;  %v1905_v7 = vpack.c.bf16 %v1774_v45, %v1770_v6 }
 0x640   : > { %3508 = vrsqrt.f32 %v1793_v52  ;;  %v1795_v12 = vadd.f32 %v1791_v15, %v1787_v14  ;;  %vm1799_vm9 = vcmp.eq.f32.partialorder %v1793_v52, inf  ;;  %vm1801_vm14 = vcmp.eq.f32.partialorder %v1793_v52, 0.0 }
 0x641   : > { %3510 = vrsqrt.f32 %v1794_v37  ;;  %v1796_v54 = vadd.f32 %v1792_v35, %v1788_v22  ;;  %1934 = vmatprep.subr.bf16.mxu1 %v1905_v7  ;;  %vm1806_vm12 = vcmp.eq.f32.partialorder %v1794_v37, inf  ;;  %vm1808_vm13 = vcmp.eq.f32.partialorder %v1794_v37, 0.0 }
 0x642   : > { %3512 = vrsqrt.f32 %v1795_v12  ;;  %1935 = vmatpush1.bf16.msra.mxu1 %v1904_v59  ;;  %v1809_v60 = vand.u32 2147483648, %v1794_v37  ;;  %v1802_v36 = vand.u32 2147483648, %v1793_v52  ;;  %vm1813_vm15 = vcmp.eq.f32.partialorder %v1795_v12, inf  ;;  %v2000_v59 = vpop.permute.xlu1 %1999 }
 0x643   : > { %3514 = vrsqrt.f32 %v1796_v54  ;;  %v1816_v61 = vand.u32 2147483648, %v1795_v12  ;;  %vm1820_vm1 = vcmp.eq.f32.partialorder %v1796_v54, inf  ;;  %v1823_v1 = vand.u32 2147483648, %v1796_v54 }
 0x644   : > { %vm1815_vm2 = vcmp.eq.f32.partialorder %v1795_v12, 0.0  ;;  %vm1822_vm3 = vcmp.eq.f32.partialorder %v1796_v54, 0.0 }
 0x645   : > { %3241 = vmatmul.mubr.msk.bf16.vlgmr.msra.gmra.mrb[32].mxu1 %vm1257_vm11, %v3458_v46 }
 0x646   : > { %1972 = vmatprep.mubr.bf16.mxu1 %v5485_v10 }
 0x64a   : > { %v3509_v40 = vpop.eup %3508 }
 0x64b   : > { %v3511_v11 = vpop.eup %3510  ;;  %v1798_v41 = vmul.f32 %v3509_v40, %v1793_v52 }
 0x64c   : > { %v3513_v9 = vpop.eup %3512  ;;  %v1805_v53 = vmul.f32 %v3511_v11, %v1794_v37 }
 0x64d   : > { %v3515_v23 = vpop.eup %3514  ;;  %v1800_v24 = vsel %vm1799_vm9, %v1793_v52, %v1798_v41  ;;  %v1812_v29 = vmul.f32 %v3513_v9, %v1795_v12  ;;  %3242 = vmatmul.mubr.msk.bf16.gmra.mrb[36].mxu1 %vm1257_vm11, %v3459_v49 }
 0x64e   : > { %v1807_v38 = vsel %vm1806_vm12, %v1794_v37, %v1805_v53  ;;  %v1819_v16 = vmul.f32 %v3515_v23, %v1796_v54  ;;  %v1803_v20 = vsel %vm1801_vm14, %v1802_v36, %v1800_v24  ;;  %1982 = vmatprep.mubr.bf16.mxu1 %v5485_v10 }
 0x64f   : > { %v1814_v5 = vsel %vm1813_vm15, %v1795_v12, %v1812_v29  ;;  %v1810_v25 = vsel %vm1808_vm13, %v1809_v60, %v1807_v38 }
 0x650   : > { %v1821_v19 = vsel %vm1820_vm1, %v1796_v54, %v1819_v16  ;;  %v1817_v33 = vsel %vm1815_vm2, %v1816_v61, %v1814_v5 }
 0x651   : > { %v1824_v28 = vsel %vm1822_vm3, %v1823_v1, %v1821_v19  ;;  %v1825_v27 = vpack.c.bf16 %v1817_v33, %v1803_v20 }
 0x652   : > { %v1826_v17 = vpack.c.bf16 %v1824_v28, %v1810_v25 }
 0x654   : > { %1847 = vmatprep.subr.bf16.mxu0 %v1826_v17 }
 0x655   : > { %1848 = vmatpush1.bf16.msra.mxu0 %v1825_v27  ;;  %3243 = vmatmul.mubr.msk.bf16.gmra.mrb[40].mxu1 %vm1257_vm11, %v3460_v50 }
 0x656   : > { %1849 = vmatprep.subr.bf16.mxu0 %v1828_v51  ;;  %2486 = vmatprep.mubr.bf16.mxu1 %v5485_v10 }
 0x659   : > { %1850 = vmatpush1.bf16.msra.mxu0 %v1827_v48  ;;  %v979_v48 = vld [vmem:[%s5555_s13 + $0x8] sm:$0xff] }
 0x65a   : > { %1851 = vmatprep.subr.bf16.mxu0 %v5553_v0  ;;  %2004 = vperm.xlu1 %3439, %v979_v48  }
 0x65d   : > { %1852 = vmatpush1.bf16.msra.mxu0 %v5554_v43 }
 0x660   : > { %3236 = vmatmul.mubr.msk.bf16.vlgmr.msra.gmra.mrb[28].mxu0 %vm1257_vm11, %v3455_v42 }
 0x661   : > { %1889 = vmatprep.mubr.bf16.mxu0 %v5485_v10 }
 0x668   : > { %3237 = vmatmul.mubr.msk.bf16.gmra.mrb[32].mxu0 %vm1257_vm11, %v3456_v44 }
 0x669   : > { %2047 = vmatprep.mubr.bf16.mxu0 %v5485_v10 }
 0x6d9   : > { %v2005_v7 = vpop.permute.xlu1 %2004 }
 0x718   : > { %v1964_v57 = vpop.f32.mrb[32].mxu1 }
 0x719   : > { %v1966_v31 = vpop.f32.mrb[33].mxu1 }
 0x71a   : > { %v1968_v8 = vpop.f32.mrb[34].mxu1 }
 0x71b   : > { %v1970_v14 = vpop.f32.mrb[35].mxu1 }
 0x720   : > { %v1974_v22 = vpop.f32.mrb[36].mxu1 }
 0x721   : > { %v1976_v58 = vpop.f32.mrb[37].mxu1 }
 0x722   : > { %v1978_v26 = vpop.f32.mrb[38].mxu1 }
 0x723   : > { %v1980_v6 = vpop.f32.mrb[39].mxu1 }
 0x728   : > { %v1984_v21 = vpop.f32.mrb[40].mxu1 }
 0x729   : > { %v1986_v39 = vpop.f32.mrb[41].mxu1 }
 0x72a   : > { %v1988_v52 = vpop.f32.mrb[42].mxu1 }
 0x72b   : > { %v1990_v15 = vpop.f32.mrb[43].mxu1 }
 0x733   : > { %v1881_v51 = vpop.f32.mrb[28].mxu0 }
 0x734   : > { %v1883_v62 = vpop.f32.mrb[29].mxu0 }
 0x735   : > { %v1885_v63 = vpop.f32.mrb[30].mxu0 }
 0x736   : > { %v4806_v2 = vpack.c.bf16 %v1885_v63, %v1881_v51  ;;  %v1887_v3 = vpop.f32.mrb[31].mxu0 }
 0x737   : > { %v4808_v13 = vpack.c.bf16 %v1887_v3, %v1883_v62 }
 0x739   : > { %2015 = vmatprep.subr.bf16.mxu0 %v4808_v13 }
 0x73a   : > { %2016 = vmatpush1.bf16.msra.mxu0 %v4806_v2 }
 0x73b   : > { %v1891_v18 = vpop.f32.mrb[32].mxu0 }
 0x73c   : > { %v1893_v4 = vpop.f32.mrb[33].mxu0 }
 0x73d   : > { %v1895_v30 = vpop.f32.mrb[34].mxu0 }
 0x73e   : > { %v4812_v56 = vpack.c.bf16 %v1895_v30, %v1891_v18  ;;  %v1897_v55 = vpop.f32.mrb[35].mxu0  ;;  %v3461_v30 = vld [vmem:[%s5557_s27] sm:$0xff]  }
 0x73f   : > { %v4814_v34 = vpack.c.bf16 %v1897_v55, %v1893_v4  ;;  %v3462_v55 = vld [vmem:[%s5557_s27 + $0x8] sm:$0xff]  }
 0x741   : > { %2017 = vmatprep.subr.bf16.mxu0 %v4814_v34 }
 0x742   : > { %2018 = vmatpush1.bf16.msra.mxu0 %v4812_v56 }
 0x745   : > { %3245 = vmatmul.mubr.msk.bf16.vlgmr.msra.gmra.mrb[36].mxu0 %vm1176_vm10, %v3457_v32  ;;  %v3463_v32 = vld [vmem:[%s5557_s27 + $0x10] sm:$0xff]  }
 0x746   : > { %2204 = vmatprep.mubr.bf16.mxu0 %v5485_v10 }
 0x818   : > { %v2049_v45 = vpop.f32.mrb[36].mxu0 }
 0x819   : > { %v2050_v37 = vadd.f32 %v2049_v45, %v2000_v59  ;;  %v2051_v35 = vpop.f32.mrb[37].mxu0 }
 0x81a   : > { %v2052_v12 = vadd.f32 %v2051_v35, %v2000_v59  ;;  %v2053_v54 = vpop.f32.mrb[38].mxu0 }
 0x81b   : > { %v3246_v40 = vmul.f32 -1.442695, %v2050_v37  ;;  %v2054_v11 = vadd.f32 %v2053_v54, %v2005_v7  ;;  %v2055_v41 = vpop.f32.mrb[39].mxu0 }
 0x81c   : > { %v3247_v9 = vmul.f32 -1.442695, %v2052_v12  ;;  %v2056_v53 = vadd.f32 %v2055_v41, %v2005_v7 }
 0x81d   : > { %3516 = vpow2.f32 %v3246_v40  ;;  %v3248_v23 = vmul.f32 -1.442695, %v2054_v11 }
 0x81e   : > { %3518 = vpow2.f32 %v3247_v9  ;;  %v3249_v60 = vmul.f32 -1.442695, %v2056_v53 }
 0x81f   : > { %3520 = vpow2.f32 %v3248_v23 }
 0x820   : > { %3522 = vpow2.f32 %v3249_v60 }
 0x827   : > { %v3517_v24 = vpop.eup %3516 }
 0x828   : > { %v3519_v36 = vpop.eup %3518  ;;  %v2070_v29 = vadd.f32 1.0, %v3517_v24 }
 0x829   : > { %v3521_v38 = vpop.eup %3520  ;;  %v2071_v16 = vadd.f32 1.0, %v3519_v36 }
 0x82a   : > { %v3523_v61 = vpop.eup %3522  ;;  %3524 = vrcp.f32 %v2070_v29  ;;  %v2072_v1 = vadd.f32 1.0, %v3521_v38 }
 0x82b   : > { %3526 = vrcp.f32 %v2071_v16  ;;  %v2073_v5 = vadd.f32 1.0, %v3523_v61 }
 0x82c   : > { %3528 = vrcp.f32 %v2072_v1 }
 0x82d   : > { %3530 = vrcp.f32 %v2073_v5 }
 0x834   : > { %v3525_v19 = vpop.eup %3524 }
 0x835   : > { %v3527_v20 = vpop.eup %3526  ;;  %v2082_v33 = vmul.f32 %v3525_v19, %v1964_v57  ;;  %v2086_v25 = vmul.f32 %v3525_v19, %v1974_v22  ;;  %v2090_v28 = vmul.f32 %v3525_v19, %v1984_v21  ;;  %v3464_v57 = vld [vmem:[%s5557_s27 + $0x18] sm:$0xff]  }
 0x836   : > { %v3529_v27 = vpop.eup %3528  ;;  %v2083_v17 = vmul.f32 %v3527_v20, %v1966_v31  ;;  %v2087_v0 = vmul.f32 %v3527_v20, %v1976_v58  ;;  %v2091_v42 = vmul.f32 %v3527_v20, %v1986_v39  ;;  %v3465_v31 = vld [vmem:[%s5557_s27 + $0x20] sm:$0xff]   ;;  %v3468_v22 = vld [vmem:[%s5557_s27 + $0x38] sm:$0xff]  }
 0x837   : > { %v3531_v43 = vpop.eup %3530  ;;  %v2084_v44 = vmul.f32 %v3529_v27, %v1968_v8  ;;  %v2088_v46 = vmul.f32 %v3529_v27, %v1978_v26  ;;  %v2092_v47 = vmul.f32 %v3529_v27, %v1988_v52  ;;  %v3466_v8 = vld [vmem:[%s5557_s27 + $0x28] sm:$0xff]   ;;  %v3469_v58 = vld [vmem:[%s5557_s27 + $0x40] sm:$0xff]  }
 0x838   : > { %v2085_v48 = vmul.f32 %v3531_v43, %v1970_v14  ;;  %v2089_v49 = vmul.f32 %v3531_v43, %v1980_v6  ;;  %v2093_v50 = vmul.f32 %v3531_v43, %v1990_v15  ;;  %v3467_v14 = vld [vmem:[%s5557_s27 + $0x30] sm:$0xff]  }
 0x839   : > { %v2094_v51 = vpack.c.bf16 %v2084_v44, %v2082_v33  ;;  %v2096_v62 = vpack.c.bf16 %v2088_v46, %v2086_v25  ;;  %v2098_v63 = vpack.c.bf16 %v2092_v47, %v2090_v28 }
 0x83a   : > { %v2095_v3 = vpack.c.bf16 %v2085_v48, %v2083_v17  ;;  %v2097_v18 = vpack.c.bf16 %v2089_v49, %v2087_v0  ;;  %v2099_v4 = vpack.c.bf16 %v2093_v50, %v2091_v42 }
 0x83c   : > { %2172 = vmatprep.subr.bf16.mxu0 %v2095_v3 }
 0x83d   : > { %2173 = vmatpush1.bf16.msra.mxu0 %v2094_v51 }
 0x83e   : > { %2174 = vmatprep.subr.bf16.mxu0 %v2097_v18 }
 0x841   : > { %2175 = vmatpush1.bf16.msra.mxu0 %v2096_v62 }
 0x842   : > { %2176 = vmatprep.subr.bf16.mxu0 %v2099_v4 }
 0x845   : > { %2177 = vmatpush1.bf16.msra.mxu0 %v2098_v63 }
 0x848   : > { %3259 = vmatmul.mubr.msk.bf16.vlgmr.msra.gmra.mrb[40].mxu0 %vm1257_vm11, %v3461_v30 }
 0x849   : > { %2214 = vmatprep.mubr.bf16.mxu0 %v5485_v10 }
 0x850   : > { %3260 = vmatmul.mubr.msk.bf16.gmra.mrb[44].mxu0 %vm1257_vm11, %v3462_v55 }
 0x851   : > { %2224 = vmatprep.mubr.bf16.mxu0 %v5485_v10 }
 0x858   : > { %3261 = vmatmul.mubr.msk.bf16.gmra.mrb[48].mxu0 %vm1257_vm11, %v3463_v32 }
 0x859   : > { %2234 = vmatprep.mubr.bf16.mxu0 %v5485_v10 }
 0x860   : > { %3262 = vmatmul.mubr.msk.bf16.gmra.mrb[52].mxu0 %vm1257_vm11, %v3464_v57 }
 0x861   : > { %2244 = vmatprep.mubr.bf16.mxu0 %v5485_v10 }
 0x868   : > { %3263 = vmatmul.mubr.msk.bf16.gmra.mrb[56].mxu0 %vm1257_vm11, %v3465_v31 }
 0x869   : > { %2254 = vmatprep.mubr.bf16.mxu0 %v5485_v10 }
 0x870   : > { %3264 = vmatmul.mubr.msk.bf16.gmra.mrb[60].mxu0 %vm1257_vm11, %v3466_v8 }
 0x871   : > { %2264 = vmatprep.mubr.bf16.mxu0 %v5485_v10 }
 0x878   : > { %3265 = vmatmul.mubr.msk.bf16.gmra.mrb[64].mxu0 %vm1257_vm11, %v3467_v14 }
 0x879   : > { %2274 = vmatprep.mubr.bf16.mxu0 %v5485_v10 }
 0x880   : > { %3266 = vmatmul.mubr.msk.bf16.gmra.mrb[68].mxu0 %vm1257_vm11, %v3468_v22 }
 0x881   : > { %2284 = vmatprep.mubr.bf16.mxu0 %v5485_v10 }
 0x888   : > { %3267 = vmatmul.mubr.msk.bf16.gmra.mrb[72].mxu0 %vm1257_vm11, %v3469_v58 }
 0x91b   : > { %v4867_v26 = vpop.f32.mrb[40].mxu0 }
 0x91c   : > { %v4869_v6 = vpop.f32.mrb[41].mxu0  ;;  %v2295_v60 = vmul.f32 %v4867_v26, %v4867_v26 }
 0x91d   : > { %v4871_v21 = vpop.f32.mrb[42].mxu0  ;;  %v2296_v29 = vmul.f32 %v4869_v6, %v4869_v6 }
 0x91e   : > { %v4875_v52 = vpop.f32.mrb[43].mxu0  ;;  %v2297_v61 = vmul.f32 %v4871_v21, %v4871_v21 }
 0x91f   : > { %v2298_v33 = vmul.f32 %v4875_v52, %v4875_v52 }
 0x923   : > { %v4879_v59 = vpop.f32.mrb[44].mxu0 }
 0x924   : > { %v4881_v45 = vpop.f32.mrb[45].mxu0  ;;  %v2299_v43 = vmul.f32 %v4879_v59, %v4879_v59 }
 0x925   : > { %v4883_v37 = vpop.f32.mrb[46].mxu0  ;;  %v2300_v47 = vmul.f32 %v4881_v45, %v4881_v45 }
 0x926   : > { %v4887_v7 = vpop.f32.mrb[47].mxu0  ;;  %v2301_v50 = vmul.f32 %v4883_v37, %v4883_v37 }
 0x927   : > { %v2302_v18 = vmul.f32 %v4887_v7, %v4887_v7 }
 0x92b   : > { %v4891_v54 = vpop.f32.mrb[48].mxu0 }
 0x92c   : > { %v4893_v40 = vpop.f32.mrb[49].mxu0  ;;  %v2303_v8 = vmul.f32 %v4891_v54, %v4891_v54 }
 0x92d   : > { %v4895_v11 = vpop.f32.mrb[50].mxu0  ;;  %v2304_v58 = vmul.f32 %v4893_v40, %v4893_v40 }
 0x92e   : > { %v4899_v9 = vpop.f32.mrb[51].mxu0 }
 0x933   : > { %v4903_v23 = vpop.f32.mrb[52].mxu0 }
 0x934   : > { %v2307_v24 = vmul.f32 %v4903_v23, %v4903_v23  ;;  %v4909_v36 = vpop.f32.mrb[53].mxu0 }
 0x935   : > { %v2308_v38 = vmul.f32 %v4909_v36, %v4909_v36  ;;  %v4915_v16 = vpop.f32.mrb[54].mxu0 }
 0x936   : > { %v2319_v1 = vadd.f32 %v2307_v24, %v2295_v60  ;;  %v2309_v5 = vmul.f32 %v4915_v16, %v4915_v16  ;;  %v4923_v20 = vpop.f32.mrb[55].mxu0 }
 0x937   : > { %v2320_v25 = vadd.f32 %v2308_v38, %v2296_v29  ;;  %v2310_v28 = vmul.f32 %v4923_v20, %v4923_v20  ;;  %v2305_v29 = vmul.f32 %v4895_v11, %v4895_v11 }
 0x938   : > { %v2321_v17 = vadd.f32 %v2309_v5, %v2297_v61 }
 0x939   : > { %v2322_v0 = vadd.f32 %v2310_v28, %v2298_v33  ;;  %v2306_v28 = vmul.f32 %v4899_v9, %v4899_v9 }
 0x93b   : > { %v4931_v42 = vpop.f32.mrb[56].mxu0 }
 0x93c   : > { %v2311_v44 = vmul.f32 %v4931_v42, %v4931_v42  ;;  %v4937_v46 = vpop.f32.mrb[57].mxu0 }
 0x93d   : > { %v2312_v48 = vmul.f32 %v4937_v46, %v4937_v46  ;;  %v4943_v49 = vpop.f32.mrb[58].mxu0 }
 0x93e   : > { %v2323_v51 = vadd.f32 %v2311_v44, %v2299_v43  ;;  %v2313_v62 = vmul.f32 %v4943_v49, %v4943_v49  ;;  %v4951_v3 = vpop.f32.mrb[59].mxu0 }
 0x93f   : > { %v2324_v4 = vadd.f32 %v2312_v48, %v2300_v47  ;;  %v2314_v30 = vmul.f32 %v4951_v3, %v4951_v3 }
 0x940   : > { %v2325_v32 = vadd.f32 %v2313_v62, %v2301_v50 }
 0x941   : > { %v2326_v57 = vadd.f32 %v2314_v30, %v2302_v18 }
 0x943   : > { %v4959_v31 = vpop.f32.mrb[60].mxu0 }
 0x944   : > { %v2315_v14 = vmul.f32 %v4959_v31, %v4959_v31  ;;  %v4965_v22 = vpop.f32.mrb[61].mxu0 }
 0x945   : > { %v2316_v60 = vmul.f32 %v4965_v22, %v4965_v22  ;;  %v4971_v24 = vpop.f32.mrb[62].mxu0 }
 0x946   : > { %v4975_v38 = vadd.f32 %v2315_v14, %v2303_v8  ;;  %v2317_v61 = vmul.f32 %v4971_v24, %v4971_v24  ;;  %v4981_v33 = vpop.f32.mrb[63].mxu0 }
 0x947   : > { %v4985_v43 = vadd.f32 %v2316_v60, %v2304_v58  ;;  %v2318_v44 = vmul.f32 %v4981_v33, %v4981_v33 }
 0x948   : > { %v4991_v48 = vadd.f32 %v2317_v61, %v2305_v29 }
 0x949   : > { %v4993_v50 = vadd.f32 %v2318_v44, %v2306_v28 }
 0x94b   : > { %v4995_v62 = vpop.f32.mrb[64].mxu0 }
 0x94c   : > { %v2331_v18 = vmul.f32 %v4995_v62, %v4995_v62  ;;  %v4999_v30 = vpop.f32.mrb[65].mxu0 }
 0x94d   : > { %v2332_v8 = vmul.f32 %v4999_v30, %v4999_v30  ;;  %v5003_v14 = vpop.f32.mrb[66].mxu0 }
 0x94e   : > { %v5005_v58 = vadd.f32 %v2331_v18, %v2319_v1  ;;  %v2333_v60 = vmul.f32 %v5003_v14, %v5003_v14  ;;  %v5011_v61 = vpop.f32.mrb[67].mxu0 }
 0x94f   : > { %v5013_v28 = vadd.f32 %v2332_v8, %v2320_v25  ;;  %v2334_v44 = vmul.f32 %v5011_v61, %v5011_v61 }
 0x950   : > { %3532 = vrsqrt.f32 %v5005_v58  ;;  %v5020_v1 = vadd.f32 %v2333_v60, %v2321_v17  ;;  %vm2357_vm10 = vcmp.eq.f32.partialorder %v5005_v58, inf  ;;  %vm2359_vm5 = vcmp.eq.f32.partialorder %v5005_v58, 0.0 }
 0x951   : > { %3534 = vrsqrt.f32 %v5013_v28  ;;  %v5023_v18 = vadd.f32 %v2334_v44, %v2322_v0  ;;  %vm2364_vm11 = vcmp.eq.f32.partialorder %v5013_v28, inf  ;;  %vm2366_vm4 = vcmp.eq.f32.partialorder %v5013_v28, 0.0 }
 0x952   : > { %3536 = vrsqrt.f32 %v5020_v1  ;;  %vm2371_vm6 = vcmp.eq.f32.partialorder %v5020_v1, inf  ;;  %vm2373_vm9 = vcmp.eq.f32.partialorder %v5020_v1, 0.0  ;;  %v2374_v39 = vand.u32 2147483648, %v5020_v1 }
 0x953   : > { %3538 = vrsqrt.f32 %v5023_v18  ;;  %v5027_v25 = vpop.f32.mrb[68].mxu0  ;;  %vm2378_vm7 = vcmp.eq.f32.partialorder %v5023_v18, inf  ;;  %vm2380_vm8 = vcmp.eq.f32.partialorder %v5023_v18, 0.0  ;;  %v2381_v41 = vand.u32 2147483648, %v5023_v18 }
 0x954   : > { %5558 = vst [vmem:[#allocation37_spill] sm:$0xff] %v5027_v25  ;;  %v2335_v8 = vmul.f32 %v5027_v25, %v5027_v25  ;;  %v5031_v29 = vpop.f32.mrb[69].mxu0 }
 0x955   : > { %5559 = vst [vmem:[#allocation38_spill] sm:$0xff] %v5031_v29  ;;  %v2336_v10 = vmul.f32 %v5031_v29, %v5031_v29  ;;  %v5035_v17 = vpop.f32.mrb[70].mxu0 }
 0x956   : > { %5560 = vst [vmem:[#allocation39_spill] sm:$0xff] %v5035_v17  ;;  %v5037_v60 = vadd.f32 %v2335_v8, %v2323_v51  ;;  %v2337_v0 = vmul.f32 %v5035_v17, %v5035_v17  ;;  %v5043_v5 = vpop.f32.mrb[71].mxu0 }
 0x957   : > { %5561 = vst [vmem:[#allocation40_spill] sm:$0xff] %v5043_v5  ;;  %v5045_v47 = vadd.f32 %v2336_v10, %v2324_v4  ;;  %v2338_v63 = vmul.f32 %v5043_v5, %v5043_v5  ;;  %v2367_v4 = vand.u32 2147483648, %v5013_v28 }
 0x958   : > { %3540 = vrsqrt.f32 %v5037_v60  ;;  %v5052_v51 = vadd.f32 %v2337_v0, %v2325_v32  ;;  %v2360_v32 = vand.u32 2147483648, %v5005_v58  ;;  %vm2385_vm12 = vcmp.eq.f32.partialorder %v5037_v60, inf }
 0x959   : > { %3542 = vrsqrt.f32 %v5045_v47  ;;  %v5056_v8 = vadd.f32 %v2338_v63, %v2326_v57  ;;  %vm2387_vm13 = vcmp.eq.f32.partialorder %v5037_v60, 0.0  ;;  %vm2392_vm14 = vcmp.eq.f32.partialorder %v5045_v47, inf }
 0x95a   : > { %v3533_v10 = vpop.eup %3532  ;;  %3544 = vrsqrt.f32 %v5052_v51  ;;  %vm2394_vm15 = vcmp.eq.f32.partialorder %v5045_v47, 0.0  ;;  %vm2399_vm1 = vcmp.eq.f32.partialorder %v5052_v51, inf  ;;  %vm2401_vm3 = vcmp.eq.f32.partialorder %v5052_v51, 0.0 }
 0x95b   : > { %v3535_v0 = vpop.eup %3534  ;;  %3546 = vrsqrt.f32 %v5056_v8  ;;  %v5066_v63 = vpop.f32.mrb[72].mxu0  ;;  %v2356_v57 = vmul.f32 %v3533_v10, %v5005_v58  ;;  %vm2406_vm2 = vcmp.eq.f32.partialorder %v5056_v8, inf }
 0x95c   : > { %5562 = vst [vmem:[#allocation41_spill] sm:$0xff] %v5066_v63  ;;  %v3537_v44 = vpop.eup %3536  ;;  %v2339_v55 = vmul.f32 %v5066_v63, %v5066_v63  ;;  %v5073_v19 = vpop.f32.mrb[73].mxu0  ;;  %v2363_v27 = vmul.f32 %v3535_v0, %v5013_v28 }
 0x95d   : > { %v3539_v53 = vpop.eup %3538  ;;  %v2340_v35 = vmul.f32 %v5073_v19, %v5073_v19  ;;  %v5080_v12 = vpop.f32.mrb[74].mxu0  ;;  %v2370_v10 = vmul.f32 %v3537_v44, %v5020_v1 }
 0x95e   : > { %v5086_v15 = vadd.f32 %v2339_v55, %v4975_v38  ;;  %v2341_v0 = vmul.f32 %v5080_v12, %v5080_v12  ;;  %v5092_v17 = vpop.f32.mrb[75].mxu0  ;;  %v2365_v29 = vsel %vm2364_vm11, %v5013_v28, %v2363_v27  ;;  %v2358_v38 = vsel %vm2357_vm10, %v5005_v58, %v2356_v57 }
 0x95f   : > { %v5098_v44 = vadd.f32 %v2340_v35, %v4985_v43  ;;  %v2342_v5 = vmul.f32 %v5092_v17, %v5092_v17  ;;  %v2377_v27 = vmul.f32 %v3539_v53, %v5023_v18  ;;  %v2368_v43 = vsel %vm2366_vm4, %v2367_v4, %v2365_v29 }
 0x960   : > { %3548 = vrsqrt.f32 %v5086_v15  ;;  %v5109_v25 = vadd.f32 %v2341_v0, %v4991_v48  ;;  %v2372_v57 = vsel %vm2371_vm6, %v5020_v1, %v2370_v10  ;;  %v2361_v48 = vsel %vm2359_vm5, %v2360_v32, %v2358_v38 }
 0x961   : > { %3550 = vrsqrt.f32 %v5098_v44  ;;  %v5115_v35 = vadd.f32 %v2342_v5, %v4993_v50  ;;  %v2379_v53 = vsel %vm2378_vm7, %v5023_v18, %v2377_v27  ;;  %v2375_v5 = vsel %vm2373_vm9, %v2374_v39, %v2372_v57 }
 0x962   : > { %v3541_v55 = vpop.eup %3540  ;;  %3552 = vrsqrt.f32 %v5109_v25  ;;  %v2382_v29 = vsel %vm2380_vm8, %v2381_v41, %v2379_v53  ;;  %v2439_v28 = vpack.c.bf16 %v2375_v5, %v2361_v48  ;;  %v2395_v39 = vand.u32 2147483648, %v5045_v47 }
 0x963   : > { %v3543_v50 = vpop.eup %3542  ;;  %3554 = vrsqrt.f32 %v5115_v35  ;;  %v2384_v4 = vmul.f32 %v3541_v55, %v5037_v60  ;;  %v2440_v0 = vpack.c.bf16 %v2382_v29, %v2368_v43  ;;  %v2388_v41 = vand.u32 2147483648, %v5037_v60 }
 0x964   : > { %v3545_v10 = vpop.eup %3544  ;;  %v2391_v63 = vmul.f32 %v3543_v50, %v5045_v47  ;;  %v2402_v38 = vand.u32 2147483648, %v5052_v51  ;;  %v2409_v27 = vand.u32 2147483648, %v5056_v8  ;;  %vm2408_vm10 = vcmp.eq.f32.partialorder %v5056_v8, 0.0 }
 0x965   : > { %v3547_v58 = vpop.eup %3546  ;;  %v2386_v1 = vsel %vm2385_vm12, %v5037_v60, %v2384_v4  ;;  %v2398_v18 = vmul.f32 %v3545_v10, %v5052_v51  ;;  %2454 = vmatprep.subr.bf16.mxu1 %v2440_v0  ;;  %vm2420_vm11 = vcmp.eq.f32.partialorder %v5098_v44, inf  ;;  %vm2422_vm4 = vcmp.eq.f32.partialorder %v5098_v44, 0.0 }
 0x966   : > { %v2393_v32 = vsel %vm2392_vm14, %v5045_v47, %v2391_v63  ;;  %v2405_v55 = vmul.f32 %v3547_v58, %v5056_v8  ;;  %2455 = vmatpush1.bf16.msra.mxu1 %v2439_v28  ;;  %v2389_v63 = vsel %vm2387_vm13, %v2388_v41, %v2386_v1  ;;  %v2423_v60 = vand.u32 2147483648, %v5098_v44 }
 0x967   : > { %v2400_v43 = vsel %vm2399_vm1, %v5052_v51, %v2398_v18  ;;  %v2396_v48 = vsel %vm2394_vm15, %v2395_v39, %v2393_v32  ;;  %vm2413_vm5 = vcmp.eq.f32.partialorder %v5086_v15, inf  ;;  %vm2434_vm6 = vcmp.eq.f32.partialorder %v5115_v35, inf }
 0x968   : > { %v2407_v57 = vsel %vm2406_vm2, %v5056_v8, %v2405_v55  ;;  %v2403_v53 = vsel %vm2401_vm3, %v2402_v38, %v2400_v43  ;;  %v2416_v58 = vand.u32 2147483648, %v5086_v15  ;;  %vm2427_vm7 = vcmp.eq.f32.partialorder %v5109_v25, inf }
 0x969   : > { %v2410_v5 = vsel %vm2408_vm10, %v2409_v27, %v2407_v57  ;;  %v2441_v50 = vpack.c.bf16 %v2403_v53, %v2389_v63  ;;  %v2430_v18 = vand.u32 2147483648, %v5109_v25  ;;  %v2437_v32 = vand.u32 2147483648, %v5115_v35 }
 0x96a   : > { %v3549_v29 = vpop.eup %3548  ;;  %v2442_v28 = vpack.c.bf16 %v2410_v5, %v2396_v48  ;;  %vm2415_vm8 = vcmp.eq.f32.partialorder %v5086_v15, 0.0  ;;  %vm2429_vm9 = vcmp.eq.f32.partialorder %v5109_v25, 0.0  ;;  %vm2436_vm12 = vcmp.eq.f32.partialorder %v5115_v35, 0.0 }
 0x96b   : > { %v3551_v4 = vpop.eup %3550  ;;  %v2412_v51 = vmul.f32 %v3549_v29, %v5086_v15  ;;  %vm2450_vm13 = vcmask 654336   ;;  %vm2530_vm14 = vcmask 130048   ;;  %vm2599_vm15 = vcmask 1045504  }
 0x96c   : > { %v3553_v10 = vpop.eup %3552  ;;  %2456 = vmatprep.subr.bf16.mxu1 %v2442_v28  ;;  %v2419_v8 = vmul.f32 %v3551_v4, %v5098_v44  ;;  %v1003_v4 = vld [vmem:[%s5588_s12] sm:$0xf]  ;;  %vm2595_vm1 = vcmask 97280   ;;  %s3814_s12 = scalar_lea.vmem %s3813_s24, 256 }
 0x96d   : > { %v3555_v47 = vpop.eup %3554  ;;  %2457 = vmatpush1.bf16.msra.mxu1 %v2441_v50  ;;  %v2414_v0 = vsel %vm2413_vm5, %v5086_v15, %v2412_v51  ;;  %v2426_v39 = vmul.f32 %v3553_v10, %v5109_v25  ;;  %v3470_v15 = vld [vmem:[%s5563_s26] sm:$0x3f]   ;;  %s2842_s26 = scalar_lea.sflag [#allocation23], %s4395_s10  ;;  %p3816_p4 = scmp.lt.s32.totalorder %s3814_s12, %s3808_s21 }
 0x96e   : > { %v2421_v1 = vsel %vm2420_vm11, %v5098_v44, %v2419_v8  ;;  %v2433_v41 = vmul.f32 %v3555_v47, %v5115_v35  ;;  %v2417_v27 = vsel %vm2415_vm8, %v2416_v58, %v2414_v0  ;;  %v5564_v44 = vpack.c.bf16 %v4875_v52, %v4869_v6 }
 0x96f   : > { %v2428_v55 = vsel %vm2427_vm7, %v5109_v25, %v2426_v39  ;;  %v2424_v57 = vsel %vm2422_vm4, %v2423_v60, %v2421_v1  ;;  %v3471_v25 = vld [vmem:[#allocation16 + $0x4] ss:$8 sps:$4 sm:$0xff]   ;;  %v5569_v6 = vpack.c.bf16 %v4895_v11, %v4891_v54  ;;  %v5572_v52 = vpack.c.bf16 %v4951_v3, %v4937_v46  ;;  %v5585_v46 = vld [vmem:[#allocation41_spill] sm:$0xff]  ;;  %v1000_v3 = vld [vmem:[#allocation16 + $0x10] sm:$0xff]  ;;  %p3817_p6 = por %p3816_p4, %p3815_p12 }
 0x970   : > { %v2435_v38 = vsel %vm2434_vm6, %v5115_v35, %v2433_v41  ;;  %v2431_v43 = vsel %vm2429_vm9, %v2430_v18, %v2428_v55  ;;  %v5577_v54 = vpack.c.bf16 %v5003_v14, %v4995_v62  ;;  %v5579_v11 = vld [vmem:[#allocation38_spill] sm:$0xff] }
 0x971   : > { %v2438_v63 = vsel %vm2436_vm12, %v2437_v32, %v2435_v38  ;;  %v2443_v53 = vpack.c.bf16 %v2431_v43, %v2417_v27  ;;  %p3818_p13 = pnand %p3817_p6, %p3811_p0 }
 0x972   : > { %v2444_v48 = vpack.c.bf16 %v2438_v63, %v2424_v57 }
 0x974   : > { %2458 = vmatprep.subr.bf16.mxu1 %v2444_v48 }
 0x975   : > { %2459 = vmatpush1.bf16.msra.mxu1 %v2443_v53 }
 0x976   : > { %2460 = vmatprep.subr.bf16.mxu1 %v4808_v13  ;;  %v5565_v13 = vpack.c.bf16 %v4871_v21, %v4867_v26  ;;  %v5570_v26 = vpack.c.bf16 %v4923_v20, %v4909_v36  ;;  %v5571_v21 = vpack.c.bf16 %v4915_v16, %v4903_v23  ;;  %v5581_v23 = vld [vmem:[#allocation39_spill] sm:$0xff]  ;;  %v5582_v36 = vld [vmem:[#allocation37_spill] sm:$0xff]  ;;  %v5584_v20 = vpack.c.bf16 %v5092_v17, %v5073_v19 }
 0x977   : > { %v5583_v16 = vpack.c.bf16 %v5581_v23, %v5582_v36 }
 0x979   : > { %2461 = vmatpush1.bf16.msra.mxu1 %v4806_v2  ;;  %v5566_v2 = vpack.c.bf16 %v4887_v7, %v4881_v45  ;;  %v5574_v45 = vpack.c.bf16 %v4981_v33, %v4965_v22  ;;  %v5576_v7 = vpack.c.bf16 %v5011_v61, %v4999_v30  ;;  %v3272_v22 = vcombine.low %v1000_v3, %v1000_v3 }
 0x97a   : > { %2462 = vmatprep.subr.bf16.mxu1 %v4814_v34  ;;  %v5568_v34 = vpack.c.bf16 %v4899_v9, %v4893_v40  ;;  %v5578_v40 = vld [vmem:[#allocation40_spill] sm:$0xff] }
 0x97b   : > { %v5580_v9 = vpack.c.bf16 %v5578_v40, %v5579_v11 }
 0x97d   : > { %2463 = vmatpush1.bf16.msra.mxu1 %v4812_v56  ;;  %v5567_v56 = vpack.c.bf16 %v4883_v37, %v4879_v59  ;;  %v5573_v59 = vpack.c.bf16 %v4943_v49, %v4931_v42  ;;  %v5575_v37 = vpack.c.bf16 %v4971_v24, %v4959_v31  ;;  %v3473_v42 = vld [vmem:[#allocation16] ss:$8 sps:$4 sm:$0xff]   ;;  %v5586_v49 = vpack.c.bf16 %v5080_v12, %v5585_v46 }
 0x97e   : > { %2537 = vmatprep.subr.bf16.mxu1 %v5564_v44  ;;  %v3273_v31 = vcombine.high %v1000_v3, %v1000_v3  ;;  %v5587_v24 = vmov 0  }
 0x980   : > { %3269 = vmatmul.mubr.msk.bf16.vlgmr.msra.gmra.mrb[44].mxu1 %vm2450_vm13, %v3470_v15 }
 0x981   : > { %2538 = vmatpush1.bf16.msra.mxu1 %v5565_v13  ;;  %3274 = vmatprep.mubr.msk.bf16.mxu1 %vm2530_vm14, %v3471_v25 }
 0x982   : > { %2539 = vmatprep.subr.bf16.mxu1 %v5566_v2 }
 0x985   : > { %2540 = vmatpush1.bf16.msra.mxu1 %v5567_v56 }
 0x986   : > { %2541 = vmatprep.subr.bf16.mxu1 %v5568_v34 }
 0x989   : > { %2542 = vmatpush1.bf16.msra.mxu1 %v5569_v6 }
 0x98a   : > { %2543 = vmatprep.subr.bf16.mxu1 %v5570_v26 }
 0x98d   : > { %2544 = vmatpush1.bf16.msra.mxu1 %v5571_v21 }
 0x98e   : > { %2545 = vmatprep.subr.bf16.mxu1 %v5572_v52 }
 0x991   : > { %2546 = vmatpush1.bf16.msra.mxu1 %v5573_v59 }
 0x992   : > { %2547 = vmatprep.subr.bf16.mxu1 %v5574_v45 }
 0x995   : > { %2548 = vmatpush1.bf16.msra.mxu1 %v5575_v37 }
 0x996   : > { %2549 = vmatprep.subr.bf16.mxu1 %v5576_v7 }
 0x999   : > { %2550 = vmatpush1.bf16.msra.mxu1 %v5577_v54 }
 0x99a   : > { %2551 = vmatprep.subr.bf16.mxu1 %v5580_v9 }
 0x99d   : > { %2552 = vmatpush1.bf16.msra.mxu1 %v5583_v16 }
 0x99e   : > { %2553 = vmatprep.subr.bf16.mxu1 %v5584_v20 }
 0x9a1   : > { %2554 = vmatpush1.bf16.msra.mxu1 %v5586_v49 }
 0x9a4   : > { %2570 = vmatmul.mubr.bf16.vlgmr.msra.gmra.mrb[48].mxu1 %v3473_v42 }
 0x9a5   : > { %3275 = vmatprep.mubr.msk.bf16.mxu1 %vm2530_vm14, %v3273_v31 }
 0x9ac   : > { %2580 = vmatmul.mubr.bf16.gmra.mrb[52].mxu1 %v3272_v22 }
 0x9ad   : > { %2638 = vmatprep.mubr.bf16.mxu1 %v5587_v24 }
 0xa53   : > { %v2488_v33 = vpop.f32.mrb[44].mxu1 }
 0xa54   : > { %v2490_v62 = vpop.f32.mrb[45].mxu1 }
 0xa55   : > { %v2492_v30 = vpop.f32.mrb[46].mxu1 }
 0xa56   : > { %v2588_v19 = vpack.c.bf16 %v2492_v30, %v2488_v33  ;;  %v2738_v14 = vsel %vm1044_vm0, %v2492_v30, -inf  ;;  %v2494_v61 = vpop.f32.mrb[47].mxu1 }
 0xa57   : > { %v2739_v17 = vrot.slane %v2738_v14, 4  ;;  %v2589_v12 = vpack.c.bf16 %v2494_v61, %v2490_v62  ;;  %v2745_v35 = vsel %vm1044_vm0, %v2494_v61, -inf }
 0xa58   : > { %v2746_v5 = vrot.slane %v2745_v35, 4  ;;  %v2601_v50 = vsel %vm2599_vm15, %v2588_v19, 0 }
 0xa59   : > { %v2740_v29 = vmax.f32 %v2738_v14, %v2739_v17  ;;  %3276 = vmatprep.subr.msk.bf16.mxu1 %vm2599_vm15, %v2589_v12 }
 0xa5a   : > { %v2747_v28 = vmax.f32 %v2745_v35, %v2746_v5  ;;  %2607 = vmatpush1.bf16.msra.mxu1 %v2601_v50 }
 0xa5b   : > { %v2741_v51 = vrot.slane %v2740_v29, 2 }
 0xa5c   : > { %v2748_v10 = vrot.slane %v2747_v28, 2 }
 0xa5d   : > { %v2742_v8 = vmax.f32 %v2740_v29, %v2741_v51  ;;  %3277 = vmatmul.mubr.msk.bf16.vlgmr.msra.gmra.mrb[56].mxu1 %vm2595_vm1, %v1003_v4 }
 0xa5e   : > { %v2749_v60 = vmax.f32 %v2747_v28, %v2748_v10 }
 0xa5f   : > { %v2743_v47 = vrot.slane %v2742_v8, 1 }
 0xa60   : > { %v2750_v0 = vrot.slane %v2749_v60, 1 }
 0xa61   : > { %v2744_v58 = vmax.f32 %v2742_v8, %v2743_v47 }
 0xa62   : > { %v2751_v39 = vmax.f32 %v2749_v60, %v2750_v0 }
 0xa63   : > { %v2752_v1 = vsub.f32 %v2492_v30, %v2744_v58 }
 0xa64   : > { %v2753_v41 = vsub.f32 %v2494_v61, %v2751_v39 }
 0xa65   : > { %v2754_v18 = vmul.f32 1.442695, %v2752_v1 }
 0xa66   : > { %v2756_v32 = vmul.f32 1.442695, %v2753_v41 }
 0xa67   : > { %3556 = vpow2.f32 %v2754_v18 }
 0xa68   : > { %3558 = vpow2.f32 %v2756_v32 }
 0xa71   : > { %v3557_v55 = vpop.eup %3556 }
 0xa72   : > { %v3559_v38 = vpop.eup %3558  ;;  %v2758_v27 = vsel %vm1044_vm0, %v3557_v55, 0.0 }
 0xa73   : > { %v2759_v43 = vrot.slane %v2758_v27, 4  ;;  %v2765_v57 = vsel %vm1044_vm0, %v3559_v38, 0.0 }
 0xa74   : > { %v2766_v63 = vrot.slane %v2765_v57, 4 }
 0xa75   : > { %v2760_v53 = vadd.f32 %v2759_v43, %v2758_v27 }
 0xa76   : > { %v2767_v48 = vadd.f32 %v2766_v63, %v2765_v57 }
 0xa77   : > { %v2761_v15 = vrot.slane %v2760_v53, 2  ;;  %v5250_v25 = vpop.f32.mrb[48].mxu1 }
 0xa78   : > { %v2768_v44 = vrot.slane %v2767_v48, 2  ;;  %v5252_v13 = vpop.f32.mrb[49].mxu1 }
 0xa79   : > { %v2762_v2 = vadd.f32 %v2761_v15, %v2760_v53  ;;  %v5254_v56 = vpop.f32.mrb[50].mxu1 }
 0xa7a   : > { %v2769_v34 = vadd.f32 %v2768_v44, %v2767_v48  ;;  %v5256_v6 = vpop.f32.mrb[51].mxu1 }
 0xa7b   : > { %v2763_v26 = vrot.slane %v2762_v2, 1 }
 0xa7c   : > { %v2770_v21 = vrot.slane %v2769_v34, 1 }
 0xa7d   : > { %v2764_v52 = vadd.f32 %v2763_v26, %v2762_v2 }
 0xa7e   : > { %v2771_v59 = vadd.f32 %v2770_v21, %v2769_v34 }
 0xa7f   : > { %3560 = vrcp.f32 %v2764_v52  ;;  %v5260_v11 = vpop.f32.mrb[52].mxu1 }
 0xa80   : > { %3562 = vrcp.f32 %v2771_v59  ;;  %v5262_v9 = vpop.f32.mrb[53].mxu1 }
 0xa81   : > { %v2585_v23 = vpop.f32.mrb[54].mxu1 }
 0xa82   : > { %v2586_v36 = vpop.f32.mrb[55].mxu1 }
 0xa89   : > { %v3561_v45 = vpop.eup %3560 }
 0xa8a   : > { %v3563_v37 = vpop.eup %3562  ;;  %v2773_v7 = vmul.f32 %v3561_v45, %v3557_v55 }
 0xa8b   : > { %v2775_v54 = vmul.f32 %v3563_v37, %v3559_v38 }
 0xa8d   : > { %v2823_v40 = vcombine.low %v2773_v7, %v2775_v54 }
 0xa8f   : > { %2825 = vst [vmem:[%s925_s0] sm:$0xff] %v2823_v40 }
 0xa90   : > { %3821 = shalt.err (!%p3818_p13)
}
 0xa91   : > { %s3822_s0 = scalar_lea.hbm %s5271_s16, 128  ;;  %s3826_s5 = scalar_lea.hbm %s5590_s2, 256 }
 0xa92   : > { %p3823_p7 = scmp.ne.s32.totalorder %s5271_s16, %s3822_s0  ;;  %p3827_p10 = scmp.lt.u32.totalorder %s5271_s16, %s5590_s2 }
 0xa93   : > { %p3828_p1 = scmp.lt.u32.totalorder %s3826_s5, %s3822_s0  ;;  %p3830_p2 = scmp.lt.u32.totalorder %s3822_s0, %s5271_s16 }
 0xa94   : > { %p3824_p8 = pnand %p3823_p7, %p5591_p5 }
 0xa95   : > { %p3829_p3 = por %p3828_p1, %p3827_p10 }
 0xa96   : > { %p3825_p9 = pneg %p3824_p8 }
 0xa97   : > { %p3831_p11 = por %p3830_p2, %p3829_p3 }
 0xa99   : > { %p3832_p0 = pnand %p3831_p11, %p3825_p9 }
 0xa9b   : > { %3835 = shalt.err (!%p3832_p0)
}
 0xa9c   : > { %3335 = dma.vmem_to_hbm [thread:$0]  (%p5591_p5), %s2905_s1, 128, %s5271_s16, %s2842_s26   ;;  %v2593_v16 = vpop.permute.xlu0 %2592  ;;  %v3998_v33 = vmov 1966171168   ;;  %v2678_v30 = vlaneseq }
 0xa9d   : > { %v2676_v62 = vunpack.c.l.s4 %v3998_v33  ;;  %v3280_v50 = vld.sshfl [vmem:[%s4405_s9] sm:$0x5f pattern:$0x75316420]  ;;  %s5293_s7 = smul.u32 24, %s4395_s10  ;;  %s5592_s19 = sld [smem:[#allocation59_spill]] }
 0xa9e   : > { %v2679_v14 = vshrl.u32 %v2678_v30, 7  ;;  %v2674_v29 = vcombine.high %v3280_v50, %v3280_v50  ;;  %s5593_s16 = sld [smem:[#allocation60_spill]]  ;;  %s3999_s8 = smov [#allocation18]  }
 0xa9f   : > { %v2677_v19 = vunpack.c.0.s8 %v2676_v62  ;;  %s5303_s9 = scalar_lea.vmem [#allocation18], %s5293_s7  ;;  %s911_s26 = scalar_lea.vmem [#allocation19], %s5293_s7 }
 0xaa0   : > { %v2692_v4 = vsub.s32 0, %v2679_v14  ;;  %v2696_v8 = vsub.s32 1, %v2679_v14  ;;  %s2855_s1 = sshll.u32 %s5303_s9, 4  ;;  %s2871_s21 = sshll.u32 %s911_s26, 4  ;;  %s5313_s1 = int_to_ptr.vmem [resolvable:$true] %s2855_s1  ;;  %s5321_s21 = int_to_ptr.vmem [resolvable:$true] %s2871_s21 }
 0xaa1   : > { %v2680_v35 = vsub.s32 %v2677_v19, %v2679_v14  ;;  %s3836_s0 = scalar_lea.vmem %s5313_s1, 384  ;;  %s3840_s5 = sshll.u32 %s3999_s8, 4  ;;  %s3841_s5 = int_to_ptr.vmem [resolvable:$false] %s3840_s5 }
 0xaa2   : > { %p3837_p12 = scmp.ne.s32.totalorder %s5313_s1, %s3836_s0  ;;  %s3842_s24 = scalar_lea.vmem %s3841_s5, 768 }
 0xaa3   : > { %v2681_v28 = vrot.slane %v3280_v50, %v2680_v35  ;;  %v2688_v51 = vrot.slane %v2674_v29, %v2680_v35  ;;  %s5311_s22 = scalar_lea.hbm %s5592_s19, %s5265_s3  ;;  %p3843_p13 = scmp.lt.s32.totalorder %s5313_s1, %s3841_s5 }
 0xaa4   : > { %s5319_s2 = scalar_lea.hbm %s5593_s16, %s5265_s3  ;;  %p3838_p4 = pnand %p3837_p12, %p5591_p5 }
 0xaa5   : > { %v2689_v10 = vcombine.high %v2681_v28, %v2681_v28  ;;  %v2693_v60 = vrot.slane %v2681_v28, %v2692_v4  ;;  %v2697_v0 = vrot.slane %v2681_v28, %v2696_v8  ;;  %v2701_v58 = vrot.slane %v2688_v51, %v2692_v4  ;;  %p3844_p7 = scmp.lt.s32.totalorder %s3842_s24, %s3836_s0 }
 0xaa6   : > { %v2705_v55 = vrot.slane %v2688_v51, %v2696_v8  ;;  %p3839_p6 = pneg %p3838_p4 }
 0xaa7   : > { %v2709_v39 = vrot.slane %v2689_v10, %v2692_v4  ;;  %v2713_v57 = vrot.slane %v2689_v10, %v2696_v8  ;;  %p3845_p8 = por %p3844_p7, %p3843_p13 }
 0xaa9   : > { %p3846_p9 = pnand %p3845_p8, %p3839_p6 }
 0xb30   : > { %v2640_v20 = vpop.f32.mrb[56].mxu1 }
 0xb31   : > { %v2641_v42 = vadd.f32 %v2640_v20, %v2593_v16  ;;  %v2642_v46 = vpop.f32.mrb[57].mxu1 }
 0xb32   : > { %v2643_v49 = vadd.f32 %v2642_v46, %v2593_v16  ;;  %v2644_v3 = vpop.f32.mrb[58].mxu1 }
 0xb33   : > { %v3278_v31 = vmul.f32 -1.442695, %v2641_v42  ;;  %v2645_v22 = vpop.f32.mrb[59].mxu1 }
 0xb34   : > { %v3279_v24 = vmul.f32 -1.442695, %v2643_v49 }
 0xb35   : > { %3564 = vpow2.f32 %v3278_v31 }
 0xb36   : > { %3566 = vpow2.f32 %v3279_v24 }
 0xb3f   : > { %v3565_v61 = vpop.eup %3564 }
 0xb40   : > { %v3567_v17 = vpop.eup %3566  ;;  %v2653_v12 = vadd.f32 1.0, %v3565_v61 }
 0xb41   : > { %v2654_v5 = vadd.f32 1.0, %v3567_v17 }
 0xb42   : > { %3568 = vrcp.f32 %v2653_v12 }
 0xb43   : > { %3570 = vrcp.f32 %v2654_v5 }
 0xb4c   : > { %v3569_v47 = vpop.eup %3568 }
 0xb4d   : > { %v3571_v1 = vpop.eup %3570  ;;  %v2659_v41 = vmul.f32 %v3569_v47, %v5250_v25  ;;  %v2661_v18 = vmul.f32 %v3569_v47, %v5254_v56  ;;  %v2663_v32 = vmul.f32 %v3569_v47, %v5260_v11 }
 0xb4e   : > { %v2660_v38 = vmul.f32 %v3571_v1, %v5252_v13  ;;  %v2662_v27 = vmul.f32 %v3571_v1, %v5256_v6  ;;  %v2664_v43 = vmul.f32 %v3571_v1, %v5262_v9 }
 0xb4f   : > { %v2726_v63 = vmul.f32 1.442695, %v2659_v41  ;;  %v2730_v53 = vmul.f32 1.442695, %v2661_v18  ;;  %v2734_v48 = vmul.f32 1.442695, %v2663_v32  ;;  %v2720_v15 = vadd.f32 %v2693_v60, %v2659_v41 }
 0xb50   : > { %v2728_v25 = vmul.f32 1.442695, %v2660_v38  ;;  %v2732_v44 = vmul.f32 1.442695, %v2662_v27  ;;  %v2736_v2 = vmul.f32 1.442695, %v2664_v43  ;;  %v2721_v56 = vadd.f32 %v2697_v0, %v2660_v38 }
 0xb51   : > { %3572 = vpow2.f32 %v2726_v63  ;;  %v2722_v13 = vadd.f32 %v2701_v58, %v2661_v18  ;;  %v2723_v34 = vadd.f32 %v2705_v55, %v2662_v27  ;;  %v2724_v6 = vadd.f32 %v2709_v39, %v2663_v32 }
 0xb52   : > { %3574 = vpow2.f32 %v2730_v53  ;;  %v2725_v26 = vadd.f32 %v2713_v57, %v2664_v43  ;;  %v2797_v21 = vcombine.low %v2720_v15, %v2721_v56  ;;  %v2782_v52 = vcombine.low %v2659_v41, %v2660_v38 }
 0xb53   : > { %3576 = vpow2.f32 %v2734_v48  ;;  %v2798_v59 = vcombine.low %v2722_v13, %v2723_v34  ;;  %v2783_v45 = vcombine.low %v2661_v18, %v2662_v27  ;;  %v2784_v37 = vcombine.low %v2663_v32, %v2664_v43 }
 0xb54   : > { %3578 = vpow2.f32 %v2728_v25  ;;  %v2799_v7 = vcombine.low %v2724_v6, %v2725_v26  ;;  %2803 = vst [vmem:[%s911_s26] sm:$0xff] %v2797_v21  ;;  %2788 = vst [vmem:[%s5303_s9] sm:$0xff] %v2782_v52 }
 0xb55   : > { %3580 = vpow2.f32 %v2732_v44  ;;  %2804 = vst [vmem:[%s911_s26 + $0x8] sm:$0xff] %v2798_v59  ;;  %2789 = vst [vmem:[%s5303_s9 + $0x8] sm:$0xff] %v2783_v45 }
 0xb56   : > { %2790 = vst [vmem:[%s5303_s9 + $0x10] sm:$0xff] %v2784_v37  ;;  %3582 = vpow2.f32 %v2736_v2  ;;  %2805 = vst [vmem:[%s911_s26 + $0x10] sm:$0xff] %v2799_v7 }
 0xb57   : > { %3849 = shalt.err (!%p3846_p9)
}
 0xb58   : > { %s3850_s9 = scalar_lea.hbm %s5311_s22, 384  ;;  %s3854_s8 = scalar_lea.hbm %s5592_s19, 768 }
 0xb59   : > { %p3851_p10 = scmp.ne.s32.totalorder %s5311_s22, %s3850_s9  ;;  %p3855_p2 = scmp.lt.u32.totalorder %s5311_s22, %s5592_s19 }
 0xb5a   : > { %p3856_p11 = scmp.lt.u32.totalorder %s3854_s8, %s3850_s9  ;;  %p3858_p12 = scmp.lt.u32.totalorder %s3850_s9, %s5311_s22 }
 0xb5b   : > { %p3852_p1 = pnand %p3851_p10, %p5591_p5 }
 0xb5c   : > { %p3857_p0 = por %p3856_p11, %p3855_p2 }
 0xb5d   : > { %p3853_p3 = pneg %p3852_p1 }
 0xb5e   : > { %p3859_p4 = por %p3858_p12, %p3857_p0 }
 0xb60   : > { %p3860_p6 = pnand %p3859_p4, %p3853_p3 }
 0xb62   : > { %3863 = shalt.err (!%p3860_p6)
}
 0xb63   : > { %s4000_s0 = smov 128   ;;  %s4001_s12 = smov 256  }
 0xb64   : > { %s4002_s24 = smov 8   ;;  %s5594_s11 = scalar_lea.sflag [#allocation6], %s4395_s10 }
 0xb65   : > { %3332 = dma.vmem_to_hbm [thread:$0]  (%p5591_p5), %s5313_s1, 384, %s5311_s22, %s5594_s11, %s4000_s0, %s4001_s12, %s4002_s24  }
 0xb66   : > { %s5595_s9 = sand.u32 1, %s4141_s4   ;;  %s3864_s8 = scalar_lea.vmem %s5321_s21, 384 }
 0xb67   : > { %s5355_s26 = scalar_lea.sflag [#allocation20], %s5595_s9  ;;  %p3865_p13 = scmp.ne.s32.totalorder %s5321_s21, %s3864_s8 }
 0xb68   : > { %s4003_s5 = smov [#allocation19]  }
 0xb69   : > { %p3866_p7 = pnand %p3865_p13, %p5591_p5  ;;  %s3868_s13 = sshll.u32 %s4003_s5, 4  ;;  %s3869_s13 = int_to_ptr.vmem [resolvable:$false] %s3868_s13 }
 0xb6a   : > { %s3870_s14 = scalar_lea.vmem %s3869_s13, 768  ;;  %p3871_p9 = scmp.lt.s32.totalorder %s5321_s21, %s3869_s13 }
 0xb6b   : > { %p3867_p8 = pneg %p3866_p7  ;;  %p3872_p10 = scmp.lt.s32.totalorder %s3870_s14, %s3864_s8 }
 0xb6d   : > { %p3873_p1 = por %p3872_p10, %p3871_p9 }
 0xb6f   : > { %p3874_p3 = pnand %p3873_p1, %p3867_p8 }
 0xb71   : > { %3877 = shalt.err (!%p3874_p3)
}
 0xb72   : > { %s3878_s4 = scalar_lea.hbm %s5319_s2, 384  ;;  %s3882_s22 = scalar_lea.hbm %s5593_s16, 768 }
 0xb73   : > { %p3879_p2 = scmp.ne.s32.totalorder %s5319_s2, %s3878_s4  ;;  %p3883_p12 = scmp.lt.u32.totalorder %s5319_s2, %s5593_s16 }
 0xb74   : > { %p3884_p4 = scmp.lt.u32.totalorder %s3882_s22, %s3878_s4  ;;  %p3886_p13 = scmp.lt.u32.totalorder %s3878_s4, %s5319_s2 }
 0xb75   : > { %p3880_p11 = pnand %p3879_p2, %p5591_p5 }
 0xb76   : > { %p3885_p6 = por %p3884_p4, %p3883_p12 }
 0xb77   : > { %p3881_p0 = pneg %p3880_p11 }
 0xb78   : > { %p3887_p7 = por %p3886_p13, %p3885_p6 }
 0xb7a   : > { %p3888_p8 = pnand %p3887_p7, %p3881_p0 }
 0xb7c   : > { %3891 = shalt.err (!%p3888_p8)
}
 0xb7d   : > { %3333 = dma.vmem_to_hbm [thread:$0]  (%p5591_p5), %s5321_s21, 384, %s5319_s2, %s5355_s26, %s4000_s0, %s4001_s12, %s4002_s24   ;;  %v3573_v54 = vpop.eup %3572 }
 0xb7e   : > { %v3575_v40 = vpop.eup %3574  ;;  %s918_s14 = scalar_lea.vmem [#allocation21], %s5293_s7  ;;  %s5596_s4 = sld [smem:[#allocation61_spill]] }
 0xb7f   : > { %v3577_v11 = vpop.eup %3576  ;;  %s2887_s9 = sshll.u32 %s918_s14, 4  ;;  %s4004_s7 = smov [#allocation21]   ;;  %s5389_s9 = int_to_ptr.vmem [resolvable:$true] %s2887_s9 }
 0xb80   : > { %v3579_v9 = vpop.eup %3578  ;;  %s3892_s2 = scalar_lea.vmem %s5389_s9, 384  ;;  %s3896_s21 = sshll.u32 %s4004_s7, 4  ;;  %s3897_s21 = int_to_ptr.vmem [resolvable:$false] %s3896_s21 }
 0xb81   : > { %v3581_v23 = vpop.eup %3580  ;;  %v2812_v36 = vcombine.high %v3573_v54, %v3579_v9  ;;  %p3893_p9 = scmp.ne.s32.totalorder %s5389_s9, %s3892_s2  ;;  %s3898_s1 = scalar_lea.vmem %s3897_s21, 768 }
 0xb82   : > { %v3583_v16 = vpop.eup %3582  ;;  %v2813_v20 = vcombine.high %v3575_v40, %v3581_v23  ;;  %p3899_p3 = scmp.lt.s32.totalorder %s5389_s9, %s3897_s21  ;;  %p3900_p2 = scmp.lt.s32.totalorder %s3898_s1, %s3892_s2 }
 0xb83   : > { %v2814_v42 = vcombine.high %v3577_v11, %v3583_v16  ;;  %2818 = vst [vmem:[%s918_s14] sm:$0xff] %v2812_v36  ;;  %p3894_p10 = pnand %p3893_p9, %p5591_p5 }
 0xb84   : > { %s5387_s10 = scalar_lea.hbm %s5596_s4, %s5265_s3  ;;  %2819 = vst [vmem:[%s918_s14 + $0x8] sm:$0xff] %v2813_v20  ;;  %p3901_p11 = por %p3900_p2, %p3899_p3 }
 0xb85   : > { %2820 = vst [vmem:[%s918_s14 + $0x10] sm:$0xff] %v2814_v42  ;;  %p3895_p1 = pneg %p3894_p10 }
 0xb87   : > { %p3902_p0 = pnand %p3901_p11, %p3895_p1 }
 0xb89   : > { %3905 = shalt.err (!%p3902_p0)
}
 0xb8a   : > { %s3906_s3 = scalar_lea.hbm %s5387_s10, 384  ;;  %s3910_s13 = scalar_lea.hbm %s5596_s4, 768 }
 0xb8b   : > { %p3907_p12 = scmp.ne.s32.totalorder %s5387_s10, %s3906_s3  ;;  %p3911_p13 = scmp.lt.u32.totalorder %s5387_s10, %s5596_s4 }
 0xb8c   : > { %p3912_p7 = scmp.lt.u32.totalorder %s3910_s13, %s3906_s3  ;;  %p3914_p9 = scmp.lt.u32.totalorder %s3906_s3, %s5387_s10 }
 0xb8d   : > { %p3908_p4 = pnand %p3907_p12, %p5591_p5 }
 0xb8e   : > { %p3913_p8 = por %p3912_p7, %p3911_p13 }
 0xb8f   : > { %p3909_p6 = pneg %p3908_p4 }
 0xb90   : > { %p3915_p10 = por %p3914_p9, %p3913_p8 }
 0xb92   : > { %p3916_p1 = pnand %p3915_p10, %p3909_p6 }
 0xb94   : > { %3919 = shalt.err (!%p3916_p1)
}
 0xb95   : > { %3334 = dma.vmem_to_hbm [thread:$0]  (%p5591_p5), %s5389_s9, 384, %s5387_s10, %s5355_s26, %s4000_s0, %s4001_s12, %s4002_s24  }
 0xb96 PF: > { %s5597_s5 = sld [smem:[#allocation32_spill]]  ;;  %s5598_s2 = sld [smem:[#allocation36_spill]] }
 0xb97   : > { %p5600_p2 = scmp.ge.s32.totalorder %s3982_s30, 2 }
 0xb9c   : > { %s2916_s7 = sand.u32 1, %s5597_s5   ;;  %p5599_p3 = scmp.ne.s32.totalorder %s5598_s2, 0 }
 0xb9d   : > { %s2917_s21 = scalar_lea.sflag [#allocation6], %s2916_s7 }
 0xb9e   : > { %p3363_p11 = pnand %p5600_p2, %p5599_p3 }
 0xba0   : > { %3957 = dma.done.wait (!%p3363_p11), %s2917_s21, 384  }
 0xba1   : > { %3959 = vsyncadd (!%p3363_p11), %s2917_s21, 4294966912  ;;  %s5601_s6 = sadd.s32 4294967294, %s3982_s30  }
 0xba2   : > { %s2925_s1 = sand.u32 1, %s5601_s6  }
 0xba3   : > { %s2926_s3 = scalar_lea.sflag [#allocation20], %s2925_s1 }
 0xba4   : > { %3961 = dma.done.wait (!%p3363_p11), %s2926_s3, 768  }
 0xba5   : > { %3963 = vsyncadd (!%p3363_p11), %s2926_s3, 4294966528  ;;  %s2944_s22 = scalar_lea.sflag [#allocation23], %s2916_s7 }
 0xba6   : > { %3965 = dma.done.wait (!%p3363_p11), %s2944_s22, 128  }
 0xba7   : > { %3967 = vsyncadd (!%p3363_p11), %s2944_s22, 4294967168  ;;  %s5602_s30 = sld [smem:[#allocation33_spill]]  ;;  %s5603_s0 = sld [smem:[#allocation34_spill]] }
 0xba8   : > { %s5604_s3 = smov %s3974_s28  ;;  %s5605_s28 = smov %s3978_s29 }
 0xbad   : > { %p46_p5 = scmp.ge.s32.totalorder %s5602_s30, 4   ;;  %s5606_s29 = smov %s5603_s0 }
 0xbaf   :  { %48 = sbr.rel (!%p46_p5) target bundleno = 35 (0x23), region = 280 }
 0xbb6   :  { %2949 = vsyncpa [#allocation5], 1 }
 0xbb7   :  { %2951 = vsyncpa [#allocation5 + $0x1], 1 }
 0xbb8   :  { %2952 = vsyncpa [#allocation8], 1 }
 0xbb9   :  { %2953 = vsyncpa [#allocation11], 1 }
 0xbba   :  { %2954 = vsyncpa [#allocation14], 1 }
 0xbbb   :  { %2955 = vsyncpa [#allocation17], 1 }
 0xbbc   :  { %2956 = vsyncpa [#allocation6], 1 }
 0xbbd   :  { %2958 = vsyncpa [#allocation6 + $0x1], 1 }
 0xbbe   :  { %2959 = vsyncpa [#allocation20], 1 }
 0xbbf   :  { %2961 = vsyncpa [#allocation20 + $0x1], 1 }
 0xbc0   :  { %2962 = vsyncpa [#allocation23], 1 }
 0xbc1   :  { %2964 = vsyncpa [#allocation23 + $0x1], 1 }

</bundles_post_ra>
